<compile_context>
chip_gen: v7x
topology: tpu7x:2x2x1
jax: 0.10.0
libtpu: 0.0.40
codegen_flags: <defaults>
</compile_context>

<pallas_src>
import functools

import jax
import jax.numpy as jnp
from jax.experimental import pallas as pl
from jax.experimental.pallas import tpu as pltpu

HIDDEN = 2048
PATCH = 14
_MiB = 1 << 20


def _round_up(x, m):
    return ((x + m - 1) // m) * m


def _tpu_config():
    """Pick tiling / VMEM budget from the TPU generation (defensive)."""
    kind = ""
    try:
        kind = (jax.devices()[0].device_kind or "").lower()
    except Exception:
        pass
    vmem = None
    try:
        vmem = int(pltpu.get_tpu_info().vmem_capacity_bytes)
    except Exception:
        vmem = None
    if vmem is None:
        # Fall back to the device-kind string if the info query fails.
        if "v7" in kind:
            vmem = 64 * _MiB
        elif any(t in kind for t in ("v4", "v5", "v6")):
            vmem = 128 * _MiB

    if vmem is not None and vmem >= 100 * _MiB and "v7" not in kind:
        # 128 MiB VMEM parts: keep the 24 MiB hidden weight stack resident.
        return {"tm_cap": 512, "resident": True, "vmem_limit": 100 * _MiB}
    if vmem is not None and vmem >= 56 * _MiB:
        # v7x-class (64 MiB/TC): stream one 8 MiB weight layer at a time.
        return {"tm_cap": 512, "resident": False, "vmem_limit": 48 * _MiB}
    # Unknown / small-VMEM fallback: conservative tiling.
    return {"tm_cap": 256, "resident": False, "vmem_limit": 32 * _MiB}


def _choose_m_tile(M, cap, min_tiles=2):
    """M tile: as large as the cap allows, but try to expose >=min_tiles tiles
    (dual-TensorCore parts) without going below 128 rows."""
    tm = min(cap, _round_up(M, 16))
    while min_tiles > 1 and tm > 128 and -(-M // tm) < min_tiles:
        tm = max(128, _round_up(tm // 2, 16))
    return tm


def _pick_n_tile(K, N):
    """Full-N weight block when it is small enough to stay VMEM resident."""
    if K * N * 2 <= 8 * _MiB:
        return N
    for t in (1024, 512, 256, 128):
        if N % t == 0:
            return t
    return N


# ----------------------------------------------------------------------------
# Kernel 1: out = act(x @ w + b).  Full-K blocks, grid = (M tiles, N tiles),
# no accumulator scratch; the (K, tn) weight block has a constant/i-independent
# index_map so it is fetched from HBM once and reused for every M tile.
# ----------------------------------------------------------------------------
def _matmul_bias_act_kernel(x_ref, w_ref, b_ref, o_ref, *, apply_tanh):
    z = jnp.dot(x_ref[...], w_ref[...], preferred_element_type=jnp.float32)
    z = z + b_ref[...].astype(jnp.float32)
    if apply_tanh:
        z = jnp.tanh(z)
    o_ref[...] = z.astype(o_ref.dtype)


def matmul_bias_act(x, w, b, *, apply_tanh, tm, out_dtype, vmem_limit):
    """x: (M, K) bf16, w: (K, N) bf16, b: (N,) f32 -> (M, N) out_dtype."""
    M, K = x.shape
    K2, N = w.shape
    assert K == K2 and b.shape == (N,)
    assert M % tm == 0
    tn = _pick_n_tile(K, N)
    grid = (M // tm, N // tn)

    kernel = functools.partial(_matmul_bias_act_kernel, apply_tanh=apply_tanh)
    return pl.pallas_call(
        kernel,
        out_shape=jax.ShapeDtypeStruct((M, N), out_dtype),
        grid_spec=pltpu.PrefetchScalarGridSpec(
            num_scalar_prefetch=0,
            grid=grid,
            in_specs=[
                pl.BlockSpec((tm, K), lambda i, j: (i, 0)),
                pl.BlockSpec((K, tn), lambda i, j: (0, j)),   # i-independent
                pl.BlockSpec((1, tn), lambda i, j: (0, j)),
            ],
            out_specs=pl.BlockSpec((tm, tn), lambda i, j: (i, j)),
        ),
        compiler_params=pltpu.CompilerParams(
            dimension_semantics=("parallel", "parallel"),
            vmem_limit_bytes=vmem_limit,
        ),
    )(x, w, b.reshape(1, N))


# ----------------------------------------------------------------------------
# Kernel 2a (big-VMEM parts): three fused Linear(D,D)+Tanh layers, weights
# VMEM-resident.  grid = (M tiles,); the (L, D, D) weight stack and (L, 1, D)
# bias use constant index_maps, so they are DMA'd once for the whole call.
# The layer loop is unrolled with static weight indices (no pl.when needed).
# ----------------------------------------------------------------------------
def _fused_resident_kernel(x_ref, w_ref, b_ref, o_ref, *, n_layers):
    h = x_ref[...]
    for l in range(n_layers):
        z = jnp.dot(h, w_ref[l], preferred_element_type=jnp.float32)
        z = z + b_ref[l].astype(jnp.float32)
        h = jnp.tanh(z).astype(jnp.bfloat16)
    o_ref[...] = h


# ----------------------------------------------------------------------------
# Kernel 2b (small-VMEM parts): grid = (M tiles, layer).  One full 8 MiB
# weight layer is streamed per step (double-buffered by the pipeline), the
# activation stays resident in a (tm, D) bf16 VMEM scratch between layers and
# only the final layer's activation is written out.  The x block index is
# constant over the layer axis, so x is fetched only when the M tile changes.
# ----------------------------------------------------------------------------
def _fused_streamed_kernel(x_ref, w_ref, b_ref, o_ref, h_ref):
    l = pl.program_id(1)
    n_layers = pl.num_programs(1)

    @pl.when(l == 0)
    def _():
        h_ref[...] = x_ref[...]

    z = jnp.dot(h_ref[...], w_ref[0], preferred_element_type=jnp.float32)
    act = jnp.tanh(z + b_ref[0].astype(jnp.float32)).astype(jnp.bfloat16)

    @pl.when(l < n_layers - 1)
    def _():
        h_ref[...] = act            # single whole-tile store (no scatter loop)

    @pl.when(l == n_layers - 1)
    def _():
        o_ref[...] = act


def fused_hidden_layers(x, w_stack, b_stack, *, tm, resident, vmem_limit):
    """x: (M, D) bf16, w_stack: (L, D, D) bf16, b_stack: (L, D) f32 -> (M, D) bf16."""
    M, D = x.shape
    L = w_stack.shape[0]
    assert w_stack.shape == (L, D, D) and b_stack.shape == (L, D)
    assert M % tm == 0
    b3 = b_stack.reshape(L, 1, D)

    if resident:
        return pl.pallas_call(
            functools.partial(_fused_resident_kernel, n_layers=L),
            out_shape=jax.ShapeDtypeStruct((M, D), jnp.bfloat16),
            grid_spec=pltpu.PrefetchScalarGridSpec(
                num_scalar_prefetch=0,
                grid=(M // tm,),
                in_specs=[
                    pl.BlockSpec((tm, D), lambda i: (i, 0)),
                    pl.BlockSpec((L, D, D), lambda i: (0, 0, 0)),  # resident
                    pl.BlockSpec((L, 1, D), lambda i: (0, 0, 0)),  # resident
                ],
                out_specs=pl.BlockSpec((tm, D), lambda i: (i, 0)),
            ),
            compiler_params=pltpu.CompilerParams(
                dimension_semantics=("parallel",),
                vmem_limit_bytes=vmem_limit,
            ),
        )(x, w_stack, b3)

    return pl.pallas_call(
        _fused_streamed_kernel,
        out_shape=jax.ShapeDtypeStruct((M, D), jnp.bfloat16),
        grid_spec=pltpu.PrefetchScalarGridSpec(
            num_scalar_prefetch=0,
            grid=(M // tm, L),
            in_specs=[
                pl.BlockSpec((tm, D), lambda i, l: (i, 0)),      # no re-DMA over l
                pl.BlockSpec((1, D, D), lambda i, l: (l, 0, 0)),
                pl.BlockSpec((1, 1, D), lambda i, l: (l, 0, 0)),
            ],
            out_specs=pl.BlockSpec((tm, D), lambda i, l: (i, 0)),
            scratch_shapes=[pltpu.VMEM((tm, D), jnp.bfloat16)],
        ),
        compiler_params=pltpu.CompilerParams(
            dimension_semantics=("parallel", "arbitrary"),
            vmem_limit_bytes=vmem_limit,
        ),
    )(x, w_stack, b3)


# ----------------------------------------------------------------------------
# Parameters: deterministic PyTorch-default-style uniform init (f32 master),
# then a kernel-ready copy: bf16 weights, padded K/N, stacked hidden layers.
# ----------------------------------------------------------------------------
def init_params(key, in_channels, out_channels, hidden=HIDDEN, patch=PATCH):
    def linear_init(k, fan_in, fan_out):
        kw, kb = jax.random.split(k)
        bound = 1.0 / jnp.sqrt(fan_in)
        w = jax.random.uniform(kw, (fan_in, fan_out), jnp.float32, -bound, bound)
        b = jax.random.uniform(kb, (fan_out,), jnp.float32, -bound, bound)
        return w, b

    keys = jax.random.split(key, 5)
    params = {}
    # Conv2d(in_ch, 2048, k=14, s=14) == Linear(in_ch*14*14 -> 2048) on im2col
    # patches laid out in (c, kh, kw) order.
    params["w_in"], params["b_in"] = linear_init(
        keys[0], in_channels * patch * patch, hidden)
    params["w1"], params["b1"] = linear_init(keys[1], hidden, hidden)
    params["w2"], params["b2"] = linear_init(keys[2], hidden, hidden)
    params["w3"], params["b3"] = linear_init(keys[3], hidden, hidden)
    params["w4"], params["b4"] = linear_init(
        keys[4], hidden, out_channels * patch * patch)
    return params


def prepare_params(params, in_channels, out_channels, patch=PATCH):
    kin = in_channels * patch * patch
    kin_pad = _round_up(kin, 128)
    nout = out_channels * patch * patch
    nout_pad = _round_up(nout, 128)

    w_in = jnp.pad(params["w_in"], ((0, kin_pad - kin), (0, 0)))
    w_out = jnp.pad(params["w4"], ((0, 0), (0, nout_pad - nout)))
    b_out = jnp.pad(params["b4"], (0, nout_pad - nout))
    w_hidden = jnp.stack([params["w1"], params["w2"], params["w3"]])
    b_hidden = jnp.stack([params["b1"], params["b2"], params["b3"]])

    return {
        "w_in": w_in.astype(jnp.bfloat16),
        "b_in": params["b_in"].astype(jnp.float32),
        "w_hidden": w_hidden.astype(jnp.bfloat16),
        "b_hidden": b_hidden.astype(jnp.float32),
        "w_out": w_out.astype(jnp.bfloat16),
        "b_out": b_out.astype(jnp.float32),
    }


# ----------------------------------------------------------------------------
# Forward pass (matches MLP_Net.forward semantics).
# ----------------------------------------------------------------------------
def mlp_net_forward(x, kparams, out_channels, *, config=None, patch=PATCH):
    if config is None:
        config = _tpu_config()
    B, C, H, W = x.shape
    # F.pad(x, (0, 13-(W-1)%14, 0, 13-(H-1)%14)): right/bottom pad to mult of 14
    pad_h = (patch - 1) - (H - 1) % patch
    pad_w = (patch - 1) - (W - 1) % patch
    xp = jnp.pad(x, ((0, 0), (0, 0), (0, pad_h), (0, pad_w)))
    Hp, Wp = H + pad_h, W + pad_w
    n1, n2 = Hp // patch, Wp // patch

    # im2col: stride-14 14x14 conv == matmul over (c, kh, kw)-ordered patches;
    # row order (b, hp, wp) matches patches.view(b,c,-1).transpose(1,2).
    patches = xp.reshape(B, C, n1, patch, n2, patch)
    patches = patches.transpose(0, 2, 4, 1, 3, 5).reshape(
        B * n1 * n2, C * patch * patch)

    M = B * n1 * n2
    tm = _choose_m_tile(M, config["tm_cap"], min_tiles=2)
    Mp = _round_up(M, tm)
    kin = C * patch * patch
    kin_pad = kparams["w_in"].shape[0]
    nout = out_channels * patch * patch

    # bf16 activations; zero-pad rows (M -> Mp) and the first-layer reduction
    # dim (kin -> 128-multiple).  Both pads are sliced off below.
    patches = jnp.pad(patches.astype(jnp.bfloat16),
                      ((0, Mp - M), (0, kin_pad - kin)))

    vl = config["vmem_limit"]
    # patch embedding + tanh
    h = matmul_bias_act(patches, kparams["w_in"], kparams["b_in"],
                        apply_tanh=True, tm=tm, out_dtype=jnp.bfloat16,
                        vmem_limit=vl)
    # 3 x (Linear(2048,2048) + Tanh), fused into one kernel
    h = fused_hidden_layers(h, kparams["w_hidden"], kparams["b_hidden"],
                            tm=tm, resident=config["resident"], vmem_limit=vl)
    # final Linear(2048, out*14*14) (padded N), no activation
    y = matmul_bias_act(h, kparams["w_out"], kparams["b_out"],
                        apply_tanh=False, tm=tm, out_dtype=jnp.float32,
                        vmem_limit=vl)

    y = y[:M, :nout]
    # patch_recover + crop back to original spatial size
    out = y.reshape(B, n1, n2, out_channels, patch, patch)
    out = out.transpose(0, 3, 1, 4, 2, 5).reshape(
        B, out_channels, n1 * patch, n2 * patch)
    return out[:, :, :H, :W]


# Pure-JAX f32 reference (loose numerical sanity check vs bf16 kernels).
def mlp_net_reference(x, params, out_channels, patch=PATCH):
    B, C, H, W = x.shape
    pad_h = (patch - 1) - (H - 1) % patch
    pad_w = (patch - 1) - (W - 1) % patch
    xp = jnp.pad(x, ((0, 0), (0, 0), (0, pad_h), (0, pad_w)))
    n1, n2 = (H + pad_h) // patch, (W + pad_w) // patch
    p = xp.reshape(B, C, n1, patch, n2, patch).transpose(0, 2, 4, 1, 3, 5)
    p = p.reshape(B * n1 * n2, C * patch * patch)
    h = jnp.tanh(p @ params["w_in"] + params["b_in"])
    h = jnp.tanh(h @ params["w1"] + params["b1"])
    h = jnp.tanh(h @ params["w2"] + params["b2"])
    h = jnp.tanh(h @ params["w3"] + params["b3"])
    y = h @ params["w4"] + params["b4"]
    out = y.reshape(B, n1, n2, out_channels, patch, patch)
    out = out.transpose(0, 3, 1, 4, 2, 5).reshape(
        B, out_channels, n1 * patch, n2 * patch)
    return out[:, :, :H, :W]


if __name__ == "__main__":
    key = jax.random.PRNGKey(0)
    k_param, k_x1, k_x2 = jax.random.split(key, 3)

    in_channels, out_channels = 4, 4
    params = init_params(k_param, in_channels, out_channels)
    kparams = prepare_params(params, in_channels, out_channels)
    config = _tpu_config()

    # Test 1 — small: 16x16 pads to 28x28 -> 2x2 patches/image (M=8, 1 tile).
    x1 = jax.random.normal(k_x1, (2, in_channels, 16, 16), jnp.float32)
    out1 = jax.block_until_ready(
        mlp_net_forward(x1, kparams, out_channels, config=config))
    assert out1.shape == (2, out_channels, 16, 16), out1.shape
    ref1 = mlp_net_reference(x1, params, out_channels)
    err1 = float(jnp.max(jnp.abs(out1 - ref1)))
    assert err1 < 0.1, f"max abs error vs f32 reference (small): {err1}"

    # Test 2 — exercises the multi-tile paths: 126x126 -> 9x9 patches/image,
    # M = 162 -> >= 2 M tiles (padded rows, fused-layer residency across tiles).
    x2 = jax.random.normal(k_x2, (2, in_channels, 126, 126), jnp.float32)
    out2 = jax.block_until_ready(
        mlp_net_forward(x2, kparams, out_channels, config=config))
    assert out2.shape == (2, out_channels, 126, 126), out2.shape
    ref2 = mlp_net_reference(x2, params, out_channels)
    err2 = float(jnp.max(jnp.abs(out2 - ref2)))
    assert err2 < 0.1, f"max abs error vs f32 reference (large): {err2}"

    print("KERNEL_OK")
</pallas_src>

<mosaic_0001>
module attributes {stable_mosaic.version = 11 : i64} {
  func.func @_matmul_bias_act_kernel(%arg0: i32, %arg1: i32, %arg2: memref<16x896xbf16, #tpu.memory_space<vmem>>, %arg3: memref<896x2048xbf16, #tpu.memory_space<vmem>>, %arg4: memref<1x2048xf32, #tpu.memory_space<vmem>>, %arg5: memref<16x2048xbf16, #tpu.memory_space<vmem>>) attributes {dimension_semantics = [#tpu.dimension_semantics<parallel>, #tpu.dimension_semantics<parallel>], iteration_bounds = array<i64: 1, 1>, scalar_prefetch = 0 : i64, scratch_operands = 0 : i64, tpu.core_type = #tpu.core_type<tc>, window_params = [{transform_indices = @transform_0, window_bounds = array<i64: 16, 896>}, {transform_indices = @transform_1, window_bounds = array<i64: 896, 2048>}, {transform_indices = @transform_2, window_bounds = array<i64: 1, 2048>}, {transform_indices = @transform_3, window_bounds = array<i64: 16, 2048>}]} {
    %c0 = arith.constant 0 : index
    %c0_0 = arith.constant 0 : index
    %0 = vector.load %arg2[%c0, %c0_0] : memref<16x896xbf16, #tpu.memory_space<vmem>>, vector<16x896xbf16>
    %c0_1 = arith.constant 0 : index
    %c0_2 = arith.constant 0 : index
    %1 = vector.load %arg3[%c0_1, %c0_2] : memref<896x2048xbf16, #tpu.memory_space<vmem>>, vector<896x2048xbf16>
    %cst = arith.constant dense<0.000000e+00> : vector<16x2048xf32>
    %2 = tpu.matmul %0, %1, %cst {dimension_numbers = #tpu.dot_dimension_numbers<[1], [0], [0], [1], [0, 0, 1, 1], [], []>} : vector<16x896xbf16>, vector<896x2048xbf16>, vector<16x2048xf32> -> vector<16x2048xf32>
    %c0_3 = arith.constant 0 : index
    %c0_4 = arith.constant 0 : index
    %3 = vector.load %arg4[%c0_3, %c0_4] : memref<1x2048xf32, #tpu.memory_space<vmem>>, vector<1x2048xf32>
    %4 = vector.broadcast %3 : vector<1x2048xf32> to vector<16x2048xf32>
    %5 = arith.addf %2, %4 : vector<16x2048xf32>
    %6 = math.tanh %5 : vector<16x2048xf32>
    %7 = arith.truncf %6 : vector<16x2048xf32> to vector<16x2048xbf16>
    %c0_5 = arith.constant 0 : index
    %c0_6 = arith.constant 0 : index
    %8 = vector.load %arg5[%c0_5, %c0_6] : memref<16x2048xbf16, #tpu.memory_space<vmem>>, vector<16x2048xbf16>
    tpu.vector_store %arg5[%c0_5, %c0_6], %7 {strides = array<i32>} : memref<16x2048xbf16, #tpu.memory_space<vmem>>, vector<16x2048xbf16>,
    return
  }
  func.func @transform_0(%arg0: i32, %arg1: i32) -> (i32, i32) {
    %c0_i32 = arith.constant 0 : i32
    %c0_i32_0 = arith.constant 0 : i32
    return %arg0, %c0_i32 : i32, i32
  }
  func.func @transform_1(%arg0: i32, %arg1: i32) -> (i32, i32) {
    %c0_i32 = arith.constant 0 : i32
    %c0_i32_0 = arith.constant 0 : i32
    return %c0_i32, %arg1 : i32, i32
  }
  func.func @transform_2(%arg0: i32, %arg1: i32) -> (i32, i32) {
    %c0_i32 = arith.constant 0 : i32
    %c0_i32_0 = arith.constant 0 : i32
    return %c0_i32, %arg1 : i32, i32
  }
  func.func @transform_3(%arg0: i32, %arg1: i32) -> (i32, i32) {
    %c0_i32 = arith.constant 0 : i32
    return %arg0, %arg1 : i32, i32
  }
}

</mosaic_0001>

<bundles_post_ra>
// kernel: tpu_custom_call.1
= control target key start
LH: loop header
LB: loop body
LE: loop exit
PB: predicated region body
PF: predicated region fallthrough
CT: control target
= control target key end

     0   :  { %8 = vsyncpa [#allocation3], 0  ;;  %s8502_s0 = inlined_call_operand.hbm [shape: bf16[16,896], index: 0, kind: input, shape index: {}]   ;;  %s8503_s1 = inlined_call_operand.hbm [shape: bf16[896,2048], index: 1, kind: input, shape index: {}]   ;;  %s8504_s2 = inlined_call_operand.hbm [shape: f32[1,2048], index: 2, kind: input, shape index: {}]   ;;  %s8505_s3 = inlined_call_operand.hbm [shape: bf16[16,2048], index: 3, kind: output, shape index: {}]  }
   0x1   :  { %9 = vsyncpa [#allocation6], 0 }
   0x2   :  { %10 = vsyncpa [#allocation4], 0  ;;  %s8359_s12 = smov [#allocation5]   ;;  %s8265_s16 = scalar_lea.hbm %s8503_s1, 114688 }
   0x3   :  { %s28_s13 = sshll.u32 %s8359_s12, 4  ;;  %p8266_p0 = scmp.ne.s32.totalorder %s8503_s1, %s8265_s16  ;;  %s29_s13 = int_to_ptr.vmem [resolvable:$true] %s28_s13 }
   0x4   :  { %p8269_p1 = scmp.lt.u32.totalorder %s8265_s16, %s8503_s1 }
   0x6   :  { %p8271_p2 = pnand %p8269_p1, %p8266_p0 }
   0x8   :  { %8274 = shalt.err (!%p8271_p2)
}
   0x9   :  { %s8275_s21 = scalar_lea.vmem %s29_s13, 114688  ;;  %p8280_p4 = scmp.lt.s32.totalorder %s29_s13, %s29_s13 }
   0xa   :  { %p8276_p3 = scmp.ne.s32.totalorder %s29_s13, %s8275_s21  ;;  %p8281_p5 = scmp.lt.s32.totalorder %s8275_s21, %s8275_s21 }
   0xc   :  { %p8282_p6 = por %p8281_p5, %p8280_p4 }
   0xe   :  { %p8283_p7 = pnand %p8282_p6, %p8276_p3 }
  0x10   :  { %8286 = shalt.err (!%p8283_p7)
}
  0x11   :  { %s8360_s22 = smov 1024   ;;  %s8361_s23 = smov 64  }
  0x12   :  { %34 = dma.hbm_to_vmem [thread:$0]  %s8503_s1, 114688, %s29_s13, [#allocation6], %s8360_s22, %s8360_s22, %s8361_s23  }
  0x13   :  { %s8362_s26 = smov [#allocation2]   ;;  %s8287_s30 = scalar_lea.hbm %s8502_s0, 896 }
  0x14   :  { %s16_s27 = sshll.u32 %s8362_s26, 4  ;;  %p8288_p8 = scmp.ne.s32.totalorder %s8502_s0, %s8287_s30  ;;  %s17_s27 = int_to_ptr.vmem [resolvable:$true] %s16_s27 }
  0x15   :  { %p8291_p9 = scmp.lt.u32.totalorder %s8287_s30, %s8502_s0 }
  0x17   :  { %p8293_p10 = pnand %p8291_p9, %p8288_p8 }
  0x19   :  { %8296 = shalt.err (!%p8293_p10)
}
  0x1a   :  { %s8297_s8 = scalar_lea.vmem %s17_s27, 896  ;;  %p8302_p12 = scmp.lt.s32.totalorder %s17_s27, %s17_s27 }
  0x1b   :  { %p8298_p11 = scmp.ne.s32.totalorder %s17_s27, %s8297_s8  ;;  %p8303_p13 = scmp.lt.s32.totalorder %s8297_s8, %s8297_s8 }
  0x1d   :  { %p8304_p0 = por %p8303_p13, %p8302_p12 }
  0x1f   :  { %p8305_p1 = pnand %p8304_p0, %p8298_p11 }
  0x21   :  { %8308 = shalt.err (!%p8305_p1)
}
  0x22   :  { %s8363_s1 = smov 448   ;;  %s8364_s9 = smov 28  }
  0x23   :  { %22 = dma.hbm_to_vmem [thread:$0]  %s8502_s0, 896, %s17_s27, [#allocation3], %s8363_s1, %s8363_s1, %s8364_s9  }
  0x24   :  { %s8365_s12 = smov [#allocation7]   ;;  %s8309_s16 = scalar_lea.hbm %s8504_s2, 256 }
  0x25   :  { %s41_s13 = sshll.u32 %s8365_s12, 4  ;;  %p8310_p2 = scmp.ne.s32.totalorder %s8504_s2, %s8309_s16  ;;  %s42_s13 = int_to_ptr.vmem [resolvable:$true] %s41_s13 }
  0x26   :  { %p8313_p3 = scmp.lt.u32.totalorder %s8309_s16, %s8504_s2 }
  0x28   :  { %p8315_p4 = pnand %p8313_p3, %p8310_p2 }
  0x2a   :  { %8318 = shalt.err (!%p8315_p4)
}
  0x2b   :  { %s8319_s21 = scalar_lea.vmem %s42_s13, 256  ;;  %p8324_p6 = scmp.lt.s32.totalorder %s42_s13, %s42_s13 }
  0x2c   :  { %p8320_p5 = scmp.ne.s32.totalorder %s42_s13, %s8319_s21  ;;  %p8325_p7 = scmp.lt.s32.totalorder %s8319_s21, %s8319_s21 }
  0x2e   :  { %p8326_p8 = por %p8325_p7, %p8324_p6 }
  0x30   :  { %p8327_p9 = pnand %p8326_p8, %p8320_p5 }
  0x32   :  { %8330 = shalt.err (!%p8327_p9)
}
  0x33   :  { %44 = dma.hbm_to_vmem [thread:$0]  %s8504_s2, 256, %s42_s13, [#allocation6]  }
  0x34   :  { %8353 = dma.done.wait [#allocation3], 896  }
  0x35   :  { %8354 = vsyncadd [#allocation3], 4294966400 }
  0x36   :  { %8355 = dma.done.wait [#allocation6], 114944  }
  0x37   :  { %8356 = vsyncadd [#allocation6], 4294852352  ;;  %v63_v0 = vld [vmem:[#allocation5] sm:$0xff]  ;;  %v64_v2 = vld [vmem:[#allocation5 + $0x8] sm:$0xff]  ;;  %s8367_s2 = smov [#allocation8]  }
  0x38   :  { %v71_v1 = vld [vmem:[#allocation5 + $0x40] sm:$0xff]  ;;  %v72_v4 = vld [vmem:[#allocation5 + $0x48] sm:$0xff]  ;;  %s7084_s25 = sshll.u32 %s8367_s2, 4  ;;  %s7085_s25 = int_to_ptr.vmem [resolvable:$true] %s7084_s25 }
  0x39   :  { %v7105_v3 = vcombine.high %v63_v0, %v71_v1  ;;  %v7104_v5 = vcombine.low %v63_v0, %v71_v1  ;;  %v79_v6 = vld [vmem:[#allocation5 + $0x80] sm:$0xff]  ;;  %v7107_v8 = vcombine.high %v64_v2, %v72_v4  ;;  %v7106_v9 = vcombine.low %v64_v2, %v72_v4  ;;  %v80_v11 = vld [vmem:[#allocation5 + $0x88] sm:$0xff]  ;;  %s8331_s26 = scalar_lea.vmem %s7085_s25, 2048  ;;  %p8336_p11 = scmp.lt.s32.totalorder %s7085_s25, %s7085_s25 }
  0x3a   :  { %v87_v7 = vld [vmem:[#allocation5 + $0xc0] sm:$0xff]  ;;  %v88_v12 = vld [vmem:[#allocation5 + $0xc8] sm:$0xff]  ;;  %p8332_p10 = scmp.ne.s32.totalorder %s7085_s25, %s8331_s26  ;;  %p8337_p12 = scmp.lt.s32.totalorder %s8331_s26, %s8331_s26 }
  0x3b   :  { %v7121_v10 = vcombine.high %v79_v6, %v87_v7  ;;  %v95_v13 = vld [vmem:[#allocation5 + $0x100] sm:$0xff]  ;;  %5559 = vmatprep.subr.bf16.mxu0 %v7105_v3  ;;  %v7123_v14 = vcombine.high %v80_v11, %v88_v12  ;;  %v96_v16 = vld [vmem:[#allocation5 + $0x108] sm:$0xff]  ;;  %5731 = vmatprep.subr.bf16.mxu1 %v7107_v8  ;;  %v7120_v18 = vcombine.low %v79_v6, %v87_v7 }
  0x3c   :  { %v103_v15 = vld [vmem:[#allocation5 + $0x140] sm:$0xff]  ;;  %v104_v17 = vld [vmem:[#allocation5 + $0x148] sm:$0xff]  ;;  %5560 = vmatpush1.bf16.msra.mxu0 %v7104_v5  ;;  %5732 = vmatpush1.bf16.msra.mxu1 %v7106_v9  ;;  %v7122_v19 = vcombine.low %v80_v11, %v88_v12  ;;  %p8338_p13 = por %p8337_p12, %p8336_p11 }
  0x3d   :  { %5561 = vmatprep.subr.bf16.mxu0 %v7121_v10  ;;  %v7137_v20 = vcombine.high %v95_v13, %v103_v15  ;;  %5733 = vmatprep.subr.bf16.mxu1 %v7123_v14  ;;  %v7139_v21 = vcombine.high %v96_v16, %v104_v17  ;;  %v111_v22 = vld [vmem:[#allocation5 + $0x180] sm:$0xff]  ;;  %v112_v24 = vld [vmem:[#allocation5 + $0x188] sm:$0xff]  ;;  %v7136_v26 = vcombine.low %v95_v13, %v103_v15 }
  0x3e   :  { %v119_v23 = vld [vmem:[#allocation5 + $0x1c0] sm:$0xff]  ;;  %v120_v25 = vld [vmem:[#allocation5 + $0x1c8] sm:$0xff]  ;;  %v7138_v27 = vcombine.low %v96_v16, %v104_v17  ;;  %p8339_p0 = pnand %p8338_p13, %p8332_p10 }
  0x3f   :  { %v7153_v28 = vcombine.high %v111_v22, %v119_v23  ;;  %v7155_v29 = vcombine.high %v112_v24, %v120_v25  ;;  %v127_v30 = vld [vmem:[#allocation5 + $0x200] sm:$0xff]  ;;  %v128_v32 = vld [vmem:[#allocation5 + $0x208] sm:$0xff]  ;;  %v7152_v34 = vcombine.low %v111_v22, %v119_v23  ;;  %v7154_v35 = vcombine.low %v112_v24, %v120_v25 }
  0x40   :  { %5562 = vmatpush1.bf16.msra.mxu0 %v7120_v18  ;;  %5734 = vmatpush1.bf16.msra.mxu1 %v7122_v19  ;;  %v135_v31 = vld [vmem:[#allocation5 + $0x240] sm:$0xff]  ;;  %v136_v33 = vld [vmem:[#allocation5 + $0x248] sm:$0xff] }
  0x41   :  { %5563 = vmatprep.subr.bf16.mxu0 %v7137_v20  ;;  %5735 = vmatprep.subr.bf16.mxu1 %v7139_v21  ;;  %v7169_v36 = vcombine.high %v127_v30, %v135_v31  ;;  %v7171_v37 = vcombine.high %v128_v32, %v136_v33  ;;  %v143_v38 = vld [vmem:[#allocation5 + $0x280] sm:$0xff]  ;;  %v144_v40 = vld [vmem:[#allocation5 + $0x288] sm:$0xff]  ;;  %v7168_v42 = vcombine.low %v127_v30, %v135_v31 }
  0x42   :  { %v151_v39 = vld [vmem:[#allocation5 + $0x2c0] sm:$0xff]  ;;  %v152_v41 = vld [vmem:[#allocation5 + $0x2c8] sm:$0xff]  ;;  %v7170_v43 = vcombine.low %v128_v32, %v136_v33 }
  0x43   :  { %v7185_v44 = vcombine.high %v143_v38, %v151_v39  ;;  %v7187_v45 = vcombine.high %v144_v40, %v152_v41  ;;  %v159_v46 = vld [vmem:[#allocation5 + $0x300] sm:$0xff]  ;;  %v160_v48 = vld [vmem:[#allocation5 + $0x308] sm:$0xff]  ;;  %v7184_v50 = vcombine.low %v143_v38, %v151_v39  ;;  %v7186_v51 = vcombine.low %v144_v40, %v152_v41 }
  0x44   :  { %5564 = vmatpush1.bf16.msra.mxu0 %v7136_v26  ;;  %5736 = vmatpush1.bf16.msra.mxu1 %v7138_v27  ;;  %v167_v47 = vld [vmem:[#allocation5 + $0x340] sm:$0xff]  ;;  %v168_v49 = vld [vmem:[#allocation5 + $0x348] sm:$0xff] }
  0x45   :  { %5565 = vmatprep.subr.bf16.mxu0 %v7153_v28  ;;  %5737 = vmatprep.subr.bf16.mxu1 %v7155_v29  ;;  %v7201_v52 = vcombine.high %v159_v46, %v167_v47  ;;  %v7203_v53 = vcombine.high %v160_v48, %v168_v49  ;;  %v175_v54 = vld [vmem:[#allocation5 + $0x380] sm:$0xff]  ;;  %v8169_v56 = vld [vmem:[#allocation2 + $0x4] ss:$28 sps:$4 sm:$0xff]   ;;  %v7200_v59 = vcombine.low %v159_v46, %v167_v47 }
  0x46   :  { %v183_v55 = vld [vmem:[#allocation5 + $0x3c0] sm:$0xff]  ;;  %v176_v57 = vld [vmem:[#allocation5 + $0x388] sm:$0xff]  ;;  %5591 = vmatprep.mubr.bf16.mxu0 %v8169_v56  ;;  %v7202_v60 = vcombine.low %v160_v48, %v168_v49  ;;  %5763 = vmatprep.mubr.bf16.mxu1 %v8169_v56 }
  0x47   :  { %v184_v58 = vld [vmem:[#allocation5 + $0x3c8] sm:$0xff]  ;;  %v7217_v61 = vcombine.high %v175_v54, %v183_v55  ;;  %v191_v63 = vld [vmem:[#allocation5 + $0x400] sm:$0xff]  ;;  %v7216_v3 = vcombine.low %v175_v54, %v183_v55 }
  0x48   :  { %5566 = vmatpush1.bf16.msra.mxu0 %v7152_v34  ;;  %5738 = vmatpush1.bf16.msra.mxu1 %v7154_v35  ;;  %v7219_v62 = vcombine.high %v176_v57, %v184_v58  ;;  %v199_v0 = vld [vmem:[#allocation5 + $0x440] sm:$0xff]  ;;  %v192_v1 = vld [vmem:[#allocation5 + $0x408] sm:$0xff]  ;;  %v7218_v4 = vcombine.low %v176_v57, %v184_v58 }
  0x49   :  { %5567 = vmatprep.subr.bf16.mxu0 %v7169_v36  ;;  %5739 = vmatprep.subr.bf16.mxu1 %v7171_v37  ;;  %v200_v2 = vld [vmem:[#allocation5 + $0x448] sm:$0xff]  ;;  %v7233_v5 = vcombine.high %v191_v63, %v199_v0  ;;  %v207_v7 = vld [vmem:[#allocation5 + $0x480] sm:$0xff]  ;;  %v7232_v11 = vcombine.low %v191_v63, %v199_v0 }
  0x4a   :  { %v7235_v6 = vcombine.high %v192_v1, %v200_v2  ;;  %v215_v8 = vld [vmem:[#allocation5 + $0x4c0] sm:$0xff]  ;;  %v208_v9 = vld [vmem:[#allocation5 + $0x488] sm:$0xff]  ;;  %v7234_v12 = vcombine.low %v192_v1, %v200_v2 }
  0x4b   :  { %v216_v10 = vld [vmem:[#allocation5 + $0x4c8] sm:$0xff]  ;;  %v7249_v13 = vcombine.high %v207_v7, %v215_v8  ;;  %v223_v15 = vld [vmem:[#allocation5 + $0x500] sm:$0xff]  ;;  %v7248_v19 = vcombine.low %v207_v7, %v215_v8 }
  0x4c   :  { %5568 = vmatpush1.bf16.msra.mxu0 %v7168_v42  ;;  %5740 = vmatpush1.bf16.msra.mxu1 %v7170_v43  ;;  %v7251_v14 = vcombine.high %v208_v9, %v216_v10  ;;  %v231_v16 = vld [vmem:[#allocation5 + $0x540] sm:$0xff]  ;;  %v224_v17 = vld [vmem:[#allocation5 + $0x508] sm:$0xff]  ;;  %v7250_v20 = vcombine.low %v208_v9, %v216_v10 }
  0x4d   :  { %5569 = vmatprep.subr.bf16.mxu0 %v7185_v44  ;;  %5741 = vmatprep.subr.bf16.mxu1 %v7187_v45  ;;  %v232_v18 = vld [vmem:[#allocation5 + $0x548] sm:$0xff]  ;;  %v7265_v21 = vcombine.high %v223_v15, %v231_v16  ;;  %v239_v23 = vld [vmem:[#allocation5 + $0x580] sm:$0xff]  ;;  %v7264_v27 = vcombine.low %v223_v15, %v231_v16 }
  0x4e   :  { %v7267_v22 = vcombine.high %v224_v17, %v232_v18  ;;  %v247_v24 = vld [vmem:[#allocation5 + $0x5c0] sm:$0xff]  ;;  %v240_v25 = vld [vmem:[#allocation5 + $0x588] sm:$0xff]  ;;  %v7266_v28 = vcombine.low %v224_v17, %v232_v18  ;;  %v8172_v18 = vld [vmem:[#allocation2 + $0xc] ss:$28 sps:$4 sm:$0xff]  }
  0x4f   :  { %v248_v26 = vld [vmem:[#allocation5 + $0x5c8] sm:$0xff]  ;;  %v7281_v29 = vcombine.high %v239_v23, %v247_v24  ;;  %v255_v31 = vld [vmem:[#allocation5 + $0x600] sm:$0xff]  ;;  %v7280_v35 = vcombine.low %v239_v23, %v247_v24 }
  0x50   :  { %5570 = vmatpush1.bf16.msra.mxu0 %v7184_v50  ;;  %5742 = vmatpush1.bf16.msra.mxu1 %v7186_v51  ;;  %v7283_v30 = vcombine.high %v240_v25, %v248_v26  ;;  %v263_v32 = vld [vmem:[#allocation5 + $0x640] sm:$0xff]  ;;  %v256_v33 = vld [vmem:[#allocation5 + $0x608] sm:$0xff]  ;;  %v7282_v36 = vcombine.low %v240_v25, %v248_v26 }
  0x51   :  { %5571 = vmatprep.subr.bf16.mxu0 %v7201_v52  ;;  %5743 = vmatprep.subr.bf16.mxu1 %v7203_v53  ;;  %v264_v34 = vld [vmem:[#allocation5 + $0x648] sm:$0xff]  ;;  %v7297_v37 = vcombine.high %v255_v31, %v263_v32  ;;  %v271_v39 = vld [vmem:[#allocation5 + $0x680] sm:$0xff]  ;;  %v7296_v43 = vcombine.low %v255_v31, %v263_v32 }
  0x52   :  { %v7299_v38 = vcombine.high %v256_v33, %v264_v34  ;;  %v279_v40 = vld [vmem:[#allocation5 + $0x6c0] sm:$0xff]  ;;  %v272_v41 = vld [vmem:[#allocation5 + $0x688] sm:$0xff]  ;;  %v7298_v44 = vcombine.low %v256_v33, %v264_v34 }
  0x53   :  { %v280_v42 = vld [vmem:[#allocation5 + $0x6c8] sm:$0xff]  ;;  %v7313_v45 = vcombine.high %v271_v39, %v279_v40  ;;  %v287_v47 = vld [vmem:[#allocation5 + $0x700] sm:$0xff]  ;;  %v7312_v51 = vcombine.low %v271_v39, %v279_v40 }
  0x54   :  { %5572 = vmatpush1.bf16.msra.mxu0 %v7200_v59  ;;  %5744 = vmatpush1.bf16.msra.mxu1 %v7202_v60  ;;  %v7315_v46 = vcombine.high %v272_v41, %v280_v42  ;;  %v295_v48 = vld [vmem:[#allocation5 + $0x740] sm:$0xff]  ;;  %v288_v49 = vld [vmem:[#allocation5 + $0x708] sm:$0xff]  ;;  %v7314_v52 = vcombine.low %v272_v41, %v280_v42 }
  0x55   :  { %5573 = vmatprep.subr.bf16.mxu0 %v7217_v61  ;;  %5745 = vmatprep.subr.bf16.mxu1 %v7219_v62  ;;  %v296_v50 = vld [vmem:[#allocation5 + $0x748] sm:$0xff]  ;;  %v7329_v53 = vcombine.high %v287_v47, %v295_v48  ;;  %v303_v55 = vld [vmem:[#allocation5 + $0x780] sm:$0xff]  ;;  %v7328_v59 = vcombine.low %v287_v47, %v295_v48 }
  0x56   :  { %v7331_v54 = vcombine.high %v288_v49, %v296_v50  ;;  %v311_v56 = vld [vmem:[#allocation5 + $0x7c0] sm:$0xff]  ;;  %v304_v57 = vld [vmem:[#allocation5 + $0x788] sm:$0xff]  ;;  %v7330_v60 = vcombine.low %v288_v49, %v296_v50 }
  0x57   :  { %v312_v58 = vld [vmem:[#allocation5 + $0x7c8] sm:$0xff]  ;;  %v7345_v61 = vcombine.high %v303_v55, %v311_v56  ;;  %v319_v63 = vld [vmem:[#allocation5 + $0x800] sm:$0xff] }
  0x58   :  { %5574 = vmatpush1.bf16.msra.mxu0 %v7216_v3  ;;  %5746 = vmatpush1.bf16.msra.mxu1 %v7218_v4  ;;  %v7347_v62 = vcombine.high %v304_v57, %v312_v58  ;;  %v327_v0 = vld [vmem:[#allocation5 + $0x840] sm:$0xff]  ;;  %v320_v1 = vld [vmem:[#allocation5 + $0x808] sm:$0xff]  ;;  %v7344_v3 = vcombine.low %v303_v55, %v311_v56  ;;  %v7346_v4 = vcombine.low %v304_v57, %v312_v58 }
  0x59   :  { %5575 = vmatprep.subr.bf16.mxu0 %v7233_v5  ;;  %5747 = vmatprep.subr.bf16.mxu1 %v7235_v6  ;;  %v328_v2 = vld [vmem:[#allocation5 + $0x848] sm:$0xff]  ;;  %v7361_v5 = vcombine.high %v319_v63, %v327_v0  ;;  %v335_v7 = vld [vmem:[#allocation5 + $0x880] sm:$0xff] }
  0x5a   :  { %v7363_v6 = vcombine.high %v320_v1, %v328_v2  ;;  %v343_v8 = vld [vmem:[#allocation5 + $0x8c0] sm:$0xff]  ;;  %v336_v10 = vld [vmem:[#allocation5 + $0x888] sm:$0xff] }
  0x5b   :  { %v8171_v9 = vld [vmem:[#allocation2] ss:$28 sps:$4 sm:$0xff]  }
  0x5c   :  { %5576 = vmatpush1.bf16.msra.mxu0 %v7232_v11  ;;  %5748 = vmatpush1.bf16.msra.mxu1 %v7234_v12  ;;  %v344_v11 = vld [vmem:[#allocation5 + $0x8c8] sm:$0xff]  ;;  %v7360_v12 = vcombine.low %v319_v63, %v327_v0  ;;  %v351_v15 = vld [vmem:[#allocation5 + $0x900] sm:$0xff] }
  0x5d   :  { %5577 = vmatprep.subr.bf16.mxu0 %v7249_v13  ;;  %5749 = vmatprep.subr.bf16.mxu1 %v7251_v14  ;;  %v7362_v13 = vcombine.low %v320_v1, %v328_v2  ;;  %v7377_v14 = vcombine.high %v335_v7, %v343_v8  ;;  %v7379_v16 = vcombine.high %v336_v10, %v344_v11  ;;  %v359_v17 = vld [vmem:[#allocation5 + $0x940] sm:$0xff] }
  0x5e   :  { %v7393_v23 = vcombine.high %v351_v15, %v359_v17  ;;  %v367_v25 = vld [vmem:[#allocation5 + $0x980] sm:$0xff] }
  0x5f   :  { %v375_v26 = vld [vmem:[#allocation5 + $0x9c0] sm:$0xff] }
  0x60   :  { %5578 = vmatpush1.bf16.msra.mxu0 %v7248_v19  ;;  %5750 = vmatpush1.bf16.msra.mxu1 %v7250_v20  ;;  %v352_v19 = vld [vmem:[#allocation5 + $0x908] sm:$0xff]  ;;  %v7409_v31 = vcombine.high %v367_v25, %v375_v26  ;;  %v383_v33 = vld [vmem:[#allocation5 + $0xa00] sm:$0xff] }
  0x61   :  { %5579 = vmatprep.subr.bf16.mxu0 %v7265_v21  ;;  %5751 = vmatprep.subr.bf16.mxu1 %v7267_v22  ;;  %v360_v20 = vld [vmem:[#allocation5 + $0x948] sm:$0xff]  ;;  %v7376_v21 = vcombine.low %v335_v7, %v343_v8  ;;  %v7378_v22 = vcombine.low %v336_v10, %v344_v11  ;;  %v391_v34 = vld [vmem:[#allocation5 + $0xa40] sm:$0xff] }
  0x62   :  { %v7395_v24 = vcombine.high %v352_v19, %v360_v20  ;;  %v7425_v39 = vcombine.high %v383_v33, %v391_v34  ;;  %v399_v41 = vld [vmem:[#allocation5 + $0xa80] sm:$0xff]  ;;  %v464_v11 = vld [vmem:[#allocation5 + $0xc88] sm:$0xff] }
  0x63   :  { %v407_v42 = vld [vmem:[#allocation5 + $0xac0] sm:$0xff] }
  0x64   :  { %5580 = vmatpush1.bf16.msra.mxu0 %v7264_v27  ;;  %5752 = vmatpush1.bf16.msra.mxu1 %v7266_v28  ;;  %v368_v27 = vld [vmem:[#allocation5 + $0x988] sm:$0xff]  ;;  %v7441_v47 = vcombine.high %v399_v41, %v407_v42  ;;  %v415_v49 = vld [vmem:[#allocation5 + $0xb00] sm:$0xff] }
  0x65   :  { %5581 = vmatprep.subr.bf16.mxu0 %v7281_v29  ;;  %5753 = vmatprep.subr.bf16.mxu1 %v7283_v30  ;;  %v376_v28 = vld [vmem:[#allocation5 + $0x9c8] sm:$0xff]  ;;  %v7392_v29 = vcombine.low %v351_v15, %v359_v17  ;;  %v7394_v30 = vcombine.low %v352_v19, %v360_v20  ;;  %v423_v50 = vld [vmem:[#allocation5 + $0xb40] sm:$0xff] }
  0x66   :  { %v7411_v32 = vcombine.high %v368_v27, %v376_v28  ;;  %v7457_v55 = vcombine.high %v415_v49, %v423_v50  ;;  %v431_v57 = vld [vmem:[#allocation5 + $0xb80] sm:$0xff]  ;;  %v480_v19 = vld [vmem:[#allocation5 + $0xd08] sm:$0xff] }
  0x67   :  { %v439_v58 = vld [vmem:[#allocation5 + $0xbc0] sm:$0xff]  ;;  %v488_v20 = vld [vmem:[#allocation5 + $0xd48] sm:$0xff] }
  0x68   :  { %5582 = vmatpush1.bf16.msra.mxu0 %v7280_v35  ;;  %5754 = vmatpush1.bf16.msra.mxu1 %v7282_v36  ;;  %v384_v35 = vld [vmem:[#allocation5 + $0xa08] sm:$0xff]  ;;  %v7473_v63 = vcombine.high %v431_v57, %v439_v58  ;;  %v447_v1 = vld [vmem:[#allocation5 + $0xc00] sm:$0xff] }
  0x69   :  { %5583 = vmatprep.subr.bf16.mxu0 %v7297_v37  ;;  %5755 = vmatprep.subr.bf16.mxu1 %v7299_v38  ;;  %v392_v36 = vld [vmem:[#allocation5 + $0xa48] sm:$0xff]  ;;  %v7408_v37 = vcombine.low %v367_v25, %v375_v26  ;;  %v7410_v38 = vcombine.low %v368_v27, %v376_v28  ;;  %v455_v2 = vld [vmem:[#allocation5 + $0xc40] sm:$0xff] }
  0x6a   :  { %v7427_v40 = vcombine.high %v384_v35, %v392_v36  ;;  %v7489_v7 = vcombine.high %v447_v1, %v455_v2  ;;  %v471_v10 = vld [vmem:[#allocation5 + $0xcc0] sm:$0xff]  ;;  %v496_v27 = vld [vmem:[#allocation5 + $0xd88] sm:$0xff] }
  0x6b   :  { %v479_v17 = vld [vmem:[#allocation5 + $0xd00] sm:$0xff]  ;;  %v504_v28 = vld [vmem:[#allocation5 + $0xdc8] sm:$0xff] }
  0x6c   :  { %5584 = vmatpush1.bf16.msra.mxu0 %v7296_v43  ;;  %5756 = vmatpush1.bf16.msra.mxu1 %v7298_v44  ;;  %v400_v43 = vld [vmem:[#allocation5 + $0xa88] sm:$0xff]  ;;  %v495_v25 = vld [vmem:[#allocation5 + $0xd80] sm:$0xff] }
  0x6d   :  { %5585 = vmatprep.subr.bf16.mxu0 %v7313_v45  ;;  %5757 = vmatprep.subr.bf16.mxu1 %v7315_v46  ;;  %v408_v44 = vld [vmem:[#allocation5 + $0xac8] sm:$0xff]  ;;  %v7424_v45 = vcombine.low %v383_v33, %v391_v34  ;;  %v7426_v46 = vcombine.low %v384_v35, %v392_v36  ;;  %v503_v26 = vld [vmem:[#allocation5 + $0xdc0] sm:$0xff] }
  0x6e   :  { %v7443_v48 = vcombine.high %v400_v43, %v408_v44  ;;  %v511_v33 = vld [vmem:[#allocation5 + $0xe00] sm:$0xff]  ;;  %v512_v35 = vld [vmem:[#allocation5 + $0xe08] sm:$0xff] }
  0x6f   :  { %v519_v34 = vld [vmem:[#allocation5 + $0xe40] sm:$0xff]  ;;  %v520_v36 = vld [vmem:[#allocation5 + $0xe48] sm:$0xff] }
  0x70   :  { %5586 = vmatpush1.bf16.msra.mxu0 %v7312_v51  ;;  %5758 = vmatpush1.bf16.msra.mxu1 %v7314_v52  ;;  %v416_v51 = vld [vmem:[#allocation5 + $0xb08] sm:$0xff] }
  0x71   :  { %5587 = vmatprep.subr.bf16.mxu0 %v7329_v53  ;;  %5759 = vmatprep.subr.bf16.mxu1 %v7331_v54  ;;  %v424_v52 = vld [vmem:[#allocation5 + $0xb48] sm:$0xff]  ;;  %v7440_v53 = vcombine.low %v399_v41, %v407_v42  ;;  %v7442_v54 = vcombine.low %v400_v43, %v408_v44  ;;  %v527_v41 = vld [vmem:[#allocation5 + $0xe80] sm:$0xff] }
  0x72   :  { %v7459_v56 = vcombine.high %v416_v51, %v424_v52  ;;  %v535_v42 = vld [vmem:[#allocation5 + $0xec0] sm:$0xff]  ;;  %v528_v43 = vld [vmem:[#allocation5 + $0xe88] sm:$0xff] }
  0x73   :  { %v536_v44 = vld [vmem:[#allocation5 + $0xec8] sm:$0xff] }
  0x74   :  { %5588 = vmatpush1.bf16.msra.mxu0 %v7328_v59  ;;  %5760 = vmatpush1.bf16.msra.mxu1 %v7330_v60  ;;  %v432_v59 = vld [vmem:[#allocation5 + $0xb88] sm:$0xff] }
  0x75   :  { %5589 = vmatprep.subr.bf16.mxu0 %v7345_v61  ;;  %5761 = vmatprep.subr.bf16.mxu1 %v7347_v62  ;;  %v440_v60 = vld [vmem:[#allocation5 + $0xbc8] sm:$0xff]  ;;  %v7456_v61 = vcombine.low %v415_v49, %v423_v50  ;;  %v7458_v62 = vcombine.low %v416_v51, %v424_v52  ;;  %v543_v49 = vld [vmem:[#allocation5 + $0xf00] sm:$0xff] }
  0x76   :  { %v7475_v0 = vcombine.high %v432_v59, %v440_v60  ;;  %v551_v50 = vld [vmem:[#allocation5 + $0xf40] sm:$0xff]  ;;  %v544_v51 = vld [vmem:[#allocation5 + $0xf08] sm:$0xff] }
  0x77   :  { %v552_v52 = vld [vmem:[#allocation5 + $0xf48] sm:$0xff] }
  0x78   :  { %5590 = vmatpush1.bf16.msra.mxu0 %v7344_v3  ;;  %5762 = vmatpush1.bf16.msra.mxu1 %v7346_v4  ;;  %v448_v3 = vld [vmem:[#allocation5 + $0xc08] sm:$0xff] }
  0x79   :  { %5602 = vmatprep.subr.bf16.mxu0 %v7361_v5  ;;  %5774 = vmatprep.subr.bf16.mxu1 %v7363_v6  ;;  %v456_v4 = vld [vmem:[#allocation5 + $0xc48] sm:$0xff]  ;;  %v7472_v5 = vcombine.low %v431_v57, %v439_v58  ;;  %v7474_v6 = vcombine.low %v432_v59, %v440_v60  ;;  %v559_v57 = vld [vmem:[#allocation5 + $0xf80] sm:$0xff] }
  0x7a   :  { %v7491_v8 = vcombine.high %v448_v3, %v456_v4  ;;  %v567_v58 = vld [vmem:[#allocation5 + $0xfc0] sm:$0xff]  ;;  %v560_v59 = vld [vmem:[#allocation5 + $0xf88] sm:$0xff] }
  0x7b   :  { %5592 = vmatmul.mubr.bf16.vlgmr.msra.gmra.mrb[0].mxu0 %v8171_v9  ;;  %5764 = vmatmul.mubr.bf16.vlgmr.msra.gmra.mrb[0].mxu1 %v8171_v9  ;;  %v463_v9 = vld [vmem:[#allocation5 + $0xc80] sm:$0xff]  ;;  %v568_v60 = vld [vmem:[#allocation5 + $0xfc8] sm:$0xff] }
  0x7c   :  { %5603 = vmatpush1.bf16.msra.mxu0 %v7360_v12  ;;  %5775 = vmatpush1.bf16.msra.mxu1 %v7362_v13  ;;  %v472_v12 = vld [vmem:[#allocation5 + $0xcc8] sm:$0xff]  ;;  %v7488_v13 = vcombine.low %v447_v1, %v455_v2  ;;  %v7505_v15 = vcombine.high %v463_v9, %v471_v10  ;;  %v575_v1 = vld [vmem:[#allocation5 + $0x1000] sm:$0xff] }
  0x7d   :  { %5604 = vmatprep.subr.bf16.mxu0 %v7377_v14  ;;  %5776 = vmatprep.subr.bf16.mxu1 %v7379_v16  ;;  %v7490_v14 = vcombine.low %v448_v3, %v456_v4  ;;  %v7507_v16 = vcombine.high %v464_v11, %v472_v12  ;;  %v583_v2 = vld [vmem:[#allocation5 + $0x1040] sm:$0xff]  ;;  %v576_v3 = vld [vmem:[#allocation5 + $0x1008] sm:$0xff] }
  0x7e   :  { %5634 = vmatprep.mubr.bf16.mxu0 %v8172_v18  ;;  %5806 = vmatprep.mubr.bf16.mxu1 %v8172_v18  ;;  %v487_v18 = vld [vmem:[#allocation5 + $0xd40] sm:$0xff]  ;;  %v584_v4 = vld [vmem:[#allocation5 + $0x1048] sm:$0xff] }
  0x80   :  { %5605 = vmatpush1.bf16.msra.mxu0 %v7376_v21  ;;  %5777 = vmatpush1.bf16.msra.mxu1 %v7378_v22  ;;  %v7504_v21 = vcombine.low %v463_v9, %v471_v10  ;;  %v7506_v22 = vcombine.low %v464_v11, %v472_v12  ;;  %v591_v9 = vld [vmem:[#allocation5 + $0x1080] sm:$0xff]  ;;  %v8174_v11 = vld [vmem:[#allocation2 + $0x8] ss:$28 sps:$4 sm:$0xff]  }
  0x81   :  { %5606 = vmatprep.subr.bf16.mxu0 %v7393_v23  ;;  %5778 = vmatprep.subr.bf16.mxu1 %v7395_v24  ;;  %v7521_v23 = vcombine.high %v479_v17, %v487_v18  ;;  %v7523_v24 = vcombine.high %v480_v19, %v488_v20  ;;  %v599_v10 = vld [vmem:[#allocation5 + $0x10c0] sm:$0xff]  ;;  %v592_v12 = vld [vmem:[#allocation5 + $0x1088] sm:$0xff] }
  0x84   :  { %5607 = vmatpush1.bf16.msra.mxu0 %v7392_v29  ;;  %5779 = vmatpush1.bf16.msra.mxu1 %v7394_v30  ;;  %v7520_v29 = vcombine.low %v479_v17, %v487_v18  ;;  %v7522_v30 = vcombine.low %v480_v19, %v488_v20  ;;  %v607_v18 = vld [vmem:[#allocation5 + $0x1100] sm:$0xff]  ;;  %v8175_v20 = vld [vmem:[#allocation2 + $0x14] ss:$28 sps:$4 sm:$0xff]  }
  0x85   :  { %5608 = vmatprep.subr.bf16.mxu0 %v7409_v31  ;;  %5780 = vmatprep.subr.bf16.mxu1 %v7411_v32  ;;  %v7537_v31 = vcombine.high %v495_v25, %v503_v26  ;;  %v7539_v32 = vcombine.high %v496_v27, %v504_v28  ;;  %v615_v19 = vld [vmem:[#allocation5 + $0x1140] sm:$0xff] }
  0x88   :  { %5609 = vmatpush1.bf16.msra.mxu0 %v7408_v37  ;;  %5781 = vmatpush1.bf16.msra.mxu1 %v7410_v38  ;;  %v7536_v37 = vcombine.low %v495_v25, %v503_v26  ;;  %v7538_v38 = vcombine.low %v496_v27, %v504_v28  ;;  %v7649_v25 = vcombine.high %v607_v18, %v615_v19  ;;  %v623_v27 = vld [vmem:[#allocation5 + $0x1180] sm:$0xff] }
  0x89   :  { %5610 = vmatprep.subr.bf16.mxu0 %v7425_v39  ;;  %5782 = vmatprep.subr.bf16.mxu1 %v7427_v40  ;;  %v7553_v39 = vcombine.high %v511_v33, %v519_v34  ;;  %v7555_v40 = vcombine.high %v512_v35, %v520_v36  ;;  %v631_v28 = vld [vmem:[#allocation5 + $0x11c0] sm:$0xff] }
  0x8c   :  { %5611 = vmatpush1.bf16.msra.mxu0 %v7424_v45  ;;  %5783 = vmatpush1.bf16.msra.mxu1 %v7426_v46  ;;  %v7552_v45 = vcombine.low %v511_v33, %v519_v34  ;;  %v7554_v46 = vcombine.low %v512_v35, %v520_v36  ;;  %v7665_v33 = vcombine.high %v623_v27, %v631_v28  ;;  %v639_v35 = vld [vmem:[#allocation5 + $0x1200] sm:$0xff] }
  0x8d   :  { %5612 = vmatprep.subr.bf16.mxu0 %v7441_v47  ;;  %5784 = vmatprep.subr.bf16.mxu1 %v7443_v48  ;;  %v7569_v47 = vcombine.high %v527_v41, %v535_v42  ;;  %v7571_v48 = vcombine.high %v528_v43, %v536_v44  ;;  %v647_v36 = vld [vmem:[#allocation5 + $0x1240] sm:$0xff] }
  0x90   :  { %5613 = vmatpush1.bf16.msra.mxu0 %v7440_v53  ;;  %5785 = vmatpush1.bf16.msra.mxu1 %v7442_v54  ;;  %v7568_v53 = vcombine.low %v527_v41, %v535_v42  ;;  %v7570_v54 = vcombine.low %v528_v43, %v536_v44  ;;  %v7681_v41 = vcombine.high %v639_v35, %v647_v36  ;;  %v655_v43 = vld [vmem:[#allocation5 + $0x1280] sm:$0xff] }
  0x91   :  { %5614 = vmatprep.subr.bf16.mxu0 %v7457_v55  ;;  %5786 = vmatprep.subr.bf16.mxu1 %v7459_v56  ;;  %v7585_v55 = vcombine.high %v543_v49, %v551_v50  ;;  %v7587_v56 = vcombine.high %v544_v51, %v552_v52  ;;  %v663_v44 = vld [vmem:[#allocation5 + $0x12c0] sm:$0xff] }
  0x94   :  { %5615 = vmatpush1.bf16.msra.mxu0 %v7456_v61  ;;  %5787 = vmatpush1.bf16.msra.mxu1 %v7458_v62  ;;  %v7584_v61 = vcombine.low %v543_v49, %v551_v50  ;;  %v7586_v62 = vcombine.low %v544_v51, %v552_v52  ;;  %v7697_v49 = vcombine.high %v655_v43, %v663_v44  ;;  %v671_v51 = vld [vmem:[#allocation5 + $0x1300] sm:$0xff] }
  0x95   :  { %5616 = vmatprep.subr.bf16.mxu0 %v7473_v63  ;;  %5788 = vmatprep.subr.bf16.mxu1 %v7475_v0  ;;  %v7601_v63 = vcombine.high %v559_v57, %v567_v58  ;;  %v7603_v0 = vcombine.high %v560_v59, %v568_v60  ;;  %v679_v52 = vld [vmem:[#allocation5 + $0x1340] sm:$0xff] }
  0x98   :  { %5617 = vmatpush1.bf16.msra.mxu0 %v7472_v5  ;;  %5789 = vmatpush1.bf16.msra.mxu1 %v7474_v6  ;;  %v7600_v5 = vcombine.low %v559_v57, %v567_v58  ;;  %v7602_v6 = vcombine.low %v560_v59, %v568_v60  ;;  %v7713_v57 = vcombine.high %v671_v51, %v679_v52  ;;  %v687_v59 = vld [vmem:[#allocation5 + $0x1380] sm:$0xff] }
  0x99   :  { %5618 = vmatprep.subr.bf16.mxu0 %v7489_v7  ;;  %5790 = vmatprep.subr.bf16.mxu1 %v7491_v8  ;;  %v7617_v7 = vcombine.high %v575_v1, %v583_v2  ;;  %v7619_v8 = vcombine.high %v576_v3, %v584_v4  ;;  %v695_v60 = vld [vmem:[#allocation5 + $0x13c0] sm:$0xff] }
  0x9c   :  { %5619 = vmatpush1.bf16.msra.mxu0 %v7488_v13  ;;  %5791 = vmatpush1.bf16.msra.mxu1 %v7490_v14  ;;  %v600_v13 = vld [vmem:[#allocation5 + $0x10c8] sm:$0xff]  ;;  %v7616_v14 = vcombine.low %v575_v1, %v583_v2  ;;  %v7729_v1 = vcombine.high %v687_v59, %v695_v60 }
  0x9d   :  { %5620 = vmatprep.subr.bf16.mxu0 %v7505_v15  ;;  %5792 = vmatprep.subr.bf16.mxu1 %v7507_v16  ;;  %v7618_v15 = vcombine.low %v576_v3, %v584_v4  ;;  %v7633_v16 = vcombine.high %v591_v9, %v599_v10  ;;  %v7635_v17 = vcombine.high %v592_v12, %v600_v13  ;;  %v703_v3 = vld [vmem:[#allocation5 + $0x1400] sm:$0xff] }
  0x9e   :  { %v711_v4 = vld [vmem:[#allocation5 + $0x1440] sm:$0xff] }
  0xa0   :  { %5621 = vmatpush1.bf16.msra.mxu0 %v7504_v21  ;;  %5793 = vmatpush1.bf16.msra.mxu1 %v7506_v22  ;;  %v608_v21 = vld [vmem:[#allocation5 + $0x1108] sm:$0xff] }
  0xa1   :  { %5622 = vmatprep.subr.bf16.mxu0 %v7521_v23  ;;  %5794 = vmatprep.subr.bf16.mxu1 %v7523_v24  ;;  %v616_v22 = vld [vmem:[#allocation5 + $0x1148] sm:$0xff]  ;;  %v7632_v23 = vcombine.low %v591_v9, %v599_v10  ;;  %v7634_v24 = vcombine.low %v592_v12, %v600_v13  ;;  %v7745_v9 = vcombine.high %v703_v3, %v711_v4  ;;  %v727_v12 = vld [vmem:[#allocation5 + $0x14c0] sm:$0xff] }
  0xa2   :  { %v7651_v26 = vcombine.high %v608_v21, %v616_v22  ;;  %v720_v13 = vld [vmem:[#allocation5 + $0x1488] sm:$0xff] }
  0xa4   :  { %5623 = vmatpush1.bf16.msra.mxu0 %v7520_v29  ;;  %5795 = vmatpush1.bf16.msra.mxu1 %v7522_v30  ;;  %v624_v29 = vld [vmem:[#allocation5 + $0x1188] sm:$0xff] }
  0xa5   :  { %5624 = vmatprep.subr.bf16.mxu0 %v7537_v31  ;;  %5796 = vmatprep.subr.bf16.mxu1 %v7539_v32  ;;  %v632_v30 = vld [vmem:[#allocation5 + $0x11c8] sm:$0xff]  ;;  %v7648_v31 = vcombine.low %v607_v18, %v615_v19  ;;  %v7650_v32 = vcombine.low %v608_v21, %v616_v22  ;;  %v735_v19 = vld [vmem:[#allocation5 + $0x1500] sm:$0xff] }
  0xa6   :  { %v7667_v34 = vcombine.high %v624_v29, %v632_v30  ;;  %v736_v21 = vld [vmem:[#allocation5 + $0x1508] sm:$0xff] }
  0xa7   :  { %v744_v22 = vld [vmem:[#allocation5 + $0x1548] sm:$0xff] }
  0xa8   :  { %5625 = vmatpush1.bf16.msra.mxu0 %v7536_v37  ;;  %5797 = vmatpush1.bf16.msra.mxu1 %v7538_v38  ;;  %v640_v37 = vld [vmem:[#allocation5 + $0x1208] sm:$0xff] }
  0xa9   :  { %5626 = vmatprep.subr.bf16.mxu0 %v7553_v39  ;;  %5798 = vmatprep.subr.bf16.mxu1 %v7555_v40  ;;  %v648_v38 = vld [vmem:[#allocation5 + $0x1248] sm:$0xff]  ;;  %v7664_v39 = vcombine.low %v623_v27, %v631_v28  ;;  %v7666_v40 = vcombine.low %v624_v29, %v632_v30  ;;  %v751_v27 = vld [vmem:[#allocation5 + $0x1580] sm:$0xff] }
  0xaa   :  { %v7683_v42 = vcombine.high %v640_v37, %v648_v38  ;;  %v759_v28 = vld [vmem:[#allocation5 + $0x15c0] sm:$0xff]  ;;  %v752_v29 = vld [vmem:[#allocation5 + $0x1588] sm:$0xff] }
  0xab   :  { %v760_v30 = vld [vmem:[#allocation5 + $0x15c8] sm:$0xff] }
  0xac   :  { %5627 = vmatpush1.bf16.msra.mxu0 %v7552_v45  ;;  %5799 = vmatpush1.bf16.msra.mxu1 %v7554_v46  ;;  %v656_v45 = vld [vmem:[#allocation5 + $0x1288] sm:$0xff] }
  0xad   :  { %5628 = vmatprep.subr.bf16.mxu0 %v7569_v47  ;;  %5800 = vmatprep.subr.bf16.mxu1 %v7571_v48  ;;  %v664_v46 = vld [vmem:[#allocation5 + $0x12c8] sm:$0xff]  ;;  %v7680_v47 = vcombine.low %v639_v35, %v647_v36  ;;  %v7682_v48 = vcombine.low %v640_v37, %v648_v38  ;;  %v767_v35 = vld [vmem:[#allocation5 + $0x1600] sm:$0xff] }
  0xae   :  { %v7699_v50 = vcombine.high %v656_v45, %v664_v46  ;;  %v775_v36 = vld [vmem:[#allocation5 + $0x1640] sm:$0xff]  ;;  %v768_v37 = vld [vmem:[#allocation5 + $0x1608] sm:$0xff] }
  0xaf   :  { %v776_v38 = vld [vmem:[#allocation5 + $0x1648] sm:$0xff] }
  0xb0   :  { %5629 = vmatpush1.bf16.msra.mxu0 %v7568_v53  ;;  %5801 = vmatpush1.bf16.msra.mxu1 %v7570_v54  ;;  %v672_v53 = vld [vmem:[#allocation5 + $0x1308] sm:$0xff] }
  0xb1   :  { %5630 = vmatprep.subr.bf16.mxu0 %v7585_v55  ;;  %5802 = vmatprep.subr.bf16.mxu1 %v7587_v56  ;;  %v680_v54 = vld [vmem:[#allocation5 + $0x1348] sm:$0xff]  ;;  %v7696_v55 = vcombine.low %v655_v43, %v663_v44  ;;  %v7698_v56 = vcombine.low %v656_v45, %v664_v46  ;;  %v783_v43 = vld [vmem:[#allocation5 + $0x1680] sm:$0xff] }
  0xb2   :  { %v7715_v58 = vcombine.high %v672_v53, %v680_v54  ;;  %v791_v44 = vld [vmem:[#allocation5 + $0x16c0] sm:$0xff]  ;;  %v784_v45 = vld [vmem:[#allocation5 + $0x1688] sm:$0xff] }
  0xb3   :  { %v792_v46 = vld [vmem:[#allocation5 + $0x16c8] sm:$0xff] }
  0xb4   :  { %5631 = vmatpush1.bf16.msra.mxu0 %v7584_v61  ;;  %5803 = vmatpush1.bf16.msra.mxu1 %v7586_v62  ;;  %v688_v61 = vld [vmem:[#allocation5 + $0x1388] sm:$0xff] }
  0xb5   :  { %5632 = vmatprep.subr.bf16.mxu0 %v7601_v63  ;;  %5804 = vmatprep.subr.bf16.mxu1 %v7603_v0  ;;  %v696_v62 = vld [vmem:[#allocation5 + $0x13c8] sm:$0xff]  ;;  %v7712_v63 = vcombine.low %v671_v51, %v679_v52  ;;  %v7714_v0 = vcombine.low %v672_v53, %v680_v54  ;;  %v799_v51 = vld [vmem:[#allocation5 + $0x1700] sm:$0xff] }
  0xb6   :  { %v7731_v2 = vcombine.high %v688_v61, %v696_v62  ;;  %v807_v52 = vld [vmem:[#allocation5 + $0x1740] sm:$0xff]  ;;  %v800_v53 = vld [vmem:[#allocation5 + $0x1708] sm:$0xff] }
  0xb7   :  { %v808_v54 = vld [vmem:[#allocation5 + $0x1748] sm:$0xff] }
  0xb8   :  { %5633 = vmatpush1.bf16.msra.mxu0 %v7600_v5  ;;  %5805 = vmatpush1.bf16.msra.mxu1 %v7602_v6  ;;  %v704_v5 = vld [vmem:[#allocation5 + $0x1408] sm:$0xff] }
  0xb9   :  { %5645 = vmatprep.subr.bf16.mxu0 %v7617_v7  ;;  %5817 = vmatprep.subr.bf16.mxu1 %v7619_v8  ;;  %v712_v6 = vld [vmem:[#allocation5 + $0x1448] sm:$0xff]  ;;  %v7728_v7 = vcombine.low %v687_v59, %v695_v60  ;;  %v7730_v8 = vcombine.low %v688_v61, %v696_v62  ;;  %v815_v59 = vld [vmem:[#allocation5 + $0x1780] sm:$0xff] }
  0xba   :  { %v7747_v10 = vcombine.high %v704_v5, %v712_v6  ;;  %v823_v60 = vld [vmem:[#allocation5 + $0x17c0] sm:$0xff]  ;;  %v816_v61 = vld [vmem:[#allocation5 + $0x1788] sm:$0xff] }
  0xbb   :  { %5635 = vmatmul.mubr.bf16.vlgmr.msra.gmra.mrb[0].mxu0 %v8174_v11  ;;  %5807 = vmatmul.mubr.bf16.vlgmr.msra.gmra.mrb[0].mxu1 %v8174_v11  ;;  %v719_v11 = vld [vmem:[#allocation5 + $0x1480] sm:$0xff]  ;;  %v824_v62 = vld [vmem:[#allocation5 + $0x17c8] sm:$0xff] }
  0xbc   :  { %5646 = vmatpush1.bf16.msra.mxu0 %v7616_v14  ;;  %5818 = vmatpush1.bf16.msra.mxu1 %v7618_v15  ;;  %v728_v14 = vld [vmem:[#allocation5 + $0x14c8] sm:$0xff]  ;;  %v7744_v15 = vcombine.low %v703_v3, %v711_v4  ;;  %v831_v3 = vld [vmem:[#allocation5 + $0x1800] sm:$0xff] }
  0xbd   :  { %5647 = vmatprep.subr.bf16.mxu0 %v7633_v16  ;;  %5819 = vmatprep.subr.bf16.mxu1 %v7635_v17  ;;  %v7746_v16 = vcombine.low %v704_v5, %v712_v6  ;;  %v7761_v17 = vcombine.high %v719_v11, %v727_v12  ;;  %v7763_v18 = vcombine.high %v720_v13, %v728_v14  ;;  %v839_v4 = vld [vmem:[#allocation5 + $0x1840] sm:$0xff]  ;;  %v832_v5 = vld [vmem:[#allocation5 + $0x1808] sm:$0xff] }
  0xbe   :  { %5677 = vmatprep.mubr.bf16.mxu0 %v8175_v20  ;;  %5849 = vmatprep.mubr.bf16.mxu1 %v8175_v20  ;;  %v743_v20 = vld [vmem:[#allocation5 + $0x1540] sm:$0xff]  ;;  %v840_v6 = vld [vmem:[#allocation5 + $0x1848] sm:$0xff] }
  0xc0   :  { %5648 = vmatpush1.bf16.msra.mxu0 %v7632_v23  ;;  %5820 = vmatpush1.bf16.msra.mxu1 %v7634_v24  ;;  %v7760_v23 = vcombine.low %v719_v11, %v727_v12  ;;  %v7762_v24 = vcombine.low %v720_v13, %v728_v14  ;;  %v847_v11 = vld [vmem:[#allocation5 + $0x1880] sm:$0xff]  ;;  %v8177_v13 = vld [vmem:[#allocation2 + $0x10] ss:$28 sps:$4 sm:$0xff]   ;;  %v848_v14 = vld [vmem:[#allocation5 + $0x1888] sm:$0xff] }
  0xc1   :  { %5649 = vmatprep.subr.bf16.mxu0 %v7649_v25  ;;  %5821 = vmatprep.subr.bf16.mxu1 %v7651_v26  ;;  %v7777_v25 = vcombine.high %v735_v19, %v743_v20  ;;  %v7779_v26 = vcombine.high %v736_v21, %v744_v22  ;;  %v855_v12 = vld [vmem:[#allocation5 + $0x18c0] sm:$0xff] }
  0xc4   :  { %5650 = vmatpush1.bf16.msra.mxu0 %v7648_v31  ;;  %5822 = vmatpush1.bf16.msra.mxu1 %v7650_v32  ;;  %v7776_v31 = vcombine.low %v735_v19, %v743_v20  ;;  %v7778_v32 = vcombine.low %v736_v21, %v744_v22  ;;  %v863_v20 = vld [vmem:[#allocation5 + $0x1900] sm:$0xff]  ;;  %v864_v22 = vld [vmem:[#allocation5 + $0x1908] sm:$0xff] }
  0xc5   :  { %5651 = vmatprep.subr.bf16.mxu0 %v7665_v33  ;;  %5823 = vmatprep.subr.bf16.mxu1 %v7667_v34  ;;  %v7793_v33 = vcombine.high %v751_v27, %v759_v28  ;;  %v7795_v34 = vcombine.high %v752_v29, %v760_v30  ;;  %v871_v21 = vld [vmem:[#allocation5 + $0x1940] sm:$0xff] }
  0xc8   :  { %5652 = vmatpush1.bf16.msra.mxu0 %v7664_v39  ;;  %5824 = vmatpush1.bf16.msra.mxu1 %v7666_v40  ;;  %v7792_v39 = vcombine.low %v751_v27, %v759_v28  ;;  %v7794_v40 = vcombine.low %v752_v29, %v760_v30  ;;  %v879_v28 = vld [vmem:[#allocation5 + $0x1980] sm:$0xff]  ;;  %v8366_v30 = vmov 0  }
  0xc9   :  { %5653 = vmatprep.subr.bf16.mxu0 %v7681_v41  ;;  %5825 = vmatprep.subr.bf16.mxu1 %v7683_v42  ;;  %v7809_v41 = vcombine.high %v767_v35, %v775_v36  ;;  %v7811_v42 = vcombine.high %v768_v37, %v776_v38  ;;  %v887_v29 = vld [vmem:[#allocation5 + $0x19c0] sm:$0xff] }
  0xcc   :  { %5654 = vmatpush1.bf16.msra.mxu0 %v7680_v47  ;;  %5826 = vmatpush1.bf16.msra.mxu1 %v7682_v48  ;;  %v7808_v47 = vcombine.low %v767_v35, %v775_v36  ;;  %v7810_v48 = vcombine.low %v768_v37, %v776_v38  ;;  %v7921_v35 = vcombine.high %v879_v28, %v887_v29  ;;  %v895_v37 = vld [vmem:[#allocation5 + $0x1a00] sm:$0xff] }
  0xcd   :  { %5655 = vmatprep.subr.bf16.mxu0 %v7697_v49  ;;  %5827 = vmatprep.subr.bf16.mxu1 %v7699_v50  ;;  %v7825_v49 = vcombine.high %v783_v43, %v791_v44  ;;  %v7827_v50 = vcombine.high %v784_v45, %v792_v46  ;;  %v903_v38 = vld [vmem:[#allocation5 + $0x1a40] sm:$0xff] }
  0xd0   :  { %5656 = vmatpush1.bf16.msra.mxu0 %v7696_v55  ;;  %5828 = vmatpush1.bf16.msra.mxu1 %v7698_v56  ;;  %v7824_v55 = vcombine.low %v783_v43, %v791_v44  ;;  %v7826_v56 = vcombine.low %v784_v45, %v792_v46  ;;  %v7937_v43 = vcombine.high %v895_v37, %v903_v38  ;;  %v911_v45 = vld [vmem:[#allocation5 + $0x1a80] sm:$0xff] }
  0xd1   :  { %5657 = vmatprep.subr.bf16.mxu0 %v7713_v57  ;;  %5829 = vmatprep.subr.bf16.mxu1 %v7715_v58  ;;  %v7841_v57 = vcombine.high %v799_v51, %v807_v52  ;;  %v7843_v58 = vcombine.high %v800_v53, %v808_v54  ;;  %v919_v46 = vld [vmem:[#allocation5 + $0x1ac0] sm:$0xff] }
  0xd4   :  { %5658 = vmatpush1.bf16.msra.mxu0 %v7712_v63  ;;  %5830 = vmatpush1.bf16.msra.mxu1 %v7714_v0  ;;  %v7840_v63 = vcombine.low %v799_v51, %v807_v52  ;;  %v7842_v0 = vcombine.low %v800_v53, %v808_v54  ;;  %v7953_v51 = vcombine.high %v911_v45, %v919_v46  ;;  %v927_v53 = vld [vmem:[#allocation5 + $0x1b00] sm:$0xff] }
  0xd5   :  { %5659 = vmatprep.subr.bf16.mxu0 %v7729_v1  ;;  %5831 = vmatprep.subr.bf16.mxu1 %v7731_v2  ;;  %v7857_v1 = vcombine.high %v815_v59, %v823_v60  ;;  %v7859_v2 = vcombine.high %v816_v61, %v824_v62  ;;  %v935_v54 = vld [vmem:[#allocation5 + $0x1b40] sm:$0xff] }
  0xd8   :  { %5660 = vmatpush1.bf16.msra.mxu0 %v7728_v7  ;;  %5832 = vmatpush1.bf16.msra.mxu1 %v7730_v8  ;;  %v7856_v7 = vcombine.low %v815_v59, %v823_v60  ;;  %v7858_v8 = vcombine.low %v816_v61, %v824_v62  ;;  %v7969_v59 = vcombine.high %v927_v53, %v935_v54  ;;  %v943_v61 = vld [vmem:[#allocation5 + $0x1b80] sm:$0xff] }
  0xd9   :  { %5661 = vmatprep.subr.bf16.mxu0 %v7745_v9  ;;  %5833 = vmatprep.subr.bf16.mxu1 %v7747_v10  ;;  %v7873_v9 = vcombine.high %v831_v3, %v839_v4  ;;  %v7875_v10 = vcombine.high %v832_v5, %v840_v6  ;;  %v951_v62 = vld [vmem:[#allocation5 + $0x1bc0] sm:$0xff] }
  0xdc   :  { %5662 = vmatpush1.bf16.msra.mxu0 %v7744_v15  ;;  %5834 = vmatpush1.bf16.msra.mxu1 %v7746_v16  ;;  %v856_v15 = vld [vmem:[#allocation5 + $0x18c8] sm:$0xff]  ;;  %v7872_v16 = vcombine.low %v831_v3, %v839_v4  ;;  %v7985_v3 = vcombine.high %v943_v61, %v951_v62 }
  0xdd   :  { %5663 = vmatprep.subr.bf16.mxu0 %v7761_v17  ;;  %5835 = vmatprep.subr.bf16.mxu1 %v7763_v18  ;;  %v7874_v17 = vcombine.low %v832_v5, %v840_v6  ;;  %v7889_v18 = vcombine.high %v847_v11, %v855_v12  ;;  %v7891_v19 = vcombine.high %v848_v14, %v856_v15  ;;  %v65_v5 = vld [vmem:[#allocation5 + $0x10] sm:$0xff] }
  0xde   :  { %v73_v6 = vld [vmem:[#allocation5 + $0x50] sm:$0xff] }
  0xe0   :  { %5664 = vmatpush1.bf16.msra.mxu0 %v7760_v23  ;;  %5836 = vmatpush1.bf16.msra.mxu1 %v7762_v24  ;;  %v872_v23 = vld [vmem:[#allocation5 + $0x1948] sm:$0xff]  ;;  %v7888_v24 = vcombine.low %v847_v11, %v855_v12  ;;  %v7109_v11 = vcombine.high %v65_v5, %v73_v6 }
  0xe1   :  { %5665 = vmatprep.subr.bf16.mxu0 %v7777_v25  ;;  %5837 = vmatprep.subr.bf16.mxu1 %v7779_v26  ;;  %v7890_v25 = vcombine.low %v848_v14, %v856_v15  ;;  %v7905_v26 = vcombine.high %v863_v20, %v871_v21  ;;  %v7907_v27 = vcombine.high %v864_v22, %v872_v23  ;;  %v89_v14 = vld [vmem:[#allocation5 + $0xd0] sm:$0xff]  ;;  %v8178_v15 = vld [vmem:[#allocation2 + $0x18] ss:$28 sps:$4 sm:$0xff]  }
  0xe4   :  { %5666 = vmatpush1.bf16.msra.mxu0 %v7776_v31  ;;  %5838 = vmatpush1.bf16.msra.mxu1 %v7778_v32  ;;  %v880_v31 = vld [vmem:[#allocation5 + $0x1988] sm:$0xff] }
  0xe5   :  { %5667 = vmatprep.subr.bf16.mxu0 %v7793_v33  ;;  %5839 = vmatprep.subr.bf16.mxu1 %v7795_v34  ;;  %v888_v32 = vld [vmem:[#allocation5 + $0x19c8] sm:$0xff]  ;;  %v7904_v33 = vcombine.low %v863_v20, %v871_v21  ;;  %v7906_v34 = vcombine.low %v864_v22, %v872_v23  ;;  %v97_v22 = vld [vmem:[#allocation5 + $0x110] sm:$0xff] }
  0xe6   :  { %v7923_v36 = vcombine.high %v880_v31, %v888_v32  ;;  %v105_v23 = vld [vmem:[#allocation5 + $0x150] sm:$0xff] }
  0xe8   :  { %5668 = vmatpush1.bf16.msra.mxu0 %v7792_v39  ;;  %5840 = vmatpush1.bf16.msra.mxu1 %v7794_v40  ;;  %v896_v39 = vld [vmem:[#allocation5 + $0x1a08] sm:$0xff] }
  0xe9   :  { %5669 = vmatprep.subr.bf16.mxu0 %v7809_v41  ;;  %5841 = vmatprep.subr.bf16.mxu1 %v7811_v42  ;;  %v904_v40 = vld [vmem:[#allocation5 + $0x1a48] sm:$0xff]  ;;  %v7920_v41 = vcombine.low %v879_v28, %v887_v29  ;;  %v7922_v42 = vcombine.low %v880_v31, %v888_v32  ;;  %v7141_v28 = vcombine.high %v97_v22, %v105_v23  ;;  %v113_v31 = vld [vmem:[#allocation5 + $0x190] sm:$0xff] }
  0xea   :  { %v7939_v44 = vcombine.high %v896_v39, %v904_v40  ;;  %v121_v32 = vld [vmem:[#allocation5 + $0x1d0] sm:$0xff] }
  0xec   :  { %5670 = vmatpush1.bf16.msra.mxu0 %v7808_v47  ;;  %5842 = vmatpush1.bf16.msra.mxu1 %v7810_v48  ;;  %v912_v47 = vld [vmem:[#allocation5 + $0x1a88] sm:$0xff] }
  0xed   :  { %5671 = vmatprep.subr.bf16.mxu0 %v7825_v49  ;;  %5843 = vmatprep.subr.bf16.mxu1 %v7827_v50  ;;  %v920_v48 = vld [vmem:[#allocation5 + $0x1ac8] sm:$0xff]  ;;  %v7936_v49 = vcombine.low %v895_v37, %v903_v38  ;;  %v7938_v50 = vcombine.low %v896_v39, %v904_v40  ;;  %v7157_v38 = vcombine.high %v113_v31, %v121_v32  ;;  %v129_v40 = vld [vmem:[#allocation5 + $0x210] sm:$0xff] }
  0xee   :  { %v7955_v52 = vcombine.high %v912_v47, %v920_v48 }
  0xf0   :  { %5672 = vmatpush1.bf16.msra.mxu0 %v7824_v55  ;;  %5844 = vmatpush1.bf16.msra.mxu1 %v7826_v56  ;;  %v928_v55 = vld [vmem:[#allocation5 + $0x1b08] sm:$0xff] }
  0xf1   :  { %5673 = vmatprep.subr.bf16.mxu0 %v7841_v57  ;;  %5845 = vmatprep.subr.bf16.mxu1 %v7843_v58  ;;  %v936_v56 = vld [vmem:[#allocation5 + $0x1b48] sm:$0xff]  ;;  %v7952_v57 = vcombine.low %v911_v45, %v919_v46  ;;  %v7954_v58 = vcombine.low %v912_v47, %v920_v48  ;;  %v145_v48 = vld [vmem:[#allocation5 + $0x290] sm:$0xff] }
  0xf2   :  { %v7971_v60 = vcombine.high %v928_v55, %v936_v56 }
  0xf4   :  { %5674 = vmatpush1.bf16.msra.mxu0 %v7840_v63  ;;  %5846 = vmatpush1.bf16.msra.mxu1 %v7842_v0  ;;  %v944_v63 = vld [vmem:[#allocation5 + $0x1b88] sm:$0xff] }
  0xf5   :  { %5675 = vmatprep.subr.bf16.mxu0 %v7857_v1  ;;  %5847 = vmatprep.subr.bf16.mxu1 %v7859_v2  ;;  %v952_v0 = vld [vmem:[#allocation5 + $0x1bc8] sm:$0xff]  ;;  %v7968_v1 = vcombine.low %v927_v53, %v935_v54  ;;  %v7970_v2 = vcombine.low %v928_v55, %v936_v56  ;;  %v161_v56 = vld [vmem:[#allocation5 + $0x310] sm:$0xff] }
  0xf6   :  { %v7987_v4 = vcombine.high %v944_v63, %v952_v0 }
  0xf8   :  { %5676 = vmatpush1.bf16.msra.mxu0 %v7856_v7  ;;  %5848 = vmatpush1.bf16.msra.mxu1 %v7858_v8  ;;  %v66_v7 = vld [vmem:[#allocation5 + $0x18] sm:$0xff] }
  0xf9   :  { %5688 = vmatprep.subr.bf16.mxu0 %v7873_v9  ;;  %5860 = vmatprep.subr.bf16.mxu1 %v7875_v10  ;;  %v74_v8 = vld [vmem:[#allocation5 + $0x58] sm:$0xff]  ;;  %v7984_v9 = vcombine.low %v943_v61, %v951_v62  ;;  %v7986_v10 = vcombine.low %v944_v63, %v952_v0  ;;  %v177_v0 = vld [vmem:[#allocation5 + $0x390] sm:$0xff] }
  0xfa   :  { %v7111_v12 = vcombine.high %v66_v7, %v74_v8 }
  0xfb   :  { %5678 = vmatmul.mubr.bf16.vlgmr.msra.gmra.mrb[0].mxu0 %v8177_v13  ;;  %5850 = vmatmul.mubr.bf16.vlgmr.msra.gmra.mrb[0].mxu1 %v8177_v13  ;;  %v81_v13 = vld [vmem:[#allocation5 + $0x90] sm:$0xff] }
  0xfc   :  { %5689 = vmatpush1.bf16.msra.mxu0 %v7872_v16  ;;  %5861 = vmatpush1.bf16.msra.mxu1 %v7874_v17  ;;  %v82_v16 = vld [vmem:[#allocation5 + $0x98] sm:$0xff]  ;;  %v7125_v20 = vcombine.high %v81_v13, %v89_v14 }
  0xfd   :  { %5690 = vmatprep.subr.bf16.mxu0 %v7889_v18  ;;  %5862 = vmatprep.subr.bf16.mxu1 %v7891_v19  ;;  %v90_v17 = vld [vmem:[#allocation5 + $0xd8] sm:$0xff]  ;;  %v7108_v18 = vcombine.low %v65_v5, %v73_v6  ;;  %v7110_v19 = vcombine.low %v66_v7, %v74_v8  ;;  %v193_v8 = vld [vmem:[#allocation5 + $0x410] sm:$0xff] }
  0xfe   :  { %5720 = vmatprep.mubr.bf16.mxu0 %v8366_v30  ;;  %5892 = vmatprep.mubr.bf16.mxu1 %v8366_v30  ;;  %v7127_v21 = vcombine.high %v82_v16, %v90_v17 }
 0x100   :  { %5691 = vmatpush1.bf16.msra.mxu0 %v7888_v24  ;;  %5863 = vmatpush1.bf16.msra.mxu1 %v7890_v25  ;;  %v98_v24 = vld [vmem:[#allocation5 + $0x118] sm:$0xff] }
 0x101   :  { %5692 = vmatprep.subr.bf16.mxu0 %v7905_v26  ;;  %5864 = vmatprep.subr.bf16.mxu1 %v7907_v27  ;;  %v106_v25 = vld [vmem:[#allocation5 + $0x158] sm:$0xff]  ;;  %v7124_v26 = vcombine.low %v81_v13, %v89_v14  ;;  %v7126_v27 = vcombine.low %v82_v16, %v90_v17  ;;  %v209_v16 = vld [vmem:[#allocation5 + $0x490] sm:$0xff] }
 0x102   :  { %v7143_v29 = vcombine.high %v98_v24, %v106_v25  ;;  %v7142_v37 = vcombine.low %v98_v24, %v106_v25  ;;  %v217_v17 = vld [vmem:[#allocation5 + $0x4d0] sm:$0xff] }
 0x103   :  { %v225_v24 = vld [vmem:[#allocation5 + $0x510] sm:$0xff] }
 0x104   :  { %5693 = vmatpush1.bf16.msra.mxu0 %v7904_v33  ;;  %5865 = vmatpush1.bf16.msra.mxu1 %v7906_v34  ;;  %v8243_v33 = vld [vmem:[#allocation2 + $0x4] ss:$28 sps:$4 sm:$0xff]   ;;  %v114_v34 = vld [vmem:[#allocation5 + $0x198] sm:$0xff]  ;;  %v233_v25 = vld [vmem:[#allocation5 + $0x550] sm:$0xff] }
 0x105   :  { %5694 = vmatprep.subr.bf16.mxu0 %v7921_v35  ;;  %5866 = vmatprep.subr.bf16.mxu1 %v7923_v36  ;;  %v122_v35 = vld [vmem:[#allocation5 + $0x1d8] sm:$0xff]  ;;  %v7140_v36 = vcombine.low %v97_v22, %v105_v23  ;;  %v7253_v22 = vcombine.high %v209_v16, %v217_v17 }
 0x106   :  { %v7159_v39 = vcombine.high %v114_v34, %v122_v35  ;;  %v7158_v45 = vcombine.low %v114_v34, %v122_v35  ;;  %v249_v34 = vld [vmem:[#allocation5 + $0x5d0] sm:$0xff]  ;;  %v242_v35 = vld [vmem:[#allocation5 + $0x598] sm:$0xff] }
 0x108   :  { %5695 = vmatpush1.bf16.msra.mxu0 %v7920_v41  ;;  %5867 = vmatpush1.bf16.msra.mxu1 %v7922_v42  ;;  %v137_v41 = vld [vmem:[#allocation5 + $0x250] sm:$0xff]  ;;  %v130_v42 = vld [vmem:[#allocation5 + $0x218] sm:$0xff] }
 0x109   :  { %5696 = vmatprep.subr.bf16.mxu0 %v7937_v43  ;;  %5868 = vmatprep.subr.bf16.mxu1 %v7939_v44  ;;  %v138_v43 = vld [vmem:[#allocation5 + $0x258] sm:$0xff]  ;;  %v7156_v44 = vcombine.low %v113_v31, %v121_v32  ;;  %v7173_v46 = vcombine.high %v129_v40, %v137_v41  ;;  %v7269_v31 = vcombine.high %v225_v24, %v233_v25 }
 0x10a   :  { %v7175_v47 = vcombine.high %v130_v42, %v138_v43  ;;  %v7174_v53 = vcombine.low %v130_v42, %v138_v43  ;;  %v265_v42 = vld [vmem:[#allocation5 + $0x650] sm:$0xff]  ;;  %v258_v43 = vld [vmem:[#allocation5 + $0x618] sm:$0xff] }
 0x10c   :  { %5697 = vmatpush1.bf16.msra.mxu0 %v7936_v49  ;;  %5869 = vmatpush1.bf16.msra.mxu1 %v7938_v50  ;;  %v153_v49 = vld [vmem:[#allocation5 + $0x2d0] sm:$0xff]  ;;  %v146_v50 = vld [vmem:[#allocation5 + $0x298] sm:$0xff] }
 0x10d   :  { %5698 = vmatprep.subr.bf16.mxu0 %v7953_v51  ;;  %5870 = vmatprep.subr.bf16.mxu1 %v7955_v52  ;;  %v154_v51 = vld [vmem:[#allocation5 + $0x2d8] sm:$0xff]  ;;  %v7172_v52 = vcombine.low %v129_v40, %v137_v41  ;;  %v7189_v54 = vcombine.high %v145_v48, %v153_v49  ;;  %v257_v41 = vld [vmem:[#allocation5 + $0x610] sm:$0xff] }
 0x10e   :  { %v7191_v55 = vcombine.high %v146_v50, %v154_v51  ;;  %v7190_v61 = vcombine.low %v146_v50, %v154_v51  ;;  %v281_v50 = vld [vmem:[#allocation5 + $0x6d0] sm:$0xff]  ;;  %v274_v51 = vld [vmem:[#allocation5 + $0x698] sm:$0xff] }
 0x110   :  { %5699 = vmatpush1.bf16.msra.mxu0 %v7952_v57  ;;  %5871 = vmatpush1.bf16.msra.mxu1 %v7954_v58  ;;  %v169_v57 = vld [vmem:[#allocation5 + $0x350] sm:$0xff]  ;;  %v162_v58 = vld [vmem:[#allocation5 + $0x318] sm:$0xff] }
 0x111   :  { %5700 = vmatprep.subr.bf16.mxu0 %v7969_v59  ;;  %5872 = vmatprep.subr.bf16.mxu1 %v7971_v60  ;;  %v170_v59 = vld [vmem:[#allocation5 + $0x358] sm:$0xff]  ;;  %v7188_v60 = vcombine.low %v145_v48, %v153_v49  ;;  %v7205_v62 = vcombine.high %v161_v56, %v169_v57  ;;  %v273_v49 = vld [vmem:[#allocation5 + $0x690] sm:$0xff] }
 0x112   :  { %v7207_v63 = vcombine.high %v162_v58, %v170_v59  ;;  %v7206_v5 = vcombine.low %v162_v58, %v170_v59  ;;  %v297_v58 = vld [vmem:[#allocation5 + $0x750] sm:$0xff]  ;;  %v290_v59 = vld [vmem:[#allocation5 + $0x718] sm:$0xff] }
 0x114   :  { %5701 = vmatpush1.bf16.msra.mxu0 %v7968_v1  ;;  %5873 = vmatpush1.bf16.msra.mxu1 %v7970_v2  ;;  %v185_v1 = vld [vmem:[#allocation5 + $0x3d0] sm:$0xff]  ;;  %v178_v2 = vld [vmem:[#allocation5 + $0x398] sm:$0xff] }
 0x115   :  { %5702 = vmatprep.subr.bf16.mxu0 %v7985_v3  ;;  %5874 = vmatprep.subr.bf16.mxu1 %v7987_v4  ;;  %v186_v3 = vld [vmem:[#allocation5 + $0x3d8] sm:$0xff]  ;;  %v7204_v4 = vcombine.low %v161_v56, %v169_v57  ;;  %v7221_v6 = vcombine.high %v177_v0, %v185_v1  ;;  %v289_v57 = vld [vmem:[#allocation5 + $0x710] sm:$0xff] }
 0x116   :  { %v7223_v7 = vcombine.high %v178_v2, %v186_v3  ;;  %v7222_v13 = vcombine.low %v178_v2, %v186_v3  ;;  %v313_v2 = vld [vmem:[#allocation5 + $0x7d0] sm:$0xff]  ;;  %v306_v3 = vld [vmem:[#allocation5 + $0x798] sm:$0xff] }
 0x118   :  { %5703 = vmatpush1.bf16.msra.mxu0 %v7984_v9  ;;  %5875 = vmatpush1.bf16.msra.mxu1 %v7986_v10  ;;  %v201_v9 = vld [vmem:[#allocation5 + $0x450] sm:$0xff]  ;;  %v194_v10 = vld [vmem:[#allocation5 + $0x418] sm:$0xff] }
 0x119   :  { %5903 = vmatprep.subr.bf16.mxu0 %v7109_v11  ;;  %6075 = vmatprep.subr.bf16.mxu1 %v7111_v12  ;;  %v202_v11 = vld [vmem:[#allocation5 + $0x458] sm:$0xff]  ;;  %v7220_v12 = vcombine.low %v177_v0, %v185_v1  ;;  %v7237_v14 = vcombine.high %v193_v8, %v201_v9  ;;  %v305_v1 = vld [vmem:[#allocation5 + $0x790] sm:$0xff] }
 0x11b   :  { %5721 = vmatmul.mubr.bf16.vlgmr.msra.gmra.mrb[0].mxu0 %v8178_v15  ;;  %5893 = vmatmul.mubr.bf16.vlgmr.msra.gmra.mrb[0].mxu1 %v8178_v15  ;;  %v7239_v15 = vcombine.high %v194_v10, %v202_v11 }
 0x11c   :  { %5904 = vmatpush1.bf16.msra.mxu0 %v7108_v18  ;;  %6076 = vmatpush1.bf16.msra.mxu1 %v7110_v19  ;;  %v210_v18 = vld [vmem:[#allocation5 + $0x498] sm:$0xff] }
 0x11d   :  { %5905 = vmatprep.subr.bf16.mxu0 %v7125_v20  ;;  %6077 = vmatprep.subr.bf16.mxu1 %v7127_v21  ;;  %v218_v19 = vld [vmem:[#allocation5 + $0x4d8] sm:$0xff]  ;;  %v7236_v20 = vcombine.low %v193_v8, %v201_v9  ;;  %v7238_v21 = vcombine.low %v194_v10, %v202_v11  ;;  %v321_v9 = vld [vmem:[#allocation5 + $0x810] sm:$0xff] }
 0x11e   :  { %5935 = vmatprep.mubr.bf16.mxu0 %v8243_v33  ;;  %6107 = vmatprep.mubr.bf16.mxu1 %v8243_v33  ;;  %v7255_v23 = vcombine.high %v210_v18, %v218_v19  ;;  %v241_v33 = vld [vmem:[#allocation5 + $0x590] sm:$0xff]  ;;  %v322_v11 = vld [vmem:[#allocation5 + $0x818] sm:$0xff] }
 0x11f   :  { %v329_v10 = vld [vmem:[#allocation5 + $0x850] sm:$0xff] }
 0x120   :  { %5906 = vmatpush1.bf16.msra.mxu0 %v7124_v26  ;;  %6078 = vmatpush1.bf16.msra.mxu1 %v7126_v27  ;;  %v226_v26 = vld [vmem:[#allocation5 + $0x518] sm:$0xff] }
 0x121   :  { %5907 = vmatprep.subr.bf16.mxu0 %v7141_v28  ;;  %6079 = vmatprep.subr.bf16.mxu1 %v7143_v29  ;;  %v234_v27 = vld [vmem:[#allocation5 + $0x558] sm:$0xff]  ;;  %v7252_v28 = vcombine.low %v209_v16, %v217_v17  ;;  %v7254_v29 = vcombine.low %v210_v18, %v218_v19  ;;  %v337_v17 = vld [vmem:[#allocation5 + $0x890] sm:$0xff] }
 0x122   :  { %v7271_v32 = vcombine.high %v226_v26, %v234_v27  ;;  %v345_v18 = vld [vmem:[#allocation5 + $0x8d0] sm:$0xff]  ;;  %v338_v19 = vld [vmem:[#allocation5 + $0x898] sm:$0xff] }
 0x124   :  { %5908 = vmatpush1.bf16.msra.mxu0 %v7140_v36  ;;  %6080 = vmatpush1.bf16.msra.mxu1 %v7142_v37  ;;  %v250_v36 = vld [vmem:[#allocation5 + $0x5d8] sm:$0xff]  ;;  %v7268_v37 = vcombine.low %v225_v24, %v233_v25  ;;  %v353_v25 = vld [vmem:[#allocation5 + $0x910] sm:$0xff] }
 0x125   :  { %5909 = vmatprep.subr.bf16.mxu0 %v7157_v38  ;;  %6081 = vmatprep.subr.bf16.mxu1 %v7159_v39  ;;  %v7270_v38 = vcombine.low %v226_v26, %v234_v27  ;;  %v7285_v39 = vcombine.high %v241_v33, %v249_v34  ;;  %v7287_v40 = vcombine.high %v242_v35, %v250_v36  ;;  %v361_v26 = vld [vmem:[#allocation5 + $0x950] sm:$0xff]  ;;  %v8244_v27 = vld [vmem:[#allocation2] ss:$28 sps:$4 sm:$0xff]  }
 0x128   :  { %5910 = vmatpush1.bf16.msra.mxu0 %v7156_v44  ;;  %6082 = vmatpush1.bf16.msra.mxu1 %v7158_v45  ;;  %v266_v44 = vld [vmem:[#allocation5 + $0x658] sm:$0xff]  ;;  %v7284_v45 = vcombine.low %v241_v33, %v249_v34  ;;  %v7397_v33 = vcombine.high %v353_v25, %v361_v26 }
 0x129   :  { %5911 = vmatprep.subr.bf16.mxu0 %v7173_v46  ;;  %6083 = vmatprep.subr.bf16.mxu1 %v7175_v47  ;;  %v7286_v46 = vcombine.low %v242_v35, %v250_v36  ;;  %v7301_v47 = vcombine.high %v257_v41, %v265_v42  ;;  %v7303_v48 = vcombine.high %v258_v43, %v266_v44  ;;  %v369_v35 = vld [vmem:[#allocation5 + $0x990] sm:$0xff] }
 0x12a   :  { %v377_v36 = vld [vmem:[#allocation5 + $0x9d0] sm:$0xff] }
 0x12c   :  { %5912 = vmatpush1.bf16.msra.mxu0 %v7172_v52  ;;  %6084 = vmatpush1.bf16.msra.mxu1 %v7174_v53  ;;  %v282_v52 = vld [vmem:[#allocation5 + $0x6d8] sm:$0xff]  ;;  %v7300_v53 = vcombine.low %v257_v41, %v265_v42  ;;  %v7413_v42 = vcombine.high %v369_v35, %v377_v36 }
 0x12d   :  { %5913 = vmatprep.subr.bf16.mxu0 %v7189_v54  ;;  %6085 = vmatprep.subr.bf16.mxu1 %v7191_v55  ;;  %v7302_v54 = vcombine.low %v258_v43, %v266_v44  ;;  %v7317_v55 = vcombine.high %v273_v49, %v281_v50  ;;  %v7319_v56 = vcombine.high %v274_v51, %v282_v52  ;;  %v385_v44 = vld [vmem:[#allocation5 + $0xa10] sm:$0xff] }
 0x130   :  { %5914 = vmatpush1.bf16.msra.mxu0 %v7188_v60  ;;  %6086 = vmatpush1.bf16.msra.mxu1 %v7190_v61  ;;  %v298_v60 = vld [vmem:[#allocation5 + $0x758] sm:$0xff]  ;;  %v7316_v61 = vcombine.low %v273_v49, %v281_v50 }
 0x131   :  { %5915 = vmatprep.subr.bf16.mxu0 %v7205_v62  ;;  %6087 = vmatprep.subr.bf16.mxu1 %v7207_v63  ;;  %v7318_v62 = vcombine.low %v274_v51, %v282_v52  ;;  %v7333_v63 = vcombine.high %v289_v57, %v297_v58  ;;  %v7335_v0 = vcombine.high %v290_v59, %v298_v60  ;;  %v401_v52 = vld [vmem:[#allocation5 + $0xa90] sm:$0xff] }
 0x134   :  { %5916 = vmatpush1.bf16.msra.mxu0 %v7204_v4  ;;  %6088 = vmatpush1.bf16.msra.mxu1 %v7206_v5  ;;  %v314_v4 = vld [vmem:[#allocation5 + $0x7d8] sm:$0xff]  ;;  %v7332_v5 = vcombine.low %v289_v57, %v297_v58 }
 0x135   :  { %5917 = vmatprep.subr.bf16.mxu0 %v7221_v6  ;;  %6089 = vmatprep.subr.bf16.mxu1 %v7223_v7  ;;  %v7334_v6 = vcombine.low %v290_v59, %v298_v60  ;;  %v7349_v7 = vcombine.high %v305_v1, %v313_v2  ;;  %v7351_v8 = vcombine.high %v306_v3, %v314_v4  ;;  %v417_v60 = vld [vmem:[#allocation5 + $0xb10] sm:$0xff] }
 0x138   :  { %5918 = vmatpush1.bf16.msra.mxu0 %v7220_v12  ;;  %6090 = vmatpush1.bf16.msra.mxu1 %v7222_v13  ;;  %v330_v12 = vld [vmem:[#allocation5 + $0x858] sm:$0xff]  ;;  %v7348_v13 = vcombine.low %v305_v1, %v313_v2 }
 0x139   :  { %5919 = vmatprep.subr.bf16.mxu0 %v7237_v14  ;;  %6091 = vmatprep.subr.bf16.mxu1 %v7239_v15  ;;  %v7350_v14 = vcombine.low %v306_v3, %v314_v4  ;;  %v7365_v15 = vcombine.high %v321_v9, %v329_v10  ;;  %v7367_v16 = vcombine.high %v322_v11, %v330_v12  ;;  %v433_v4 = vld [vmem:[#allocation5 + $0xb90] sm:$0xff] }
 0x13c   :  { %5920 = vmatpush1.bf16.msra.mxu0 %v7236_v20  ;;  %6092 = vmatpush1.bf16.msra.mxu1 %v7238_v21  ;;  %v346_v20 = vld [vmem:[#allocation5 + $0x8d8] sm:$0xff]  ;;  %v7364_v21 = vcombine.low %v321_v9, %v329_v10 }
 0x13d   :  { %5921 = vmatprep.subr.bf16.mxu0 %v7253_v22  ;;  %6093 = vmatprep.subr.bf16.mxu1 %v7255_v23  ;;  %v7366_v22 = vcombine.low %v322_v11, %v330_v12  ;;  %v7381_v23 = vcombine.high %v337_v17, %v345_v18  ;;  %v7383_v24 = vcombine.high %v338_v19, %v346_v20  ;;  %v449_v12 = vld [vmem:[#allocation5 + $0xc10] sm:$0xff] }
 0x140   :  { %5922 = vmatpush1.bf16.msra.mxu0 %v7252_v28  ;;  %6094 = vmatpush1.bf16.msra.mxu1 %v7254_v29  ;;  %v354_v28 = vld [vmem:[#allocation5 + $0x918] sm:$0xff] }
 0x141   :  { %5923 = vmatprep.subr.bf16.mxu0 %v7269_v31  ;;  %6095 = vmatprep.subr.bf16.mxu1 %v7271_v32  ;;  %v362_v29 = vld [vmem:[#allocation5 + $0x958] sm:$0xff]  ;;  %v7380_v31 = vcombine.low %v337_v17, %v345_v18  ;;  %v7382_v32 = vcombine.low %v338_v19, %v346_v20  ;;  %v465_v20 = vld [vmem:[#allocation5 + $0xc90] sm:$0xff] }
 0x142   :  { %v7399_v34 = vcombine.high %v354_v28, %v362_v29  ;;  %v7398_v41 = vcombine.low %v354_v28, %v362_v29  ;;  %v481_v28 = vld [vmem:[#allocation5 + $0xd10] sm:$0xff] }
 0x143   :  { %v489_v29 = vld [vmem:[#allocation5 + $0xd50] sm:$0xff] }
 0x144   :  { %5924 = vmatpush1.bf16.msra.mxu0 %v7268_v37  ;;  %6096 = vmatpush1.bf16.msra.mxu1 %v7270_v38  ;;  %v8245_v37 = vld [vmem:[#allocation2 + $0xc] ss:$28 sps:$4 sm:$0xff]   ;;  %v370_v38 = vld [vmem:[#allocation5 + $0x998] sm:$0xff] }
 0x145   :  { %5925 = vmatprep.subr.bf16.mxu0 %v7285_v39  ;;  %6097 = vmatprep.subr.bf16.mxu1 %v7287_v40  ;;  %v378_v39 = vld [vmem:[#allocation5 + $0x9d8] sm:$0xff]  ;;  %v7396_v40 = vcombine.low %v353_v25, %v361_v26 }
 0x146   :  { %v7415_v43 = vcombine.high %v370_v38, %v378_v39  ;;  %v7414_v49 = vcombine.low %v370_v38, %v378_v39  ;;  %v505_v38 = vld [vmem:[#allocation5 + $0xdd0] sm:$0xff]  ;;  %v498_v39 = vld [vmem:[#allocation5 + $0xd98] sm:$0xff] }
 0x148   :  { %5926 = vmatpush1.bf16.msra.mxu0 %v7284_v45  ;;  %6098 = vmatpush1.bf16.msra.mxu1 %v7286_v46  ;;  %v393_v45 = vld [vmem:[#allocation5 + $0xa50] sm:$0xff]  ;;  %v386_v46 = vld [vmem:[#allocation5 + $0xa18] sm:$0xff] }
 0x149   :  { %5927 = vmatprep.subr.bf16.mxu0 %v7301_v47  ;;  %6099 = vmatprep.subr.bf16.mxu1 %v7303_v48  ;;  %v394_v47 = vld [vmem:[#allocation5 + $0xa58] sm:$0xff]  ;;  %v7412_v48 = vcombine.low %v369_v35, %v377_v36  ;;  %v7429_v50 = vcombine.high %v385_v44, %v393_v45  ;;  %v7525_v35 = vcombine.high %v481_v28, %v489_v29 }
 0x14a   :  { %v7431_v51 = vcombine.high %v386_v46, %v394_v47  ;;  %v7430_v57 = vcombine.low %v386_v46, %v394_v47  ;;  %v521_v46 = vld [vmem:[#allocation5 + $0xe50] sm:$0xff]  ;;  %v514_v47 = vld [vmem:[#allocation5 + $0xe18] sm:$0xff] }
 0x14c   :  { %5928 = vmatpush1.bf16.msra.mxu0 %v7300_v53  ;;  %6100 = vmatpush1.bf16.msra.mxu1 %v7302_v54  ;;  %v409_v53 = vld [vmem:[#allocation5 + $0xad0] sm:$0xff]  ;;  %v402_v54 = vld [vmem:[#allocation5 + $0xa98] sm:$0xff] }
 0x14d   :  { %5929 = vmatprep.subr.bf16.mxu0 %v7317_v55  ;;  %6101 = vmatprep.subr.bf16.mxu1 %v7319_v56  ;;  %v410_v55 = vld [vmem:[#allocation5 + $0xad8] sm:$0xff]  ;;  %v7428_v56 = vcombine.low %v385_v44, %v393_v45  ;;  %v7445_v58 = vcombine.high %v401_v52, %v409_v53  ;;  %v513_v45 = vld [vmem:[#allocation5 + $0xe10] sm:$0xff] }
 0x14e   :  { %v7447_v59 = vcombine.high %v402_v54, %v410_v55  ;;  %v7446_v1 = vcombine.low %v402_v54, %v410_v55  ;;  %v537_v54 = vld [vmem:[#allocation5 + $0xed0] sm:$0xff]  ;;  %v530_v55 = vld [vmem:[#allocation5 + $0xe98] sm:$0xff] }
 0x150   :  { %5930 = vmatpush1.bf16.msra.mxu0 %v7316_v61  ;;  %6102 = vmatpush1.bf16.msra.mxu1 %v7318_v62  ;;  %v425_v61 = vld [vmem:[#allocation5 + $0xb50] sm:$0xff]  ;;  %v418_v62 = vld [vmem:[#allocation5 + $0xb18] sm:$0xff] }
 0x151   :  { %5931 = vmatprep.subr.bf16.mxu0 %v7333_v63  ;;  %6103 = vmatprep.subr.bf16.mxu1 %v7335_v0  ;;  %v426_v63 = vld [vmem:[#allocation5 + $0xb58] sm:$0xff]  ;;  %v7444_v0 = vcombine.low %v401_v52, %v409_v53  ;;  %v7461_v2 = vcombine.high %v417_v60, %v425_v61  ;;  %v529_v53 = vld [vmem:[#allocation5 + $0xe90] sm:$0xff] }
 0x152   :  { %v7463_v3 = vcombine.high %v418_v62, %v426_v63  ;;  %v7462_v9 = vcombine.low %v418_v62, %v426_v63  ;;  %v553_v62 = vld [vmem:[#allocation5 + $0xf50] sm:$0xff]  ;;  %v546_v63 = vld [vmem:[#allocation5 + $0xf18] sm:$0xff] }
 0x154   :  { %5932 = vmatpush1.bf16.msra.mxu0 %v7332_v5  ;;  %6104 = vmatpush1.bf16.msra.mxu1 %v7334_v6  ;;  %v441_v5 = vld [vmem:[#allocation5 + $0xbd0] sm:$0xff]  ;;  %v434_v6 = vld [vmem:[#allocation5 + $0xb98] sm:$0xff] }
 0x155   :  { %5933 = vmatprep.subr.bf16.mxu0 %v7349_v7  ;;  %6105 = vmatprep.subr.bf16.mxu1 %v7351_v8  ;;  %v442_v7 = vld [vmem:[#allocation5 + $0xbd8] sm:$0xff]  ;;  %v7460_v8 = vcombine.low %v417_v60, %v425_v61  ;;  %v7477_v10 = vcombine.high %v433_v4, %v441_v5  ;;  %v545_v61 = vld [vmem:[#allocation5 + $0xf10] sm:$0xff] }
 0x156   :  { %v7479_v11 = vcombine.high %v434_v6, %v442_v7  ;;  %v7478_v17 = vcombine.low %v434_v6, %v442_v7  ;;  %v569_v6 = vld [vmem:[#allocation5 + $0xfd0] sm:$0xff]  ;;  %v562_v7 = vld [vmem:[#allocation5 + $0xf98] sm:$0xff] }
 0x158   :  { %5934 = vmatpush1.bf16.msra.mxu0 %v7348_v13  ;;  %6106 = vmatpush1.bf16.msra.mxu1 %v7350_v14  ;;  %v457_v13 = vld [vmem:[#allocation5 + $0xc50] sm:$0xff]  ;;  %v450_v14 = vld [vmem:[#allocation5 + $0xc18] sm:$0xff] }
 0x159   :  { %5946 = vmatprep.subr.bf16.mxu0 %v7365_v15  ;;  %6118 = vmatprep.subr.bf16.mxu1 %v7367_v16  ;;  %v458_v15 = vld [vmem:[#allocation5 + $0xc58] sm:$0xff]  ;;  %v7476_v16 = vcombine.low %v433_v4, %v441_v5  ;;  %v7493_v18 = vcombine.high %v449_v12, %v457_v13  ;;  %v561_v5 = vld [vmem:[#allocation5 + $0xf90] sm:$0xff] }
 0x15a   :  { %v7495_v19 = vcombine.high %v450_v14, %v458_v15  ;;  %v7494_v25 = vcombine.low %v450_v14, %v458_v15  ;;  %v585_v14 = vld [vmem:[#allocation5 + $0x1050] sm:$0xff]  ;;  %v578_v15 = vld [vmem:[#allocation5 + $0x1018] sm:$0xff] }
 0x15b   :  { %5936 = vmatmul.mubr.bf16.vlgmr.msra.gmra.mrb[4].mxu0 %v8244_v27  ;;  %6108 = vmatmul.mubr.bf16.vlgmr.msra.gmra.mrb[4].mxu1 %v8244_v27 }
 0x15c   :  { %5947 = vmatpush1.bf16.msra.mxu0 %v7364_v21  ;;  %6119 = vmatpush1.bf16.msra.mxu1 %v7366_v22  ;;  %v473_v21 = vld [vmem:[#allocation5 + $0xcd0] sm:$0xff]  ;;  %v466_v22 = vld [vmem:[#allocation5 + $0xc98] sm:$0xff] }
 0x15d   :  { %5948 = vmatprep.subr.bf16.mxu0 %v7381_v23  ;;  %6120 = vmatprep.subr.bf16.mxu1 %v7383_v24  ;;  %v474_v23 = vld [vmem:[#allocation5 + $0xcd8] sm:$0xff]  ;;  %v7492_v24 = vcombine.low %v449_v12, %v457_v13  ;;  %v7509_v26 = vcombine.high %v465_v20, %v473_v21  ;;  %v577_v13 = vld [vmem:[#allocation5 + $0x1010] sm:$0xff] }
 0x15e   :  { %5978 = vmatprep.mubr.bf16.mxu0 %v8245_v37  ;;  %6150 = vmatprep.mubr.bf16.mxu1 %v8245_v37  ;;  %v7511_v27 = vcombine.high %v466_v22, %v474_v23  ;;  %v497_v37 = vld [vmem:[#allocation5 + $0xd90] sm:$0xff] }
 0x160   :  { %5949 = vmatpush1.bf16.msra.mxu0 %v7380_v31  ;;  %6121 = vmatpush1.bf16.msra.mxu1 %v7382_v32  ;;  %v482_v31 = vld [vmem:[#allocation5 + $0xd18] sm:$0xff] }
 0x161   :  { %5950 = vmatprep.subr.bf16.mxu0 %v7397_v33  ;;  %6122 = vmatprep.subr.bf16.mxu1 %v7399_v34  ;;  %v490_v32 = vld [vmem:[#allocation5 + $0xd58] sm:$0xff]  ;;  %v7508_v33 = vcombine.low %v465_v20, %v473_v21  ;;  %v7510_v34 = vcombine.low %v466_v22, %v474_v23  ;;  %v593_v21 = vld [vmem:[#allocation5 + $0x1090] sm:$0xff] }
 0x162   :  { %v7527_v36 = vcombine.high %v482_v31, %v490_v32  ;;  %v601_v22 = vld [vmem:[#allocation5 + $0x10d0] sm:$0xff]  ;;  %v594_v23 = vld [vmem:[#allocation5 + $0x1098] sm:$0xff] }
 0x164   :  { %5951 = vmatpush1.bf16.msra.mxu0 %v7396_v40  ;;  %6123 = vmatpush1.bf16.msra.mxu1 %v7398_v41  ;;  %v506_v40 = vld [vmem:[#allocation5 + $0xdd8] sm:$0xff]  ;;  %v7524_v41 = vcombine.low %v481_v28, %v489_v29  ;;  %v609_v29 = vld [vmem:[#allocation5 + $0x1110] sm:$0xff] }
 0x165   :  { %5952 = vmatprep.subr.bf16.mxu0 %v7413_v42  ;;  %6124 = vmatprep.subr.bf16.mxu1 %v7415_v43  ;;  %v7526_v42 = vcombine.low %v482_v31, %v490_v32  ;;  %v7541_v43 = vcombine.high %v497_v37, %v505_v38  ;;  %v7543_v44 = vcombine.high %v498_v39, %v506_v40  ;;  %v617_v31 = vld [vmem:[#allocation5 + $0x1150] sm:$0xff] }
 0x166   :  { %v8246_v32 = vld [vmem:[#allocation2 + $0x8] ss:$28 sps:$4 sm:$0xff]  }
 0x168   :  { %5953 = vmatpush1.bf16.msra.mxu0 %v7412_v48  ;;  %6125 = vmatpush1.bf16.msra.mxu1 %v7414_v49  ;;  %v522_v48 = vld [vmem:[#allocation5 + $0xe58] sm:$0xff]  ;;  %v7540_v49 = vcombine.low %v497_v37, %v505_v38  ;;  %v7653_v37 = vcombine.high %v609_v29, %v617_v31 }
 0x169   :  { %5954 = vmatprep.subr.bf16.mxu0 %v7429_v50  ;;  %6126 = vmatprep.subr.bf16.mxu1 %v7431_v51  ;;  %v7542_v50 = vcombine.low %v498_v39, %v506_v40  ;;  %v7557_v51 = vcombine.high %v513_v45, %v521_v46  ;;  %v7559_v52 = vcombine.high %v514_v47, %v522_v48  ;;  %v625_v39 = vld [vmem:[#allocation5 + $0x1190] sm:$0xff] }
 0x16a   :  { %v633_v40 = vld [vmem:[#allocation5 + $0x11d0] sm:$0xff] }
 0x16c   :  { %5955 = vmatpush1.bf16.msra.mxu0 %v7428_v56  ;;  %6127 = vmatpush1.bf16.msra.mxu1 %v7430_v57  ;;  %v538_v56 = vld [vmem:[#allocation5 + $0xed8] sm:$0xff]  ;;  %v7556_v57 = vcombine.low %v513_v45, %v521_v46  ;;  %v7669_v46 = vcombine.high %v625_v39, %v633_v40 }
 0x16d   :  { %5956 = vmatprep.subr.bf16.mxu0 %v7445_v58  ;;  %6128 = vmatprep.subr.bf16.mxu1 %v7447_v59  ;;  %v7558_v58 = vcombine.low %v514_v47, %v522_v48  ;;  %v7573_v59 = vcombine.high %v529_v53, %v537_v54  ;;  %v7575_v60 = vcombine.high %v530_v55, %v538_v56  ;;  %v641_v48 = vld [vmem:[#allocation5 + $0x1210] sm:$0xff] }
 0x170   :  { %5957 = vmatpush1.bf16.msra.mxu0 %v7444_v0  ;;  %6129 = vmatpush1.bf16.msra.mxu1 %v7446_v1  ;;  %v554_v0 = vld [vmem:[#allocation5 + $0xf58] sm:$0xff]  ;;  %v7572_v1 = vcombine.low %v529_v53, %v537_v54 }
 0x171   :  { %5958 = vmatprep.subr.bf16.mxu0 %v7461_v2  ;;  %6130 = vmatprep.subr.bf16.mxu1 %v7463_v3  ;;  %v7574_v2 = vcombine.low %v530_v55, %v538_v56  ;;  %v7589_v3 = vcombine.high %v545_v61, %v553_v62  ;;  %v7591_v4 = vcombine.high %v546_v63, %v554_v0  ;;  %v657_v56 = vld [vmem:[#allocation5 + $0x1290] sm:$0xff] }
 0x174   :  { %5959 = vmatpush1.bf16.msra.mxu0 %v7460_v8  ;;  %6131 = vmatpush1.bf16.msra.mxu1 %v7462_v9  ;;  %v570_v8 = vld [vmem:[#allocation5 + $0xfd8] sm:$0xff]  ;;  %v7588_v9 = vcombine.low %v545_v61, %v553_v62 }
 0x175   :  { %5960 = vmatprep.subr.bf16.mxu0 %v7477_v10  ;;  %6132 = vmatprep.subr.bf16.mxu1 %v7479_v11  ;;  %v7590_v10 = vcombine.low %v546_v63, %v554_v0  ;;  %v7605_v11 = vcombine.high %v561_v5, %v569_v6  ;;  %v7607_v12 = vcombine.high %v562_v7, %v570_v8  ;;  %v673_v0 = vld [vmem:[#allocation5 + $0x1310] sm:$0xff] }
 0x178   :  { %5961 = vmatpush1.bf16.msra.mxu0 %v7476_v16  ;;  %6133 = vmatpush1.bf16.msra.mxu1 %v7478_v17  ;;  %v586_v16 = vld [vmem:[#allocation5 + $0x1058] sm:$0xff]  ;;  %v7604_v17 = vcombine.low %v561_v5, %v569_v6 }
 0x179   :  { %5962 = vmatprep.subr.bf16.mxu0 %v7493_v18  ;;  %6134 = vmatprep.subr.bf16.mxu1 %v7495_v19  ;;  %v7606_v18 = vcombine.low %v562_v7, %v570_v8  ;;  %v7621_v19 = vcombine.high %v577_v13, %v585_v14  ;;  %v7623_v20 = vcombine.high %v578_v15, %v586_v16  ;;  %v689_v8 = vld [vmem:[#allocation5 + $0x1390] sm:$0xff] }
 0x17c   :  { %5963 = vmatpush1.bf16.msra.mxu0 %v7492_v24  ;;  %6135 = vmatpush1.bf16.msra.mxu1 %v7494_v25  ;;  %v602_v24 = vld [vmem:[#allocation5 + $0x10d8] sm:$0xff]  ;;  %v7620_v25 = vcombine.low %v577_v13, %v585_v14 }
 0x17d   :  { %5964 = vmatprep.subr.bf16.mxu0 %v7509_v26  ;;  %6136 = vmatprep.subr.bf16.mxu1 %v7511_v27  ;;  %v7622_v26 = vcombine.low %v578_v15, %v586_v16  ;;  %v7637_v27 = vcombine.high %v593_v21, %v601_v22  ;;  %v7639_v28 = vcombine.high %v594_v23, %v602_v24  ;;  %v705_v16 = vld [vmem:[#allocation5 + $0x1410] sm:$0xff] }
 0x180   :  { %5965 = vmatpush1.bf16.msra.mxu0 %v7508_v33  ;;  %6137 = vmatpush1.bf16.msra.mxu1 %v7510_v34  ;;  %v610_v33 = vld [vmem:[#allocation5 + $0x1118] sm:$0xff] }
 0x181   :  { %5966 = vmatprep.subr.bf16.mxu0 %v7525_v35  ;;  %6138 = vmatprep.subr.bf16.mxu1 %v7527_v36  ;;  %v618_v34 = vld [vmem:[#allocation5 + $0x1158] sm:$0xff]  ;;  %v7636_v35 = vcombine.low %v593_v21, %v601_v22  ;;  %v7638_v36 = vcombine.low %v594_v23, %v602_v24  ;;  %v721_v24 = vld [vmem:[#allocation5 + $0x1490] sm:$0xff] }
 0x182   :  { %v7655_v38 = vcombine.high %v610_v33, %v618_v34  ;;  %v7654_v45 = vcombine.low %v610_v33, %v618_v34  ;;  %v737_v33 = vld [vmem:[#allocation5 + $0x1510] sm:$0xff] }
 0x183   :  { %v745_v34 = vld [vmem:[#allocation5 + $0x1550] sm:$0xff] }
 0x184   :  { %5967 = vmatpush1.bf16.msra.mxu0 %v7524_v41  ;;  %6139 = vmatpush1.bf16.msra.mxu1 %v7526_v42  ;;  %v8247_v41 = vld [vmem:[#allocation2 + $0x14] ss:$28 sps:$4 sm:$0xff]  }
 0x185   :  { %5968 = vmatprep.subr.bf16.mxu0 %v7541_v43  ;;  %6140 = vmatprep.subr.bf16.mxu1 %v7543_v44  ;;  %v626_v42 = vld [vmem:[#allocation5 + $0x1198] sm:$0xff]  ;;  %v7652_v44 = vcombine.low %v609_v29, %v617_v31 }
 0x186   :  { %v634_v43 = vld [vmem:[#allocation5 + $0x11d8] sm:$0xff] }
 0x187   :  { %v7671_v47 = vcombine.high %v626_v42, %v634_v43  ;;  %v7670_v53 = vcombine.low %v626_v42, %v634_v43  ;;  %v761_v42 = vld [vmem:[#allocation5 + $0x15d0] sm:$0xff]  ;;  %v754_v43 = vld [vmem:[#allocation5 + $0x1598] sm:$0xff] }
 0x188   :  { %5969 = vmatpush1.bf16.msra.mxu0 %v7540_v49  ;;  %6141 = vmatpush1.bf16.msra.mxu1 %v7542_v50  ;;  %v649_v49 = vld [vmem:[#allocation5 + $0x1250] sm:$0xff]  ;;  %v642_v50 = vld [vmem:[#allocation5 + $0x1218] sm:$0xff] }
 0x189   :  { %5970 = vmatprep.subr.bf16.mxu0 %v7557_v51  ;;  %6142 = vmatprep.subr.bf16.mxu1 %v7559_v52  ;;  %v650_v51 = vld [vmem:[#allocation5 + $0x1258] sm:$0xff]  ;;  %v7668_v52 = vcombine.low %v625_v39, %v633_v40  ;;  %v7685_v54 = vcombine.high %v641_v48, %v649_v49  ;;  %v7781_v39 = vcombine.high %v737_v33, %v745_v34 }
 0x18a   :  { %v7687_v55 = vcombine.high %v642_v50, %v650_v51  ;;  %v7686_v61 = vcombine.low %v642_v50, %v650_v51  ;;  %v777_v50 = vld [vmem:[#allocation5 + $0x1650] sm:$0xff]  ;;  %v770_v51 = vld [vmem:[#allocation5 + $0x1618] sm:$0xff] }
 0x18c   :  { %5971 = vmatpush1.bf16.msra.mxu0 %v7556_v57  ;;  %6143 = vmatpush1.bf16.msra.mxu1 %v7558_v58  ;;  %v665_v57 = vld [vmem:[#allocation5 + $0x12d0] sm:$0xff]  ;;  %v658_v58 = vld [vmem:[#allocation5 + $0x1298] sm:$0xff] }
 0x18d   :  { %5972 = vmatprep.subr.bf16.mxu0 %v7573_v59  ;;  %6144 = vmatprep.subr.bf16.mxu1 %v7575_v60  ;;  %v666_v59 = vld [vmem:[#allocation5 + $0x12d8] sm:$0xff]  ;;  %v7684_v60 = vcombine.low %v641_v48, %v649_v49  ;;  %v7701_v62 = vcombine.high %v657_v56, %v665_v57  ;;  %v769_v49 = vld [vmem:[#allocation5 + $0x1610] sm:$0xff] }
 0x18e   :  { %v7703_v63 = vcombine.high %v658_v58, %v666_v59  ;;  %v7702_v5 = vcombine.low %v658_v58, %v666_v59  ;;  %v793_v58 = vld [vmem:[#allocation5 + $0x16d0] sm:$0xff]  ;;  %v786_v59 = vld [vmem:[#allocation5 + $0x1698] sm:$0xff] }
 0x190   :  { %5973 = vmatpush1.bf16.msra.mxu0 %v7572_v1  ;;  %6145 = vmatpush1.bf16.msra.mxu1 %v7574_v2  ;;  %v681_v1 = vld [vmem:[#allocation5 + $0x1350] sm:$0xff]  ;;  %v674_v2 = vld [vmem:[#allocation5 + $0x1318] sm:$0xff] }
 0x191   :  { %5974 = vmatprep.subr.bf16.mxu0 %v7589_v3  ;;  %6146 = vmatprep.subr.bf16.mxu1 %v7591_v4  ;;  %v682_v3 = vld [vmem:[#allocation5 + $0x1358] sm:$0xff]  ;;  %v7700_v4 = vcombine.low %v657_v56, %v665_v57  ;;  %v7717_v6 = vcombine.high %v673_v0, %v681_v1  ;;  %v785_v57 = vld [vmem:[#allocation5 + $0x1690] sm:$0xff] }
 0x192   :  { %v7719_v7 = vcombine.high %v674_v2, %v682_v3  ;;  %v7718_v13 = vcombine.low %v674_v2, %v682_v3  ;;  %v809_v2 = vld [vmem:[#allocation5 + $0x1750] sm:$0xff]  ;;  %v802_v3 = vld [vmem:[#allocation5 + $0x1718] sm:$0xff] }
 0x194   :  { %5975 = vmatpush1.bf16.msra.mxu0 %v7588_v9  ;;  %6147 = vmatpush1.bf16.msra.mxu1 %v7590_v10  ;;  %v697_v9 = vld [vmem:[#allocation5 + $0x13d0] sm:$0xff]  ;;  %v690_v10 = vld [vmem:[#allocation5 + $0x1398] sm:$0xff] }
 0x195   :  { %5976 = vmatprep.subr.bf16.mxu0 %v7605_v11  ;;  %6148 = vmatprep.subr.bf16.mxu1 %v7607_v12  ;;  %v698_v11 = vld [vmem:[#allocation5 + $0x13d8] sm:$0xff]  ;;  %v7716_v12 = vcombine.low %v673_v0, %v681_v1  ;;  %v7733_v14 = vcombine.high %v689_v8, %v697_v9  ;;  %v801_v1 = vld [vmem:[#allocation5 + $0x1710] sm:$0xff] }
 0x196   :  { %v7735_v15 = vcombine.high %v690_v10, %v698_v11  ;;  %v7734_v21 = vcombine.low %v690_v10, %v698_v11  ;;  %v825_v10 = vld [vmem:[#allocation5 + $0x17d0] sm:$0xff]  ;;  %v818_v11 = vld [vmem:[#allocation5 + $0x1798] sm:$0xff] }
 0x198   :  { %5977 = vmatpush1.bf16.msra.mxu0 %v7604_v17  ;;  %6149 = vmatpush1.bf16.msra.mxu1 %v7606_v18  ;;  %v713_v17 = vld [vmem:[#allocation5 + $0x1450] sm:$0xff]  ;;  %v706_v18 = vld [vmem:[#allocation5 + $0x1418] sm:$0xff] }
 0x199   :  { %5989 = vmatprep.subr.bf16.mxu0 %v7621_v19  ;;  %6161 = vmatprep.subr.bf16.mxu1 %v7623_v20  ;;  %v714_v19 = vld [vmem:[#allocation5 + $0x1458] sm:$0xff]  ;;  %v7732_v20 = vcombine.low %v689_v8, %v697_v9  ;;  %v7749_v22 = vcombine.high %v705_v16, %v713_v17  ;;  %v817_v9 = vld [vmem:[#allocation5 + $0x1790] sm:$0xff] }
 0x19a   :  { %v7751_v23 = vcombine.high %v706_v18, %v714_v19  ;;  %v7750_v29 = vcombine.low %v706_v18, %v714_v19  ;;  %v841_v18 = vld [vmem:[#allocation5 + $0x1850] sm:$0xff]  ;;  %v834_v19 = vld [vmem:[#allocation5 + $0x1818] sm:$0xff] }
 0x19b   :  { %5979 = vmatmul.mubr.bf16.vlgmr.msra.gmra.mrb[4].mxu0 %v8246_v32  ;;  %6151 = vmatmul.mubr.bf16.vlgmr.msra.gmra.mrb[4].mxu1 %v8246_v32 }
 0x19c   :  { %5990 = vmatpush1.bf16.msra.mxu0 %v7620_v25  ;;  %6162 = vmatpush1.bf16.msra.mxu1 %v7622_v26  ;;  %v729_v25 = vld [vmem:[#allocation5 + $0x14d0] sm:$0xff]  ;;  %v722_v26 = vld [vmem:[#allocation5 + $0x1498] sm:$0xff] }
 0x19d   :  { %5991 = vmatprep.subr.bf16.mxu0 %v7637_v27  ;;  %6163 = vmatprep.subr.bf16.mxu1 %v7639_v28  ;;  %v730_v27 = vld [vmem:[#allocation5 + $0x14d8] sm:$0xff]  ;;  %v7748_v28 = vcombine.low %v705_v16, %v713_v17  ;;  %v7765_v31 = vcombine.high %v721_v24, %v729_v25  ;;  %v833_v17 = vld [vmem:[#allocation5 + $0x1810] sm:$0xff] }
 0x19e   :  { %6021 = vmatprep.mubr.bf16.mxu0 %v8247_v41  ;;  %6193 = vmatprep.mubr.bf16.mxu1 %v8247_v41  ;;  %v7767_v32 = vcombine.high %v722_v26, %v730_v27  ;;  %v753_v41 = vld [vmem:[#allocation5 + $0x1590] sm:$0xff] }
 0x1a0   :  { %5992 = vmatpush1.bf16.msra.mxu0 %v7636_v35  ;;  %6164 = vmatpush1.bf16.msra.mxu1 %v7638_v36  ;;  %v738_v35 = vld [vmem:[#allocation5 + $0x1518] sm:$0xff] }
 0x1a1   :  { %5993 = vmatprep.subr.bf16.mxu0 %v7653_v37  ;;  %6165 = vmatprep.subr.bf16.mxu1 %v7655_v38  ;;  %v746_v36 = vld [vmem:[#allocation5 + $0x1558] sm:$0xff]  ;;  %v7764_v37 = vcombine.low %v721_v24, %v729_v25  ;;  %v7766_v38 = vcombine.low %v722_v26, %v730_v27  ;;  %v849_v25 = vld [vmem:[#allocation5 + $0x1890] sm:$0xff] }
 0x1a2   :  { %v7783_v40 = vcombine.high %v738_v35, %v746_v36  ;;  %v857_v26 = vld [vmem:[#allocation5 + $0x18d0] sm:$0xff]  ;;  %v850_v27 = vld [vmem:[#allocation5 + $0x1898] sm:$0xff] }
 0x1a4   :  { %5994 = vmatpush1.bf16.msra.mxu0 %v7652_v44  ;;  %6166 = vmatpush1.bf16.msra.mxu1 %v7654_v45  ;;  %v762_v44 = vld [vmem:[#allocation5 + $0x15d8] sm:$0xff]  ;;  %v7780_v45 = vcombine.low %v737_v33, %v745_v34  ;;  %v865_v34 = vld [vmem:[#allocation5 + $0x1910] sm:$0xff] }
 0x1a5   :  { %5995 = vmatprep.subr.bf16.mxu0 %v7669_v46  ;;  %6167 = vmatprep.subr.bf16.mxu1 %v7671_v47  ;;  %v7782_v46 = vcombine.low %v738_v35, %v746_v36  ;;  %v7797_v47 = vcombine.high %v753_v41, %v761_v42  ;;  %v7799_v48 = vcombine.high %v754_v43, %v762_v44  ;;  %v873_v35 = vld [vmem:[#allocation5 + $0x1950] sm:$0xff] }
 0x1a6   :  { %v8248_v36 = vld [vmem:[#allocation2 + $0x10] ss:$28 sps:$4 sm:$0xff]  }
 0x1a8   :  { %5996 = vmatpush1.bf16.msra.mxu0 %v7668_v52  ;;  %6168 = vmatpush1.bf16.msra.mxu1 %v7670_v53  ;;  %v778_v52 = vld [vmem:[#allocation5 + $0x1658] sm:$0xff]  ;;  %v7796_v53 = vcombine.low %v753_v41, %v761_v42  ;;  %v7909_v41 = vcombine.high %v865_v34, %v873_v35 }
 0x1a9   :  { %5997 = vmatprep.subr.bf16.mxu0 %v7685_v54  ;;  %6169 = vmatprep.subr.bf16.mxu1 %v7687_v55  ;;  %v7798_v54 = vcombine.low %v754_v43, %v762_v44  ;;  %v7813_v55 = vcombine.high %v769_v49, %v777_v50  ;;  %v7815_v56 = vcombine.high %v770_v51, %v778_v52  ;;  %v881_v43 = vld [vmem:[#allocation5 + $0x1990] sm:$0xff] }
 0x1aa   :  { %v889_v44 = vld [vmem:[#allocation5 + $0x19d0] sm:$0xff] }
 0x1ac   :  { %5998 = vmatpush1.bf16.msra.mxu0 %v7684_v60  ;;  %6170 = vmatpush1.bf16.msra.mxu1 %v7686_v61  ;;  %v794_v60 = vld [vmem:[#allocation5 + $0x16d8] sm:$0xff]  ;;  %v7812_v61 = vcombine.low %v769_v49, %v777_v50  ;;  %v7925_v50 = vcombine.high %v881_v43, %v889_v44 }
 0x1ad   :  { %5999 = vmatprep.subr.bf16.mxu0 %v7701_v62  ;;  %6171 = vmatprep.subr.bf16.mxu1 %v7703_v63  ;;  %v7814_v62 = vcombine.low %v770_v51, %v778_v52  ;;  %v7829_v63 = vcombine.high %v785_v57, %v793_v58  ;;  %v7831_v0 = vcombine.high %v786_v59, %v794_v60  ;;  %v897_v52 = vld [vmem:[#allocation5 + $0x1a10] sm:$0xff] }
 0x1b0   :  { %6000 = vmatpush1.bf16.msra.mxu0 %v7700_v4  ;;  %6172 = vmatpush1.bf16.msra.mxu1 %v7702_v5  ;;  %v810_v4 = vld [vmem:[#allocation5 + $0x1758] sm:$0xff]  ;;  %v7828_v5 = vcombine.low %v785_v57, %v793_v58  ;;  %v7924_v57 = vcombine.low %v881_v43, %v889_v44 }
 0x1b1   :  { %6001 = vmatprep.subr.bf16.mxu0 %v7717_v6  ;;  %6173 = vmatprep.subr.bf16.mxu1 %v7719_v7  ;;  %v7830_v6 = vcombine.low %v786_v59, %v794_v60  ;;  %v7845_v7 = vcombine.high %v801_v1, %v809_v2  ;;  %v7847_v8 = vcombine.high %v802_v3, %v810_v4 }
 0x1b4   :  { %6002 = vmatpush1.bf16.msra.mxu0 %v7716_v12  ;;  %6174 = vmatpush1.bf16.msra.mxu1 %v7718_v13  ;;  %v826_v12 = vld [vmem:[#allocation5 + $0x17d8] sm:$0xff]  ;;  %v7844_v13 = vcombine.low %v801_v1, %v809_v2 }
 0x1b5   :  { %6003 = vmatprep.subr.bf16.mxu0 %v7733_v14  ;;  %6175 = vmatprep.subr.bf16.mxu1 %v7735_v15  ;;  %v7846_v14 = vcombine.low %v802_v3, %v810_v4  ;;  %v7861_v15 = vcombine.high %v817_v9, %v825_v10  ;;  %v7863_v16 = vcombine.high %v818_v11, %v826_v12  ;;  %v922_v1 = vld [vmem:[#allocation5 + $0x1ad8] sm:$0xff]  ;;  %v959_v3 = vld [vmem:[#allocation7] sm:$0xff] }
 0x1b8   :  { %6004 = vmatpush1.bf16.msra.mxu0 %v7732_v20  ;;  %6176 = vmatpush1.bf16.msra.mxu1 %v7734_v21  ;;  %v842_v20 = vld [vmem:[#allocation5 + $0x1858] sm:$0xff]  ;;  %v7860_v21 = vcombine.low %v817_v9, %v825_v10  ;;  %v929_v10 = vld [vmem:[#allocation5 + $0x1b10] sm:$0xff] }
 0x1b9   :  { %6005 = vmatprep.subr.bf16.mxu0 %v7749_v22  ;;  %6177 = vmatprep.subr.bf16.mxu1 %v7751_v23  ;;  %v7862_v22 = vcombine.low %v818_v11, %v826_v12  ;;  %v7877_v23 = vcombine.high %v833_v17, %v841_v18  ;;  %v7879_v24 = vcombine.high %v834_v19, %v842_v20  ;;  %v937_v11 = vld [vmem:[#allocation5 + $0x1b50] sm:$0xff] }
 0x1bc   :  { %6006 = vmatpush1.bf16.msra.mxu0 %v7748_v28  ;;  %6178 = vmatpush1.bf16.msra.mxu1 %v7750_v29  ;;  %v858_v28 = vld [vmem:[#allocation5 + $0x18d8] sm:$0xff]  ;;  %v7876_v29 = vcombine.low %v833_v17, %v841_v18 }
 0x1bd   :  { %6007 = vmatprep.subr.bf16.mxu0 %v7765_v31  ;;  %6179 = vmatprep.subr.bf16.mxu1 %v7767_v32  ;;  %v7878_v31 = vcombine.low %v834_v19, %v842_v20  ;;  %v7893_v32 = vcombine.high %v849_v25, %v857_v26  ;;  %v7895_v33 = vcombine.high %v850_v27, %v858_v28 }
 0x1be   :  { %v7973_v20 = vcombine.high %v929_v10, %v937_v11 }
 0x1c0   :  { %6008 = vmatpush1.bf16.msra.mxu0 %v7764_v37  ;;  %6180 = vmatpush1.bf16.msra.mxu1 %v7766_v38  ;;  %v866_v37 = vld [vmem:[#allocation5 + $0x1918] sm:$0xff] }
 0x1c1   :  { %6009 = vmatprep.subr.bf16.mxu0 %v7781_v39  ;;  %6181 = vmatprep.subr.bf16.mxu1 %v7783_v40  ;;  %v874_v38 = vld [vmem:[#allocation5 + $0x1958] sm:$0xff]  ;;  %v7892_v39 = vcombine.low %v849_v25, %v857_v26  ;;  %v7894_v40 = vcombine.low %v850_v27, %v858_v28 }
 0x1c2   :  { %v7911_v42 = vcombine.high %v866_v37, %v874_v38  ;;  %v7910_v49 = vcombine.low %v866_v37, %v874_v38  ;;  %v946_v28 = vld [vmem:[#allocation5 + $0x1b98] sm:$0xff] }
 0x1c4   :  { %6010 = vmatpush1.bf16.msra.mxu0 %v7780_v45  ;;  %6182 = vmatpush1.bf16.msra.mxu1 %v7782_v46  ;;  %v882_v45 = vld [vmem:[#allocation5 + $0x1998] sm:$0xff] }
 0x1c5   :  { %6011 = vmatprep.subr.bf16.mxu0 %v7797_v47  ;;  %6183 = vmatprep.subr.bf16.mxu1 %v7799_v48  ;;  %v890_v46 = vld [vmem:[#allocation5 + $0x19d8] sm:$0xff]  ;;  %v963_v47 = vlaneseq  ;;  %v7908_v48 = vcombine.low %v865_v34, %v873_v35  ;;  %v7972_v35 = vcombine.low %v929_v10, %v937_v11 }
 0x1c6   :  { %v7927_v51 = vcombine.high %v882_v45, %v890_v46  ;;  %v7926_v58 = vcombine.low %v882_v45, %v890_v46  ;;  %v67_v45 = vld [vmem:[#allocation5 + $0x20] sm:$0xff] }
 0x1c7   :  { %v75_v46 = vld [vmem:[#allocation5 + $0x60] sm:$0xff] }
 0x1c8   :  { %6012 = vmatpush1.bf16.msra.mxu0 %v7796_v53  ;;  %6184 = vmatpush1.bf16.msra.mxu1 %v7798_v54  ;;  %v905_v53 = vld [vmem:[#allocation5 + $0x1a50] sm:$0xff]  ;;  %v898_v54 = vld [vmem:[#allocation5 + $0x1a18] sm:$0xff] }
 0x1c9   :  { %6013 = vmatprep.subr.bf16.mxu0 %v7813_v55  ;;  %6185 = vmatprep.subr.bf16.mxu1 %v7815_v56  ;;  %v906_v55 = vld [vmem:[#allocation5 + $0x1a58] sm:$0xff]  ;;  %v8431_v56 = vshrl.u32 %v963_v47, 7  ;;  %v7941_v59 = vcombine.high %v897_v52, %v905_v53  ;;  %v7940_v2 = vcombine.low %v897_v52, %v905_v53  ;;  %v7113_v53 = vcombine.high %v67_v45, %v75_v46 }
 0x1ca   :  { %v7943_v60 = vcombine.high %v898_v54, %v906_v55 }
 0x1cb   :  { %v973_v4 = vsub.s32 2, %v8431_v56 }
 0x1cc   :  { %6014 = vmatpush1.bf16.msra.mxu0 %v7812_v61  ;;  %6186 = vmatpush1.bf16.msra.mxu1 %v7814_v62  ;;  %v913_v61 = vld [vmem:[#allocation5 + $0x1a90] sm:$0xff] }
 0x1cd   :  { %6015 = vmatprep.subr.bf16.mxu0 %v7829_v63  ;;  %6187 = vmatprep.subr.bf16.mxu1 %v7831_v0  ;;  %v921_v62 = vld [vmem:[#allocation5 + $0x1ad0] sm:$0xff]  ;;  %v965_v63 = vsub.s32 0, %v8431_v56  ;;  %v914_v0 = vld [vmem:[#allocation5 + $0x1a98] sm:$0xff] }
 0x1ce   :  { %v7959_v9 = vcombine.high %v914_v0, %v922_v1  ;;  %v7956_v17 = vcombine.low %v913_v61, %v921_v62  ;;  %v7958_v19 = vcombine.low %v914_v0, %v922_v1  ;;  %v99_v1 = vld [vmem:[#allocation5 + $0x120] sm:$0xff] }
 0x1cf   :  { %v966_v12 = vrot.slane %v959_v3, %v965_v63 }
 0x1d0   :  { %6016 = vmatpush1.bf16.msra.mxu0 %v7828_v5  ;;  %6188 = vmatpush1.bf16.msra.mxu1 %v7830_v6  ;;  %v969_v5 = vsub.s32 1, %v8431_v56  ;;  %v7942_v6 = vcombine.low %v898_v54, %v906_v55  ;;  %v83_v55 = vld [vmem:[#allocation5 + $0xa0] sm:$0xff] }
 0x1d1   :  { %6017 = vmatprep.subr.bf16.mxu0 %v7845_v7  ;;  %6189 = vmatprep.subr.bf16.mxu1 %v7847_v8  ;;  %v977_v7 = vsub.s32 3, %v8431_v56  ;;  %v7957_v8 = vcombine.high %v913_v61, %v921_v62 }
 0x1d3   :  { %v978_v18 = vrot.slane %v959_v3, %v977_v7 }
 0x1d4   :  { %6018 = vmatpush1.bf16.msra.mxu0 %v7844_v13  ;;  %6190 = vmatpush1.bf16.msra.mxu1 %v7846_v14  ;;  %v930_v13 = vld [vmem:[#allocation5 + $0x1b18] sm:$0xff] }
 0x1d5   :  { %6019 = vmatprep.subr.bf16.mxu0 %v7861_v15  ;;  %6191 = vmatprep.subr.bf16.mxu1 %v7863_v16  ;;  %v938_v14 = vld [vmem:[#allocation5 + $0x1b58] sm:$0xff]  ;;  %v974_v15 = vrot.slane %v959_v3, %v973_v4  ;;  %v970_v16 = vrot.slane %v959_v3, %v969_v5 }
 0x1d8   :  { %6020 = vmatpush1.bf16.msra.mxu0 %v7860_v21  ;;  %6192 = vmatpush1.bf16.msra.mxu1 %v7862_v22  ;;  %v7975_v22 = vcombine.high %v930_v13, %v938_v14 }
 0x1d9   :  { %6032 = vmatprep.subr.bf16.mxu0 %v7877_v23  ;;  %6204 = vmatprep.subr.bf16.mxu1 %v7879_v24  ;;  %v945_v23 = vld [vmem:[#allocation5 + $0x1b90] sm:$0xff] }
 0x1da   :  { %v953_v24 = vld [vmem:[#allocation5 + $0x1bd0] sm:$0xff] }
 0x1db   :  { %6022 = vmatmul.mubr.bf16.vlgmr.msra.gmra.mrb[4].mxu0 %v8248_v36  ;;  %6194 = vmatmul.mubr.bf16.vlgmr.msra.gmra.mrb[4].mxu1 %v8248_v36  ;;  %v7974_v36 = vcombine.low %v930_v13, %v938_v14 }
 0x1dc   :  { %6033 = vmatpush1.bf16.msra.mxu0 %v7876_v29  ;;  %6205 = vmatpush1.bf16.msra.mxu1 %v7878_v31  ;;  %v954_v29 = vld [vmem:[#allocation5 + $0x1bd8] sm:$0xff] }
 0x1dd   :  { %6034 = vmatprep.subr.bf16.mxu0 %v7893_v32  ;;  %6206 = vmatprep.subr.bf16.mxu1 %v7895_v33  ;;  %v7991_v44 = vcombine.high %v946_v28, %v954_v29  ;;  %v7990_v52 = vcombine.low %v946_v28, %v954_v29 }
 0x1de   :  { %6064 = vmatprep.mubr.bf16.mxu0 %v8366_v30  ;;  %6236 = vmatprep.mubr.bf16.mxu1 %v8366_v30 }
 0x1e0   :  { %6035 = vmatpush1.bf16.msra.mxu0 %v7892_v39  ;;  %6207 = vmatpush1.bf16.msra.mxu1 %v7894_v40 }
 0x1e1   :  { %6036 = vmatprep.subr.bf16.mxu0 %v7909_v41  ;;  %6208 = vmatprep.subr.bf16.mxu1 %v7911_v42  ;;  %v7989_v41 = vcombine.high %v945_v23, %v953_v24 }
 0x1e4   :  { %6037 = vmatpush1.bf16.msra.mxu0 %v7908_v48  ;;  %6209 = vmatpush1.bf16.msra.mxu1 %v7910_v49  ;;  %v68_v48 = vld [vmem:[#allocation5 + $0x28] sm:$0xff] }
 0x1e5   :  { %6038 = vmatprep.subr.bf16.mxu0 %v7925_v50  ;;  %6210 = vmatprep.subr.bf16.mxu1 %v7927_v51  ;;  %v76_v49 = vld [vmem:[#allocation5 + $0x68] sm:$0xff]  ;;  %v7988_v51 = vcombine.low %v945_v23, %v953_v24 }
 0x1e6   :  { %v7115_v54 = vcombine.high %v68_v48, %v76_v49  ;;  %v7114_v61 = vcombine.low %v68_v48, %v76_v49  ;;  %v116_v23 = vld [vmem:[#allocation5 + $0x1a8] sm:$0xff] }
 0x1e7   :  { %v124_v24 = vld [vmem:[#allocation5 + $0x1e8] sm:$0xff] }
 0x1e8   :  { %6039 = vmatpush1.bf16.msra.mxu0 %v7924_v57  ;;  %6211 = vmatpush1.bf16.msra.mxu1 %v7926_v58  ;;  %v91_v57 = vld [vmem:[#allocation5 + $0xe0] sm:$0xff]  ;;  %v84_v58 = vld [vmem:[#allocation5 + $0xa8] sm:$0xff] }
 0x1e9   :  { %6040 = vmatprep.subr.bf16.mxu0 %v7941_v59  ;;  %6212 = vmatprep.subr.bf16.mxu1 %v7943_v60  ;;  %v92_v59 = vld [vmem:[#allocation5 + $0xe8] sm:$0xff]  ;;  %v7112_v60 = vcombine.low %v67_v45, %v75_v46  ;;  %v7129_v62 = vcombine.high %v83_v55, %v91_v57  ;;  %v7128_v11 = vcombine.low %v83_v55, %v91_v57 }
 0x1ea   :  { %v7131_v0 = vcombine.high %v84_v58, %v92_v59  ;;  %v7130_v13 = vcombine.low %v84_v58, %v92_v59  ;;  %v148_v45 = vld [vmem:[#allocation5 + $0x2a8] sm:$0xff] }
 0x1eb   :  { %v156_v46 = vld [vmem:[#allocation5 + $0x2e8] sm:$0xff] }
 0x1ec   :  { %6041 = vmatpush1.bf16.msra.mxu0 %v7940_v2  ;;  %6213 = vmatpush1.bf16.msra.mxu1 %v7942_v6  ;;  %v107_v2 = vld [vmem:[#allocation5 + $0x160] sm:$0xff]  ;;  %v7194_v57 = vcombine.low %v148_v45, %v156_v46 }
 0x1ed   :  { %6042 = vmatprep.subr.bf16.mxu0 %v7957_v8  ;;  %6214 = vmatprep.subr.bf16.mxu1 %v7959_v9  ;;  %v8249_v6 = vld [vmem:[#allocation2 + $0x18] ss:$28 sps:$4 sm:$0xff]   ;;  %v100_v8 = vld [vmem:[#allocation5 + $0x128] sm:$0xff]  ;;  %v7145_v14 = vcombine.high %v99_v1, %v107_v2 }
 0x1ee   :  { %v5722_v21 = vpop.f32.mrb[0].mxu0  ;;  %v5894_v26 = vpop.f32.mrb[0].mxu1  ;;  %v108_v9 = vld [vmem:[#allocation5 + $0x168] sm:$0xff] }
 0x1ef   :  { %v8032_v25 = vadd.f32 %v5722_v21, %v966_v12  ;;  %v5724_v27 = vpop.f32.mrb[1].mxu0  ;;  %v8036_v31 = vadd.f32 %v5894_v26, %v974_v15  ;;  %v5896_v33 = vpop.f32.mrb[1].mxu1  ;;  %v7144_v26 = vcombine.low %v99_v1, %v107_v2  ;;  %v7146_v28 = vcombine.low %v100_v8, %v108_v9 }
 0x1f0   :  { %v8033_v32 = vadd.f32 %v5724_v27, %v970_v16  ;;  %v5726_v34 = vpop.f32.mrb[2].mxu0  ;;  %6043 = vmatpush1.bf16.msra.mxu0 %v7956_v17  ;;  %v8037_v37 = vadd.f32 %v5896_v33, %v978_v18  ;;  %v5898_v39 = vpop.f32.mrb[2].mxu1  ;;  %6215 = vmatpush1.bf16.msra.mxu1 %v7958_v19  ;;  %v7147_v17 = vcombine.high %v100_v8, %v108_v9  ;;  %v123_v19 = vld [vmem:[#allocation5 + $0x1e0] sm:$0xff] }
 0x1f1   :  { %8179 = vtanh.f32 %v8032_v25  ;;  %v8034_v38 = vadd.f32 %v5726_v34, %v966_v12  ;;  %v5728_v40 = vpop.f32.mrb[3].mxu0  ;;  %6044 = vmatprep.subr.bf16.mxu0 %v7973_v20  ;;  %v8038_v42 = vadd.f32 %v5898_v39, %v974_v15  ;;  %v5900_v43 = vpop.f32.mrb[3].mxu1  ;;  %6216 = vmatprep.subr.bf16.mxu1 %v7975_v22  ;;  %v8250_v20 = vld [vmem:[#allocation2 + $0x4] ss:$28 sps:$4 sm:$0xff]   ;;  %v7163_v33 = vcombine.high %v116_v23, %v124_v24  ;;  %v131_v34 = vld [vmem:[#allocation5 + $0x220] sm:$0xff] }
 0x1f2   :  { %8181 = vtanh.f32 %v8036_v31  ;;  %v8035_v47 = vadd.f32 %v5728_v40, %v970_v16  ;;  %v8039_v50 = vadd.f32 %v5900_v43, %v978_v18  ;;  %v115_v18 = vld [vmem:[#allocation5 + $0x1a0] sm:$0xff]  ;;  %v7162_v40 = vcombine.low %v116_v23, %v124_v24 }
 0x1f3   :  { %8183 = vtanh.f32 %v8033_v32  ;;  %v7161_v29 = vcombine.high %v115_v18, %v123_v19  ;;  %v7160_v39 = vcombine.low %v115_v18, %v123_v19  ;;  %v147_v43 = vld [vmem:[#allocation5 + $0x2a0] sm:$0xff]  ;;  %v212_v18 = vld [vmem:[#allocation5 + $0x4a8] sm:$0xff] }
 0x1f4   :  { %8185 = vtanh.f32 %v8037_v37  ;;  %6045 = vmatpush1.bf16.msra.mxu0 %v7972_v35  ;;  %6217 = vmatpush1.bf16.msra.mxu1 %v7974_v36  ;;  %v139_v35 = vld [vmem:[#allocation5 + $0x260] sm:$0xff]  ;;  %v132_v37 = vld [vmem:[#allocation5 + $0x228] sm:$0xff] }
 0x1f5   :  { %8187 = vtanh.f32 %v8034_v38  ;;  %6046 = vmatprep.subr.bf16.mxu0 %v7989_v41  ;;  %6218 = vmatprep.subr.bf16.mxu1 %v7991_v44  ;;  %v140_v38 = vld [vmem:[#allocation5 + $0x268] sm:$0xff]  ;;  %v7177_v41 = vcombine.high %v131_v34, %v139_v35  ;;  %v155_v44 = vld [vmem:[#allocation5 + $0x2e0] sm:$0xff] }
 0x1f6   :  { %8189 = vtanh.f32 %v8038_v42  ;;  %v7179_v42 = vcombine.high %v132_v37, %v140_v38  ;;  %v7178_v48 = vcombine.low %v132_v37, %v140_v38  ;;  %v7193_v49 = vcombine.high %v147_v43, %v155_v44  ;;  %v195_v8 = vld [vmem:[#allocation5 + $0x420] sm:$0xff]  ;;  %v220_v19 = vld [vmem:[#allocation5 + $0x4e8] sm:$0xff] }
 0x1f7   :  { %8191 = vtanh.f32 %v8035_v47  ;;  %v7176_v47 = vcombine.low %v131_v34, %v139_v35  ;;  %v7192_v55 = vcombine.low %v147_v43, %v155_v44  ;;  %v203_v9 = vld [vmem:[#allocation5 + $0x460] sm:$0xff]  ;;  %v7259_v23 = vcombine.high %v212_v18, %v220_v19  ;;  %v244_v35 = vld [vmem:[#allocation5 + $0x5a8] sm:$0xff] }
 0x1f8   :  { %8193 = vtanh.f32 %v8039_v50  ;;  %6047 = vmatpush1.bf16.msra.mxu0 %v7988_v51  ;;  %6219 = vmatpush1.bf16.msra.mxu1 %v7990_v52  ;;  %v7195_v50 = vcombine.high %v148_v45, %v156_v46  ;;  %v163_v51 = vld [vmem:[#allocation5 + $0x320] sm:$0xff]  ;;  %v260_v43 = vld [vmem:[#allocation5 + $0x628] sm:$0xff] }
 0x1f9   :  { %6247 = vmatprep.subr.bf16.mxu0 %v7113_v53  ;;  %6419 = vmatprep.subr.bf16.mxu1 %v7115_v54  ;;  %v171_v52 = vld [vmem:[#allocation5 + $0x360] sm:$0xff]  ;;  %v164_v53 = vld [vmem:[#allocation5 + $0x328] sm:$0xff] }
 0x1fa   :  { %v172_v54 = vld [vmem:[#allocation5 + $0x368] sm:$0xff]  ;;  %v7209_v58 = vcombine.high %v163_v51, %v171_v52  ;;  %v7208_v1 = vcombine.low %v163_v51, %v171_v52  ;;  %v227_v24 = vld [vmem:[#allocation5 + $0x520] sm:$0xff] }
 0x1fb   :  { %v8180_v3 = vpop.eup %8179  ;;  %6065 = vmatmul.mubr.bf16.vlgmr.msra.gmra.mrb[4].mxu0 %v8249_v6  ;;  %6237 = vmatmul.mubr.bf16.vlgmr.msra.gmra.mrb[4].mxu1 %v8249_v6  ;;  %v7211_v59 = vcombine.high %v164_v53, %v172_v54  ;;  %v7210_v2 = vcombine.low %v164_v53, %v172_v54  ;;  %v251_v34 = vld [vmem:[#allocation5 + $0x5e0] sm:$0xff]  ;;  %v268_v44 = vld [vmem:[#allocation5 + $0x668] sm:$0xff] }
 0x1fc   :  { %v8182_v10 = vpop.eup %8181  ;;  %6248 = vmatpush1.bf16.msra.mxu0 %v7112_v60  ;;  %6420 = vmatpush1.bf16.msra.mxu1 %v7114_v61  ;;  %v179_v60 = vld [vmem:[#allocation5 + $0x3a0] sm:$0xff]  ;;  %v276_v51 = vld [vmem:[#allocation5 + $0x6a8] sm:$0xff]  ;;  %v7306_v54 = vcombine.low %v260_v43, %v268_v44 }
 0x1fd   :  { %v8184_v12 = vpop.eup %8183  ;;  %6249 = vmatprep.subr.bf16.mxu0 %v7129_v62  ;;  %6421 = vmatprep.subr.bf16.mxu1 %v7131_v0  ;;  %v187_v61 = vld [vmem:[#allocation5 + $0x3e0] sm:$0xff]  ;;  %v180_v62 = vld [vmem:[#allocation5 + $0x3a8] sm:$0xff] }
 0x1fe   :  { %v8186_v15 = vpop.eup %8185  ;;  %v8016_v16 = vpack.c.bf16 %v8184_v12, %v8180_v3  ;;  %6279 = vmatprep.mubr.bf16.mxu0 %v8250_v20  ;;  %6451 = vmatprep.mubr.bf16.mxu1 %v8250_v20  ;;  %v188_v0 = vld [vmem:[#allocation5 + $0x3e8] sm:$0xff]  ;;  %v7225_v3 = vcombine.high %v179_v60, %v187_v61  ;;  %v7224_v12 = vcombine.low %v179_v60, %v187_v61 }
 0x1ff   :  { %v8188_v21 = vpop.eup %8187  ;;  %v8017_v22 = vpack.c.bf16 %v8186_v15, %v8182_v10  ;;  %v7227_v6 = vcombine.high %v180_v62, %v188_v0  ;;  %v196_v10 = vld [vmem:[#allocation5 + $0x428] sm:$0xff]  ;;  %v7240_v20 = vcombine.low %v195_v8, %v203_v9 }
 0x200   :  { %v8190_v25 = vpop.eup %8189  ;;  %7063 = vst [vmem:[#allocation8] sm:$0xff] %v8016_v16  ;;  %6250 = vmatpush1.bf16.msra.mxu0 %v7128_v11  ;;  %6422 = vmatpush1.bf16.msra.mxu1 %v7130_v13  ;;  %v204_v11 = vld [vmem:[#allocation5 + $0x468] sm:$0xff]  ;;  %v7226_v13 = vcombine.low %v180_v62, %v188_v0  ;;  %v211_v16 = vld [vmem:[#allocation5 + $0x4a0] sm:$0xff] }
 0x201   :  { %v8192_v27 = vpop.eup %8191  ;;  %7064 = vst [vmem:[#allocation8 + $0x8] sm:$0xff] %v8017_v22  ;;  %6251 = vmatprep.subr.bf16.mxu0 %v7145_v14  ;;  %6423 = vmatprep.subr.bf16.mxu1 %v7147_v17  ;;  %v7241_v14 = vcombine.high %v195_v8, %v203_v9  ;;  %v7243_v15 = vcombine.high %v196_v10, %v204_v11  ;;  %v219_v17 = vld [vmem:[#allocation5 + $0x4e0] sm:$0xff]  ;;  %v284_v52 = vld [vmem:[#allocation5 + $0x6e8] sm:$0xff] }
 0x202   :  { %v8194_v31 = vpop.eup %8193  ;;  %v8024_v32 = vpack.c.bf16 %v8192_v27, %v8188_v21  ;;  %v7242_v21 = vcombine.low %v196_v10, %v204_v11  ;;  %v7257_v22 = vcombine.high %v211_v16, %v219_v17  ;;  %v236_v27 = vld [vmem:[#allocation5 + $0x568] sm:$0xff]  ;;  %v7322_v0 = vcombine.low %v276_v51, %v284_v52 }
 0x203   :  { %v8025_v36 = vpack.c.bf16 %v8194_v31, %v8190_v25  ;;  %v235_v25 = vld [vmem:[#allocation5 + $0x560] sm:$0xff]  ;;  %v292_v60 = vld [vmem:[#allocation5 + $0x728] sm:$0xff] }
 0x204   :  { %7071 = vst [vmem:[#allocation8 + $0x40] sm:$0xff] %v8024_v32  ;;  %6252 = vmatpush1.bf16.msra.mxu0 %v7144_v26  ;;  %6424 = vmatpush1.bf16.msra.mxu1 %v7146_v28  ;;  %v228_v26 = vld [vmem:[#allocation5 + $0x528] sm:$0xff]  ;;  %v7256_v28 = vcombine.low %v211_v16, %v219_v17  ;;  %v7273_v31 = vcombine.high %v227_v24, %v235_v25 }
 0x205   :  { %7072 = vst [vmem:[#allocation8 + $0x48] sm:$0xff] %v8025_v36  ;;  %6253 = vmatprep.subr.bf16.mxu0 %v7161_v29  ;;  %6425 = vmatprep.subr.bf16.mxu1 %v7163_v33  ;;  %v7258_v29 = vcombine.low %v212_v18, %v220_v19  ;;  %v7275_v32 = vcombine.high %v228_v26, %v236_v27  ;;  %v243_v33 = vld [vmem:[#allocation5 + $0x5a0] sm:$0xff]  ;;  %v252_v36 = vld [vmem:[#allocation5 + $0x5e8] sm:$0xff] }
 0x206   :  { %v7272_v37 = vcombine.low %v227_v24, %v235_v25  ;;  %v7274_v38 = vcombine.low %v228_v26, %v236_v27  ;;  %v7288_v45 = vcombine.low %v243_v33, %v251_v34  ;;  %v7290_v46 = vcombine.low %v244_v35, %v252_v36  ;;  %v300_v61 = vld [vmem:[#allocation5 + $0x768] sm:$0xff] }
 0x207   :  { %v308_v8 = vld [vmem:[#allocation5 + $0x7a8] sm:$0xff]  ;;  %v7338_v11 = vcombine.low %v292_v60, %v300_v61 }
 0x208   :  { %6254 = vmatpush1.bf16.msra.mxu0 %v7160_v39  ;;  %6426 = vmatpush1.bf16.msra.mxu1 %v7162_v40  ;;  %v7289_v39 = vcombine.high %v243_v33, %v251_v34  ;;  %v7291_v40 = vcombine.high %v244_v35, %v252_v36  ;;  %v316_v9 = vld [vmem:[#allocation5 + $0x7e8] sm:$0xff] }
 0x209   :  { %6255 = vmatprep.subr.bf16.mxu0 %v7177_v41  ;;  %6427 = vmatprep.subr.bf16.mxu1 %v7179_v42  ;;  %v259_v41 = vld [vmem:[#allocation5 + $0x620] sm:$0xff]  ;;  %v324_v16 = vld [vmem:[#allocation5 + $0x828] sm:$0xff]  ;;  %v7354_v19 = vcombine.low %v308_v8, %v316_v9 }
 0x20a   :  { %v267_v42 = vld [vmem:[#allocation5 + $0x660] sm:$0xff]  ;;  %v332_v17 = vld [vmem:[#allocation5 + $0x868] sm:$0xff] }
 0x20b   :  { %v7304_v53 = vcombine.low %v259_v41, %v267_v42  ;;  %v340_v24 = vld [vmem:[#allocation5 + $0x8a8] sm:$0xff]  ;;  %v7370_v27 = vcombine.low %v324_v16, %v332_v17 }
 0x20c   :  { %6256 = vmatpush1.bf16.msra.mxu0 %v7176_v47  ;;  %6428 = vmatpush1.bf16.msra.mxu1 %v7178_v48  ;;  %v7305_v47 = vcombine.high %v259_v41, %v267_v42  ;;  %v7307_v48 = vcombine.high %v260_v43, %v268_v44  ;;  %v348_v25 = vld [vmem:[#allocation5 + $0x8e8] sm:$0xff]  ;;  %v379_v41 = vld [vmem:[#allocation5 + $0x9e0] sm:$0xff]  ;;  %v8252_v42 = vld [vmem:[#allocation2 + $0xc] ss:$28 sps:$4 sm:$0xff]  }
 0x20d   :  { %6257 = vmatprep.subr.bf16.mxu0 %v7193_v49  ;;  %6429 = vmatprep.subr.bf16.mxu1 %v7195_v50  ;;  %v275_v49 = vld [vmem:[#allocation5 + $0x6a0] sm:$0xff]  ;;  %v356_v34 = vld [vmem:[#allocation5 + $0x928] sm:$0xff] }
 0x20e   :  { %v283_v50 = vld [vmem:[#allocation5 + $0x6e0] sm:$0xff]  ;;  %v364_v35 = vld [vmem:[#allocation5 + $0x968] sm:$0xff] }
 0x20f   :  { %v7320_v62 = vcombine.low %v275_v49, %v283_v50  ;;  %v8251_v33 = vld [vmem:[#allocation2] ss:$28 sps:$4 sm:$0xff]  }
 0x210   :  { %6258 = vmatpush1.bf16.msra.mxu0 %v7192_v55  ;;  %6430 = vmatpush1.bf16.msra.mxu1 %v7194_v57  ;;  %v7321_v55 = vcombine.high %v275_v49, %v283_v50  ;;  %v7323_v57 = vcombine.high %v276_v51, %v284_v52  ;;  %v372_v43 = vld [vmem:[#allocation5 + $0x9a8] sm:$0xff]  ;;  %v387_v49 = vld [vmem:[#allocation5 + $0xa20] sm:$0xff] }
 0x211   :  { %6259 = vmatprep.subr.bf16.mxu0 %v7209_v58  ;;  %6431 = vmatprep.subr.bf16.mxu1 %v7211_v59  ;;  %v291_v58 = vld [vmem:[#allocation5 + $0x720] sm:$0xff]  ;;  %v380_v44 = vld [vmem:[#allocation5 + $0x9e8] sm:$0xff] }
 0x212   :  { %v299_v59 = vld [vmem:[#allocation5 + $0x760] sm:$0xff]  ;;  %v388_v51 = vld [vmem:[#allocation5 + $0xa28] sm:$0xff] }
 0x213   :  { %v7336_v10 = vcombine.low %v291_v58, %v299_v59  ;;  %v395_v50 = vld [vmem:[#allocation5 + $0xa60] sm:$0xff]  ;;  %v396_v52 = vld [vmem:[#allocation5 + $0xa68] sm:$0xff] }
 0x214   :  { %6260 = vmatpush1.bf16.msra.mxu0 %v7208_v1  ;;  %6432 = vmatpush1.bf16.msra.mxu1 %v7210_v2  ;;  %v7337_v1 = vcombine.high %v291_v58, %v299_v59  ;;  %v7339_v2 = vcombine.high %v292_v60, %v300_v61  ;;  %v403_v58 = vld [vmem:[#allocation5 + $0xaa0] sm:$0xff]  ;;  %v404_v60 = vld [vmem:[#allocation5 + $0xaa8] sm:$0xff] }
 0x215   :  { %6261 = vmatprep.subr.bf16.mxu0 %v7225_v3  ;;  %6433 = vmatprep.subr.bf16.mxu1 %v7227_v6  ;;  %v307_v3 = vld [vmem:[#allocation5 + $0x7a0] sm:$0xff]  ;;  %v412_v61 = vld [vmem:[#allocation5 + $0xae8] sm:$0xff] }
 0x216   :  { %v315_v6 = vld [vmem:[#allocation5 + $0x7e0] sm:$0xff] }
 0x217   :  { %v7352_v18 = vcombine.low %v307_v3, %v315_v6  ;;  %v411_v59 = vld [vmem:[#allocation5 + $0xae0] sm:$0xff] }
 0x218   :  { %6262 = vmatpush1.bf16.msra.mxu0 %v7224_v12  ;;  %6434 = vmatpush1.bf16.msra.mxu1 %v7226_v13  ;;  %v7353_v12 = vcombine.high %v307_v3, %v315_v6  ;;  %v7355_v13 = vcombine.high %v308_v8, %v316_v9  ;;  %v419_v3 = vld [vmem:[#allocation5 + $0xb20] sm:$0xff]  ;;  %v420_v8 = vld [vmem:[#allocation5 + $0xb28] sm:$0xff] }
 0x219   :  { %6263 = vmatprep.subr.bf16.mxu0 %v7241_v14  ;;  %6435 = vmatprep.subr.bf16.mxu1 %v7243_v15  ;;  %v323_v14 = vld [vmem:[#allocation5 + $0x820] sm:$0xff]  ;;  %v428_v9 = vld [vmem:[#allocation5 + $0xb68] sm:$0xff] }
 0x21a   :  { %v331_v15 = vld [vmem:[#allocation5 + $0x860] sm:$0xff] }
 0x21b   :  { %v7368_v26 = vcombine.low %v323_v14, %v331_v15  ;;  %v427_v6 = vld [vmem:[#allocation5 + $0xb60] sm:$0xff] }
 0x21c   :  { %6264 = vmatpush1.bf16.msra.mxu0 %v7240_v20  ;;  %6436 = vmatpush1.bf16.msra.mxu1 %v7242_v21  ;;  %v7369_v20 = vcombine.high %v323_v14, %v331_v15  ;;  %v7371_v21 = vcombine.high %v324_v16, %v332_v17  ;;  %v435_v14 = vld [vmem:[#allocation5 + $0xba0] sm:$0xff]  ;;  %v436_v16 = vld [vmem:[#allocation5 + $0xba8] sm:$0xff] }
 0x21d   :  { %6265 = vmatprep.subr.bf16.mxu0 %v7257_v22  ;;  %6437 = vmatprep.subr.bf16.mxu1 %v7259_v23  ;;  %v339_v22 = vld [vmem:[#allocation5 + $0x8a0] sm:$0xff]  ;;  %v444_v17 = vld [vmem:[#allocation5 + $0xbe8] sm:$0xff] }
 0x21e   :  { %v347_v23 = vld [vmem:[#allocation5 + $0x8e0] sm:$0xff] }
 0x21f   :  { %v7384_v36 = vcombine.low %v339_v22, %v347_v23  ;;  %v443_v15 = vld [vmem:[#allocation5 + $0xbe0] sm:$0xff] }
 0x220   :  { %6266 = vmatpush1.bf16.msra.mxu0 %v7256_v28  ;;  %6438 = vmatpush1.bf16.msra.mxu1 %v7258_v29  ;;  %v7385_v28 = vcombine.high %v339_v22, %v347_v23  ;;  %v7387_v29 = vcombine.high %v340_v24, %v348_v25  ;;  %v451_v22 = vld [vmem:[#allocation5 + $0xc20] sm:$0xff] }
 0x221   :  { %6267 = vmatprep.subr.bf16.mxu0 %v7273_v31  ;;  %6439 = vmatprep.subr.bf16.mxu1 %v7275_v32  ;;  %v355_v31 = vld [vmem:[#allocation5 + $0x920] sm:$0xff] }
 0x222   :  { %v363_v32 = vld [vmem:[#allocation5 + $0x960] sm:$0xff] }
 0x223   :  { %v459_v23 = vld [vmem:[#allocation5 + $0xc60] sm:$0xff] }
 0x224   :  { %6268 = vmatpush1.bf16.msra.mxu0 %v7272_v37  ;;  %6440 = vmatpush1.bf16.msra.mxu1 %v7274_v38  ;;  %v7386_v37 = vcombine.low %v340_v24, %v348_v25  ;;  %v7401_v38 = vcombine.high %v355_v31, %v363_v32  ;;  %v452_v24 = vld [vmem:[#allocation5 + $0xc28] sm:$0xff] }
 0x225   :  { %6269 = vmatprep.subr.bf16.mxu0 %v7289_v39  ;;  %6441 = vmatprep.subr.bf16.mxu1 %v7291_v40  ;;  %v7403_v39 = vcombine.high %v356_v34, %v364_v35  ;;  %v371_v40 = vld [vmem:[#allocation5 + $0x9a0] sm:$0xff]  ;;  %v460_v25 = vld [vmem:[#allocation5 + $0xc68] sm:$0xff] }
 0x228   :  { %6270 = vmatpush1.bf16.msra.mxu0 %v7288_v45  ;;  %6442 = vmatpush1.bf16.msra.mxu1 %v7290_v46  ;;  %v7400_v45 = vcombine.low %v355_v31, %v363_v32  ;;  %v7402_v46 = vcombine.low %v356_v34, %v364_v35  ;;  %v467_v31 = vld [vmem:[#allocation5 + $0xca0] sm:$0xff]  ;;  %v476_v34 = vld [vmem:[#allocation5 + $0xce8] sm:$0xff]  ;;  %v7496_v35 = vcombine.low %v451_v22, %v459_v23 }
 0x229   :  { %6271 = vmatprep.subr.bf16.mxu0 %v7305_v47  ;;  %6443 = vmatprep.subr.bf16.mxu1 %v7307_v48  ;;  %v7417_v47 = vcombine.high %v371_v40, %v379_v41  ;;  %v7419_v48 = vcombine.high %v372_v43, %v380_v44  ;;  %v475_v32 = vld [vmem:[#allocation5 + $0xce0] sm:$0xff] }
 0x22c   :  { %6272 = vmatpush1.bf16.msra.mxu0 %v7304_v53  ;;  %6444 = vmatpush1.bf16.msra.mxu1 %v7306_v54  ;;  %v7416_v53 = vcombine.low %v371_v40, %v379_v41  ;;  %v7418_v54 = vcombine.low %v372_v43, %v380_v44  ;;  %v491_v40 = vld [vmem:[#allocation5 + $0xd60] sm:$0xff]  ;;  %v484_v41 = vld [vmem:[#allocation5 + $0xd28] sm:$0xff]  ;;  %v7512_v43 = vcombine.low %v467_v31, %v475_v32 }
 0x22d   :  { %6273 = vmatprep.subr.bf16.mxu0 %v7321_v55  ;;  %6445 = vmatprep.subr.bf16.mxu1 %v7323_v57  ;;  %v7433_v55 = vcombine.high %v387_v49, %v395_v50  ;;  %v7435_v57 = vcombine.high %v388_v51, %v396_v52 }
 0x230   :  { %6274 = vmatpush1.bf16.msra.mxu0 %v7320_v62  ;;  %6446 = vmatpush1.bf16.msra.mxu1 %v7322_v0  ;;  %v7432_v62 = vcombine.low %v387_v49, %v395_v50  ;;  %v7434_v0 = vcombine.low %v388_v51, %v396_v52  ;;  %v500_v49 = vld [vmem:[#allocation5 + $0xda8] sm:$0xff] }
 0x231   :  { %6275 = vmatprep.subr.bf16.mxu0 %v7337_v1  ;;  %6447 = vmatprep.subr.bf16.mxu1 %v7339_v2  ;;  %v7449_v1 = vcombine.high %v403_v58, %v411_v59  ;;  %v7451_v2 = vcombine.high %v404_v60, %v412_v61  ;;  %v508_v50 = vld [vmem:[#allocation5 + $0xde8] sm:$0xff] }
 0x234   :  { %6276 = vmatpush1.bf16.msra.mxu0 %v7336_v10  ;;  %6448 = vmatpush1.bf16.msra.mxu1 %v7338_v11  ;;  %v7448_v10 = vcombine.low %v403_v58, %v411_v59  ;;  %v7450_v11 = vcombine.low %v404_v60, %v412_v61  ;;  %v516_v58 = vld [vmem:[#allocation5 + $0xe28] sm:$0xff]  ;;  %v7546_v61 = vcombine.low %v500_v49, %v508_v50 }
 0x235   :  { %6277 = vmatprep.subr.bf16.mxu0 %v7353_v12  ;;  %6449 = vmatprep.subr.bf16.mxu1 %v7355_v13  ;;  %v7465_v12 = vcombine.high %v419_v3, %v427_v6  ;;  %v7467_v13 = vcombine.high %v420_v8, %v428_v9  ;;  %v524_v59 = vld [vmem:[#allocation5 + $0xe68] sm:$0xff] }
 0x238   :  { %6278 = vmatpush1.bf16.msra.mxu0 %v7352_v18  ;;  %6450 = vmatpush1.bf16.msra.mxu1 %v7354_v19  ;;  %v7464_v18 = vcombine.low %v419_v3, %v427_v6  ;;  %v7466_v19 = vcombine.low %v420_v8, %v428_v9  ;;  %v532_v3 = vld [vmem:[#allocation5 + $0xea8] sm:$0xff]  ;;  %v7562_v9 = vcombine.low %v516_v58, %v524_v59 }
 0x239   :  { %6290 = vmatprep.subr.bf16.mxu0 %v7369_v20  ;;  %6462 = vmatprep.subr.bf16.mxu1 %v7371_v21  ;;  %v7481_v20 = vcombine.high %v435_v14, %v443_v15  ;;  %v7483_v21 = vcombine.high %v436_v16, %v444_v17  ;;  %v540_v6 = vld [vmem:[#allocation5 + $0xee8] sm:$0xff] }
 0x23b   :  { %6280 = vmatmul.mubr.bf16.vlgmr.msra.gmra.mrb[8].mxu0 %v8251_v33  ;;  %6452 = vmatmul.mubr.bf16.vlgmr.msra.gmra.mrb[8].mxu1 %v8251_v33  ;;  %v468_v33 = vld [vmem:[#allocation5 + $0xca8] sm:$0xff] }
 0x23c   :  { %6291 = vmatpush1.bf16.msra.mxu0 %v7368_v26  ;;  %6463 = vmatpush1.bf16.msra.mxu1 %v7370_v27  ;;  %v7480_v26 = vcombine.low %v435_v14, %v443_v15  ;;  %v7482_v27 = vcombine.low %v436_v16, %v444_v17  ;;  %v7514_v44 = vcombine.low %v468_v33, %v476_v34  ;;  %v548_v14 = vld [vmem:[#allocation5 + $0xf28] sm:$0xff] }
 0x23d   :  { %6292 = vmatprep.subr.bf16.mxu0 %v7385_v28  ;;  %6464 = vmatprep.subr.bf16.mxu1 %v7387_v29  ;;  %v7497_v28 = vcombine.high %v451_v22, %v459_v23  ;;  %v7499_v29 = vcombine.high %v452_v24, %v460_v25  ;;  %v556_v15 = vld [vmem:[#allocation5 + $0xf68] sm:$0xff]  ;;  %v7578_v17 = vcombine.low %v532_v3, %v540_v6 }
 0x23e   :  { %6322 = vmatprep.mubr.bf16.mxu0 %v8252_v42  ;;  %6494 = vmatprep.mubr.bf16.mxu1 %v8252_v42  ;;  %v492_v42 = vld [vmem:[#allocation5 + $0xd68] sm:$0xff] }
 0x23f   :  { %v7530_v52 = vcombine.low %v484_v41, %v492_v42  ;;  %v564_v22 = vld [vmem:[#allocation5 + $0xfa8] sm:$0xff] }
 0x240   :  { %6293 = vmatpush1.bf16.msra.mxu0 %v7384_v36  ;;  %6465 = vmatpush1.bf16.msra.mxu1 %v7386_v37  ;;  %v7498_v36 = vcombine.low %v452_v24, %v460_v25  ;;  %v7513_v37 = vcombine.high %v467_v31, %v475_v32  ;;  %v572_v23 = vld [vmem:[#allocation5 + $0xfe8] sm:$0xff]  ;;  %v7594_v25 = vcombine.low %v548_v14, %v556_v15 }
 0x241   :  { %6294 = vmatprep.subr.bf16.mxu0 %v7401_v38  ;;  %6466 = vmatprep.subr.bf16.mxu1 %v7403_v39  ;;  %v7515_v38 = vcombine.high %v468_v33, %v476_v34  ;;  %v483_v39 = vld [vmem:[#allocation5 + $0xd20] sm:$0xff]  ;;  %v580_v31 = vld [vmem:[#allocation5 + $0x1028] sm:$0xff]  ;;  %v7610_v34 = vcombine.low %v564_v22, %v572_v23 }
 0x242   :  { %v7528_v51 = vcombine.low %v483_v39, %v491_v40  ;;  %v588_v32 = vld [vmem:[#allocation5 + $0x1068] sm:$0xff] }
 0x244   :  { %6295 = vmatpush1.bf16.msra.mxu0 %v7400_v45  ;;  %6467 = vmatpush1.bf16.msra.mxu1 %v7402_v46  ;;  %v7529_v45 = vcombine.high %v483_v39, %v491_v40  ;;  %v7531_v46 = vcombine.high %v484_v41, %v492_v42  ;;  %v596_v39 = vld [vmem:[#allocation5 + $0x10a8] sm:$0xff]  ;;  %v7626_v42 = vcombine.low %v580_v31, %v588_v32 }
 0x245   :  { %6296 = vmatprep.subr.bf16.mxu0 %v7417_v47  ;;  %6468 = vmatprep.subr.bf16.mxu1 %v7419_v48  ;;  %v499_v47 = vld [vmem:[#allocation5 + $0xda0] sm:$0xff]  ;;  %v604_v40 = vld [vmem:[#allocation5 + $0x10e8] sm:$0xff] }
 0x246   :  { %v507_v48 = vld [vmem:[#allocation5 + $0xde0] sm:$0xff] }
 0x247   :  { %v7544_v60 = vcombine.low %v499_v47, %v507_v48 }
 0x248   :  { %6297 = vmatpush1.bf16.msra.mxu0 %v7416_v53  ;;  %6469 = vmatpush1.bf16.msra.mxu1 %v7418_v54  ;;  %v7545_v53 = vcombine.high %v499_v47, %v507_v48  ;;  %v7547_v54 = vcombine.high %v500_v49, %v508_v50  ;;  %v8253_v47 = vld [vmem:[#allocation2 + $0x8] ss:$28 sps:$4 sm:$0xff]  }
 0x249   :  { %6298 = vmatprep.subr.bf16.mxu0 %v7433_v55  ;;  %6470 = vmatprep.subr.bf16.mxu1 %v7435_v57  ;;  %v515_v55 = vld [vmem:[#allocation5 + $0xe20] sm:$0xff]  ;;  %v612_v48 = vld [vmem:[#allocation5 + $0x1128] sm:$0xff] }
 0x24a   :  { %v523_v57 = vld [vmem:[#allocation5 + $0xe60] sm:$0xff]  ;;  %v620_v49 = vld [vmem:[#allocation5 + $0x1168] sm:$0xff] }
 0x24b   :  { %v7560_v8 = vcombine.low %v515_v55, %v523_v57 }
 0x24c   :  { %6299 = vmatpush1.bf16.msra.mxu0 %v7432_v62  ;;  %6471 = vmatpush1.bf16.msra.mxu1 %v7434_v0  ;;  %v7561_v62 = vcombine.high %v515_v55, %v523_v57  ;;  %v7563_v0 = vcombine.high %v516_v58, %v524_v59  ;;  %v635_v55 = vld [vmem:[#allocation5 + $0x11e0] sm:$0xff]  ;;  %v8254_v57 = vld [vmem:[#allocation2 + $0x14] ss:$28 sps:$4 sm:$0xff]   ;;  %v628_v58 = vld [vmem:[#allocation5 + $0x11a8] sm:$0xff] }
 0x24d   :  { %6300 = vmatprep.subr.bf16.mxu0 %v7449_v1  ;;  %6472 = vmatprep.subr.bf16.mxu1 %v7451_v2  ;;  %v531_v1 = vld [vmem:[#allocation5 + $0xea0] sm:$0xff]  ;;  %v636_v59 = vld [vmem:[#allocation5 + $0x11e8] sm:$0xff] }
 0x24e   :  { %v539_v2 = vld [vmem:[#allocation5 + $0xee0] sm:$0xff] }
 0x24f   :  { %v7576_v16 = vcombine.low %v531_v1, %v539_v2 }
 0x250   :  { %6301 = vmatpush1.bf16.msra.mxu0 %v7448_v10  ;;  %6473 = vmatpush1.bf16.msra.mxu1 %v7450_v11  ;;  %v7577_v10 = vcombine.high %v531_v1, %v539_v2  ;;  %v7579_v11 = vcombine.high %v532_v3, %v540_v6  ;;  %v643_v1 = vld [vmem:[#allocation5 + $0x1220] sm:$0xff]  ;;  %v644_v3 = vld [vmem:[#allocation5 + $0x1228] sm:$0xff] }
 0x251   :  { %6302 = vmatprep.subr.bf16.mxu0 %v7465_v12  ;;  %6474 = vmatprep.subr.bf16.mxu1 %v7467_v13  ;;  %v547_v12 = vld [vmem:[#allocation5 + $0xf20] sm:$0xff]  ;;  %v652_v6 = vld [vmem:[#allocation5 + $0x1268] sm:$0xff] }
 0x252   :  { %v555_v13 = vld [vmem:[#allocation5 + $0xf60] sm:$0xff] }
 0x253   :  { %v7592_v24 = vcombine.low %v547_v12, %v555_v13  ;;  %v651_v2 = vld [vmem:[#allocation5 + $0x1260] sm:$0xff] }
 0x254   :  { %6303 = vmatpush1.bf16.msra.mxu0 %v7464_v18  ;;  %6475 = vmatpush1.bf16.msra.mxu1 %v7466_v19  ;;  %v7593_v18 = vcombine.high %v547_v12, %v555_v13  ;;  %v7595_v19 = vcombine.high %v548_v14, %v556_v15  ;;  %v659_v12 = vld [vmem:[#allocation5 + $0x12a0] sm:$0xff]  ;;  %v660_v14 = vld [vmem:[#allocation5 + $0x12a8] sm:$0xff] }
 0x255   :  { %6304 = vmatprep.subr.bf16.mxu0 %v7481_v20  ;;  %6476 = vmatprep.subr.bf16.mxu1 %v7483_v21  ;;  %v563_v20 = vld [vmem:[#allocation5 + $0xfa0] sm:$0xff]  ;;  %v668_v15 = vld [vmem:[#allocation5 + $0x12e8] sm:$0xff] }
 0x256   :  { %v571_v21 = vld [vmem:[#allocation5 + $0xfe0] sm:$0xff] }
 0x257   :  { %v7608_v33 = vcombine.low %v563_v20, %v571_v21  ;;  %v667_v13 = vld [vmem:[#allocation5 + $0x12e0] sm:$0xff] }
 0x258   :  { %6305 = vmatpush1.bf16.msra.mxu0 %v7480_v26  ;;  %6477 = vmatpush1.bf16.msra.mxu1 %v7482_v27  ;;  %v7609_v26 = vcombine.high %v563_v20, %v571_v21  ;;  %v7611_v27 = vcombine.high %v564_v22, %v572_v23  ;;  %v675_v20 = vld [vmem:[#allocation5 + $0x1320] sm:$0xff]  ;;  %v676_v22 = vld [vmem:[#allocation5 + $0x1328] sm:$0xff] }
 0x259   :  { %6306 = vmatprep.subr.bf16.mxu0 %v7497_v28  ;;  %6478 = vmatprep.subr.bf16.mxu1 %v7499_v29  ;;  %v579_v28 = vld [vmem:[#allocation5 + $0x1020] sm:$0xff]  ;;  %v684_v23 = vld [vmem:[#allocation5 + $0x1368] sm:$0xff] }
 0x25a   :  { %v587_v29 = vld [vmem:[#allocation5 + $0x1060] sm:$0xff] }
 0x25b   :  { %v7624_v41 = vcombine.low %v579_v28, %v587_v29  ;;  %v683_v21 = vld [vmem:[#allocation5 + $0x1360] sm:$0xff] }
 0x25c   :  { %6307 = vmatpush1.bf16.msra.mxu0 %v7496_v35  ;;  %6479 = vmatpush1.bf16.msra.mxu1 %v7498_v36  ;;  %v7625_v35 = vcombine.high %v579_v28, %v587_v29  ;;  %v7627_v36 = vcombine.high %v580_v31, %v588_v32  ;;  %v691_v28 = vld [vmem:[#allocation5 + $0x13a0] sm:$0xff]  ;;  %v692_v31 = vld [vmem:[#allocation5 + $0x13a8] sm:$0xff] }
 0x25d   :  { %6308 = vmatprep.subr.bf16.mxu0 %v7513_v37  ;;  %6480 = vmatprep.subr.bf16.mxu1 %v7515_v38  ;;  %v595_v37 = vld [vmem:[#allocation5 + $0x10a0] sm:$0xff]  ;;  %v700_v32 = vld [vmem:[#allocation5 + $0x13e8] sm:$0xff] }
 0x25e   :  { %v603_v38 = vld [vmem:[#allocation5 + $0x10e0] sm:$0xff] }
 0x25f   :  { %v7640_v50 = vcombine.low %v595_v37, %v603_v38  ;;  %v699_v29 = vld [vmem:[#allocation5 + $0x13e0] sm:$0xff] }
 0x260   :  { %6309 = vmatpush1.bf16.msra.mxu0 %v7512_v43  ;;  %6481 = vmatpush1.bf16.msra.mxu1 %v7514_v44  ;;  %v7641_v43 = vcombine.high %v595_v37, %v603_v38  ;;  %v7643_v44 = vcombine.high %v596_v39, %v604_v40  ;;  %v707_v37 = vld [vmem:[#allocation5 + $0x1420] sm:$0xff] }
 0x261   :  { %6310 = vmatprep.subr.bf16.mxu0 %v7529_v45  ;;  %6482 = vmatprep.subr.bf16.mxu1 %v7531_v46  ;;  %v611_v45 = vld [vmem:[#allocation5 + $0x1120] sm:$0xff] }
 0x262   :  { %v619_v46 = vld [vmem:[#allocation5 + $0x1160] sm:$0xff] }
 0x263   :  { %v715_v38 = vld [vmem:[#allocation5 + $0x1460] sm:$0xff] }
 0x264   :  { %6311 = vmatpush1.bf16.msra.mxu0 %v7528_v51  ;;  %6483 = vmatpush1.bf16.msra.mxu1 %v7530_v52  ;;  %v7642_v51 = vcombine.low %v596_v39, %v604_v40  ;;  %v7657_v52 = vcombine.high %v611_v45, %v619_v46  ;;  %v708_v39 = vld [vmem:[#allocation5 + $0x1428] sm:$0xff] }
 0x265   :  { %6312 = vmatprep.subr.bf16.mxu0 %v7545_v53  ;;  %6484 = vmatprep.subr.bf16.mxu1 %v7547_v54  ;;  %v7659_v53 = vcombine.high %v612_v48, %v620_v49  ;;  %v627_v54 = vld [vmem:[#allocation5 + $0x11a0] sm:$0xff]  ;;  %v716_v40 = vld [vmem:[#allocation5 + $0x1468] sm:$0xff] }
 0x268   :  { %6313 = vmatpush1.bf16.msra.mxu0 %v7544_v60  ;;  %6485 = vmatpush1.bf16.msra.mxu1 %v7546_v61  ;;  %v7656_v60 = vcombine.low %v611_v45, %v619_v46  ;;  %v7658_v61 = vcombine.low %v612_v48, %v620_v49  ;;  %v723_v45 = vld [vmem:[#allocation5 + $0x14a0] sm:$0xff]  ;;  %v732_v48 = vld [vmem:[#allocation5 + $0x14e8] sm:$0xff]  ;;  %v7752_v49 = vcombine.low %v707_v37, %v715_v38 }
 0x269   :  { %6314 = vmatprep.subr.bf16.mxu0 %v7561_v62  ;;  %6486 = vmatprep.subr.bf16.mxu1 %v7563_v0  ;;  %v7673_v62 = vcombine.high %v627_v54, %v635_v55  ;;  %v7675_v0 = vcombine.high %v628_v58, %v636_v59  ;;  %v731_v46 = vld [vmem:[#allocation5 + $0x14e0] sm:$0xff] }
 0x26c   :  { %6315 = vmatpush1.bf16.msra.mxu0 %v7560_v8  ;;  %6487 = vmatpush1.bf16.msra.mxu1 %v7562_v9  ;;  %v7672_v8 = vcombine.low %v627_v54, %v635_v55  ;;  %v7674_v9 = vcombine.low %v628_v58, %v636_v59  ;;  %v747_v54 = vld [vmem:[#allocation5 + $0x1560] sm:$0xff]  ;;  %v740_v55 = vld [vmem:[#allocation5 + $0x1528] sm:$0xff]  ;;  %v7768_v58 = vcombine.low %v723_v45, %v731_v46 }
 0x26d   :  { %6316 = vmatprep.subr.bf16.mxu0 %v7577_v10  ;;  %6488 = vmatprep.subr.bf16.mxu1 %v7579_v11  ;;  %v7689_v10 = vcombine.high %v643_v1, %v651_v2  ;;  %v7691_v11 = vcombine.high %v644_v3, %v652_v6 }
 0x270   :  { %6317 = vmatpush1.bf16.msra.mxu0 %v7576_v16  ;;  %6489 = vmatpush1.bf16.msra.mxu1 %v7578_v17  ;;  %v7688_v16 = vcombine.low %v643_v1, %v651_v2  ;;  %v7690_v17 = vcombine.low %v644_v3, %v652_v6  ;;  %v756_v1 = vld [vmem:[#allocation5 + $0x15a8] sm:$0xff] }
 0x271   :  { %6318 = vmatprep.subr.bf16.mxu0 %v7593_v18  ;;  %6490 = vmatprep.subr.bf16.mxu1 %v7595_v19  ;;  %v7705_v18 = vcombine.high %v659_v12, %v667_v13  ;;  %v7707_v19 = vcombine.high %v660_v14, %v668_v15  ;;  %v764_v2 = vld [vmem:[#allocation5 + $0x15e8] sm:$0xff] }
 0x274   :  { %6319 = vmatpush1.bf16.msra.mxu0 %v7592_v24  ;;  %6491 = vmatpush1.bf16.msra.mxu1 %v7594_v25  ;;  %v7704_v24 = vcombine.low %v659_v12, %v667_v13  ;;  %v7706_v25 = vcombine.low %v660_v14, %v668_v15  ;;  %v772_v12 = vld [vmem:[#allocation5 + $0x1628] sm:$0xff]  ;;  %v7802_v15 = vcombine.low %v756_v1, %v764_v2 }
 0x275   :  { %6320 = vmatprep.subr.bf16.mxu0 %v7609_v26  ;;  %6492 = vmatprep.subr.bf16.mxu1 %v7611_v27  ;;  %v7721_v26 = vcombine.high %v675_v20, %v683_v21  ;;  %v7723_v27 = vcombine.high %v676_v22, %v684_v23  ;;  %v780_v13 = vld [vmem:[#allocation5 + $0x1668] sm:$0xff] }
 0x278   :  { %6321 = vmatpush1.bf16.msra.mxu0 %v7608_v33  ;;  %6493 = vmatpush1.bf16.msra.mxu1 %v7610_v34  ;;  %v7720_v33 = vcombine.low %v675_v20, %v683_v21  ;;  %v7722_v34 = vcombine.low %v676_v22, %v684_v23  ;;  %v788_v20 = vld [vmem:[#allocation5 + $0x16a8] sm:$0xff]  ;;  %v7818_v23 = vcombine.low %v772_v12, %v780_v13 }
 0x279   :  { %6333 = vmatprep.subr.bf16.mxu0 %v7625_v35  ;;  %6505 = vmatprep.subr.bf16.mxu1 %v7627_v36  ;;  %v7737_v35 = vcombine.high %v691_v28, %v699_v29  ;;  %v7739_v36 = vcombine.high %v692_v31, %v700_v32  ;;  %v796_v21 = vld [vmem:[#allocation5 + $0x16e8] sm:$0xff] }
 0x27b   :  { %6323 = vmatmul.mubr.bf16.vlgmr.msra.gmra.mrb[8].mxu0 %v8253_v47  ;;  %6495 = vmatmul.mubr.bf16.vlgmr.msra.gmra.mrb[8].mxu1 %v8253_v47  ;;  %v724_v47 = vld [vmem:[#allocation5 + $0x14a8] sm:$0xff] }
 0x27c   :  { %6334 = vmatpush1.bf16.msra.mxu0 %v7624_v41  ;;  %6506 = vmatpush1.bf16.msra.mxu1 %v7626_v42  ;;  %v7736_v41 = vcombine.low %v691_v28, %v699_v29  ;;  %v7738_v42 = vcombine.low %v692_v31, %v700_v32  ;;  %v7770_v59 = vcombine.low %v724_v47, %v732_v48  ;;  %v804_v28 = vld [vmem:[#allocation5 + $0x1728] sm:$0xff] }
 0x27d   :  { %6335 = vmatprep.subr.bf16.mxu0 %v7641_v43  ;;  %6507 = vmatprep.subr.bf16.mxu1 %v7643_v44  ;;  %v7753_v43 = vcombine.high %v707_v37, %v715_v38  ;;  %v7755_v44 = vcombine.high %v708_v39, %v716_v40  ;;  %v812_v29 = vld [vmem:[#allocation5 + $0x1768] sm:$0xff]  ;;  %v7834_v32 = vcombine.low %v788_v20, %v796_v21 }
 0x27e   :  { %6365 = vmatprep.mubr.bf16.mxu0 %v8254_v57  ;;  %6537 = vmatprep.mubr.bf16.mxu1 %v8254_v57  ;;  %v748_v57 = vld [vmem:[#allocation5 + $0x1568] sm:$0xff] }
 0x27f   :  { %v7786_v6 = vcombine.low %v740_v55, %v748_v57  ;;  %v820_v37 = vld [vmem:[#allocation5 + $0x17a8] sm:$0xff] }
 0x280   :  { %6336 = vmatpush1.bf16.msra.mxu0 %v7640_v50  ;;  %6508 = vmatpush1.bf16.msra.mxu1 %v7642_v51  ;;  %v7754_v50 = vcombine.low %v708_v39, %v716_v40  ;;  %v7769_v51 = vcombine.high %v723_v45, %v731_v46  ;;  %v828_v38 = vld [vmem:[#allocation5 + $0x17e8] sm:$0xff]  ;;  %v7850_v40 = vcombine.low %v804_v28, %v812_v29 }
 0x281   :  { %6337 = vmatprep.subr.bf16.mxu0 %v7657_v52  ;;  %6509 = vmatprep.subr.bf16.mxu1 %v7659_v53  ;;  %v7771_v52 = vcombine.high %v724_v47, %v732_v48  ;;  %v739_v53 = vld [vmem:[#allocation5 + $0x1520] sm:$0xff]  ;;  %v836_v45 = vld [vmem:[#allocation5 + $0x1828] sm:$0xff]  ;;  %v7866_v48 = vcombine.low %v820_v37, %v828_v38 }
 0x282   :  { %v7784_v3 = vcombine.low %v739_v53, %v747_v54  ;;  %v844_v46 = vld [vmem:[#allocation5 + $0x1868] sm:$0xff] }
 0x284   :  { %6338 = vmatpush1.bf16.msra.mxu0 %v7656_v60  ;;  %6510 = vmatpush1.bf16.msra.mxu1 %v7658_v61  ;;  %v7785_v60 = vcombine.high %v739_v53, %v747_v54  ;;  %v7787_v61 = vcombine.high %v740_v55, %v748_v57  ;;  %v852_v53 = vld [vmem:[#allocation5 + $0x18a8] sm:$0xff]  ;;  %v7882_v57 = vcombine.low %v836_v45, %v844_v46 }
 0x285   :  { %6339 = vmatprep.subr.bf16.mxu0 %v7673_v62  ;;  %6511 = vmatprep.subr.bf16.mxu1 %v7675_v0  ;;  %v755_v62 = vld [vmem:[#allocation5 + $0x15a0] sm:$0xff]  ;;  %v860_v54 = vld [vmem:[#allocation5 + $0x18e8] sm:$0xff] }
 0x286   :  { %v763_v0 = vld [vmem:[#allocation5 + $0x15e0] sm:$0xff] }
 0x287   :  { %v7800_v14 = vcombine.low %v755_v62, %v763_v0 }
 0x288   :  { %6340 = vmatpush1.bf16.msra.mxu0 %v7672_v8  ;;  %6512 = vmatpush1.bf16.msra.mxu1 %v7674_v9  ;;  %v7801_v8 = vcombine.high %v755_v62, %v763_v0  ;;  %v7803_v9 = vcombine.high %v756_v1, %v764_v2  ;;  %v8255_v62 = vld [vmem:[#allocation2 + $0x10] ss:$28 sps:$4 sm:$0xff]   ;;  %v868_v0 = vld [vmem:[#allocation5 + $0x1928] sm:$0xff] }
 0x289   :  { %6341 = vmatprep.subr.bf16.mxu0 %v7689_v10  ;;  %6513 = vmatprep.subr.bf16.mxu1 %v7691_v11  ;;  %v771_v10 = vld [vmem:[#allocation5 + $0x1620] sm:$0xff]  ;;  %v876_v1 = vld [vmem:[#allocation5 + $0x1968] sm:$0xff] }
 0x28a   :  { %v779_v11 = vld [vmem:[#allocation5 + $0x1660] sm:$0xff] }
 0x28b   :  { %v7816_v22 = vcombine.low %v771_v10, %v779_v11 }
 0x28c   :  { %6342 = vmatpush1.bf16.msra.mxu0 %v7688_v16  ;;  %6514 = vmatpush1.bf16.msra.mxu1 %v7690_v17  ;;  %v7817_v16 = vcombine.high %v771_v10, %v779_v11  ;;  %v7819_v17 = vcombine.high %v772_v12, %v780_v13  ;;  %v891_v10 = vld [vmem:[#allocation5 + $0x19e0] sm:$0xff]  ;;  %v884_v11 = vld [vmem:[#allocation5 + $0x19a8] sm:$0xff] }
 0x28d   :  { %6343 = vmatprep.subr.bf16.mxu0 %v7705_v18  ;;  %6515 = vmatprep.subr.bf16.mxu1 %v7707_v19  ;;  %v787_v18 = vld [vmem:[#allocation5 + $0x16a0] sm:$0xff]  ;;  %v892_v12 = vld [vmem:[#allocation5 + $0x19e8] sm:$0xff] }
 0x28e   :  { %v795_v19 = vld [vmem:[#allocation5 + $0x16e0] sm:$0xff] }
 0x28f   :  { %v7832_v31 = vcombine.low %v787_v18, %v795_v19 }
 0x290   :  { %6344 = vmatpush1.bf16.msra.mxu0 %v7704_v24  ;;  %6516 = vmatpush1.bf16.msra.mxu1 %v7706_v25  ;;  %v7833_v24 = vcombine.high %v787_v18, %v795_v19  ;;  %v7835_v25 = vcombine.high %v788_v20, %v796_v21  ;;  %v907_v18 = vld [vmem:[#allocation5 + $0x1a60] sm:$0xff]  ;;  %v900_v19 = vld [vmem:[#allocation5 + $0x1a28] sm:$0xff] }
 0x291   :  { %6345 = vmatprep.subr.bf16.mxu0 %v7721_v26  ;;  %6517 = vmatprep.subr.bf16.mxu1 %v7723_v27  ;;  %v803_v26 = vld [vmem:[#allocation5 + $0x1720] sm:$0xff]  ;;  %v908_v20 = vld [vmem:[#allocation5 + $0x1a68] sm:$0xff] }
 0x292   :  { %v811_v27 = vld [vmem:[#allocation5 + $0x1760] sm:$0xff] }
 0x293   :  { %v7848_v39 = vcombine.low %v803_v26, %v811_v27 }
 0x294   :  { %6346 = vmatpush1.bf16.msra.mxu0 %v7720_v33  ;;  %6518 = vmatpush1.bf16.msra.mxu1 %v7722_v34  ;;  %v7849_v33 = vcombine.high %v803_v26, %v811_v27  ;;  %v7851_v34 = vcombine.high %v804_v28, %v812_v29  ;;  %v923_v26 = vld [vmem:[#allocation5 + $0x1ae0] sm:$0xff]  ;;  %v981_v27 = vsub.s32 4, %v8431_v56  ;;  %v916_v28 = vld [vmem:[#allocation5 + $0x1aa8] sm:$0xff] }
 0x295   :  { %6347 = vmatprep.subr.bf16.mxu0 %v7737_v35  ;;  %6519 = vmatprep.subr.bf16.mxu1 %v7739_v36  ;;  %v819_v35 = vld [vmem:[#allocation5 + $0x17a0] sm:$0xff]  ;;  %v924_v29 = vld [vmem:[#allocation5 + $0x1ae8] sm:$0xff] }
 0x296   :  { %v827_v36 = vld [vmem:[#allocation5 + $0x17e0] sm:$0xff] }
 0x297   :  { %v7864_v47 = vcombine.low %v819_v35, %v827_v36 }
 0x298   :  { %6348 = vmatpush1.bf16.msra.mxu0 %v7736_v41  ;;  %6520 = vmatpush1.bf16.msra.mxu1 %v7738_v42  ;;  %v7865_v41 = vcombine.high %v819_v35, %v827_v36  ;;  %v7867_v42 = vcombine.high %v820_v37, %v828_v38  ;;  %v993_v35 = vsub.s32 7, %v8431_v56  ;;  %v7963_v37 = vcombine.high %v916_v28, %v924_v29  ;;  %v931_v38 = vld [vmem:[#allocation5 + $0x1b20] sm:$0xff] }
 0x299   :  { %6349 = vmatprep.subr.bf16.mxu0 %v7753_v43  ;;  %6521 = vmatprep.subr.bf16.mxu1 %v7755_v44  ;;  %v835_v43 = vld [vmem:[#allocation5 + $0x1820] sm:$0xff] }
 0x29a   :  { %v843_v44 = vld [vmem:[#allocation5 + $0x1860] sm:$0xff] }
 0x29b   :  { %v7880_v55 = vcombine.low %v835_v43, %v843_v44 }
 0x29c   :  { %6350 = vmatpush1.bf16.msra.mxu0 %v7752_v49  ;;  %6522 = vmatpush1.bf16.msra.mxu1 %v7754_v50  ;;  %v7881_v49 = vcombine.high %v835_v43, %v843_v44  ;;  %v7883_v50 = vcombine.high %v836_v45, %v844_v46  ;;  %v940_v43 = vld [vmem:[#allocation5 + $0x1b68] sm:$0xff] }
 0x29d   :  { %6351 = vmatprep.subr.bf16.mxu0 %v7769_v51  ;;  %6523 = vmatprep.subr.bf16.mxu1 %v7771_v52  ;;  %v851_v51 = vld [vmem:[#allocation5 + $0x18a0] sm:$0xff] }
 0x29e   :  { %v859_v52 = vld [vmem:[#allocation5 + $0x18e0] sm:$0xff] }
 0x29f   :  { %v7896_v2 = vcombine.low %v851_v51, %v859_v52 }
 0x2a0   :  { %6352 = vmatpush1.bf16.msra.mxu0 %v7768_v58  ;;  %6524 = vmatpush1.bf16.msra.mxu1 %v7770_v59  ;;  %v7897_v58 = vcombine.high %v851_v51, %v859_v52  ;;  %v7899_v59 = vcombine.high %v852_v53, %v860_v54  ;;  %v947_v52 = vld [vmem:[#allocation5 + $0x1ba0] sm:$0xff] }
 0x2a1   :  { %6353 = vmatprep.subr.bf16.mxu0 %v7785_v60  ;;  %6525 = vmatprep.subr.bf16.mxu1 %v7787_v61  ;;  %v867_v60 = vld [vmem:[#allocation5 + $0x1920] sm:$0xff] }
 0x2a2   :  { %v875_v61 = vld [vmem:[#allocation5 + $0x1960] sm:$0xff] }
 0x2a3   :  { %v7912_v13 = vcombine.low %v867_v60, %v875_v61 }
 0x2a4   :  { %6354 = vmatpush1.bf16.msra.mxu0 %v7784_v3  ;;  %6526 = vmatpush1.bf16.msra.mxu1 %v7786_v6  ;;  %v7898_v3 = vcombine.low %v852_v53, %v860_v54  ;;  %v7913_v6 = vcombine.high %v867_v60, %v875_v61  ;;  %v955_v53 = vld [vmem:[#allocation5 + $0x1be0] sm:$0xff] }
 0x2a5   :  { %6355 = vmatprep.subr.bf16.mxu0 %v7801_v8  ;;  %6527 = vmatprep.subr.bf16.mxu1 %v7803_v9  ;;  %v7915_v8 = vcombine.high %v868_v0, %v876_v1  ;;  %v883_v9 = vld [vmem:[#allocation5 + $0x19a0] sm:$0xff] }
 0x2a6   :  { %v7928_v21 = vcombine.low %v883_v9, %v891_v10 }
 0x2a8   :  { %6356 = vmatpush1.bf16.msra.mxu0 %v7800_v14  ;;  %6528 = vmatpush1.bf16.msra.mxu1 %v7802_v15  ;;  %v7914_v14 = vcombine.low %v868_v0, %v876_v1  ;;  %v7929_v15 = vcombine.high %v883_v9, %v891_v10  ;;  %v7993_v10 = vcombine.high %v947_v52, %v955_v53 }
 0x2a9   :  { %6357 = vmatprep.subr.bf16.mxu0 %v7817_v16  ;;  %6529 = vmatprep.subr.bf16.mxu1 %v7819_v17  ;;  %v7931_v16 = vcombine.high %v884_v11, %v892_v12  ;;  %v899_v17 = vld [vmem:[#allocation5 + $0x1a20] sm:$0xff] }
 0x2ac   :  { %6358 = vmatpush1.bf16.msra.mxu0 %v7816_v22  ;;  %6530 = vmatpush1.bf16.msra.mxu1 %v7818_v23  ;;  %v7930_v22 = vcombine.low %v884_v11, %v892_v12  ;;  %v7945_v23 = vcombine.high %v899_v17, %v907_v18 }
 0x2ad   :  { %6359 = vmatprep.subr.bf16.mxu0 %v7833_v24  ;;  %6531 = vmatprep.subr.bf16.mxu1 %v7835_v25  ;;  %v7947_v24 = vcombine.high %v900_v19, %v908_v20  ;;  %v915_v25 = vld [vmem:[#allocation5 + $0x1aa0] sm:$0xff] }
 0x2ae   :  { %v7961_v36 = vcombine.high %v915_v25, %v923_v26  ;;  %v7960_v46 = vcombine.low %v915_v25, %v923_v26  ;;  %v93_v25 = vld [vmem:[#allocation5 + $0xf0] sm:$0xff]  ;;  %v86_v26 = vld [vmem:[#allocation5 + $0xb8] sm:$0xff] }
 0x2b0   :  { %6360 = vmatpush1.bf16.msra.mxu0 %v7832_v31  ;;  %6532 = vmatpush1.bf16.msra.mxu1 %v7834_v32  ;;  %v7944_v31 = vcombine.low %v899_v17, %v907_v18  ;;  %v989_v32 = vsub.s32 6, %v8431_v56  ;;  %v70_v17 = vld [vmem:[#allocation5 + $0x38] sm:$0xff] }
 0x2b1   :  { %6361 = vmatprep.subr.bf16.mxu0 %v7849_v33  ;;  %6533 = vmatprep.subr.bf16.mxu1 %v7851_v34  ;;  %v985_v33 = vsub.s32 5, %v8431_v56  ;;  %v7946_v34 = vcombine.low %v900_v19, %v908_v20  ;;  %v78_v18 = vld [vmem:[#allocation5 + $0x78] sm:$0xff]  ;;  %v7992_v20 = vcombine.low %v947_v52, %v955_v53  ;;  %v125_v52 = vld [vmem:[#allocation5 + $0x1f0] sm:$0xff]  ;;  %v8258_v53 = vld [vmem:[#allocation2 + $0x4] ss:$28 sps:$4 sm:$0xff]  }
 0x2b4   :  { %6362 = vmatpush1.bf16.msra.mxu0 %v7848_v39  ;;  %6534 = vmatpush1.bf16.msra.mxu1 %v7850_v40  ;;  %v939_v39 = vld [vmem:[#allocation5 + $0x1b60] sm:$0xff] }
 0x2b5   :  { %6363 = vmatprep.subr.bf16.mxu0 %v7865_v41  ;;  %6535 = vmatprep.subr.bf16.mxu1 %v7867_v42  ;;  %v8256_v40 = vld [vmem:[#allocation7] sm:$0xff]  ;;  %v932_v42 = vld [vmem:[#allocation5 + $0x1b28] sm:$0xff]  ;;  %v7976_v1 = vcombine.low %v931_v38, %v939_v39 }
 0x2b6   :  { %v982_v41 = vrot.slane %v8256_v40, %v981_v27  ;;  %v990_v44 = vrot.slane %v8256_v40, %v989_v32  ;;  %v986_v45 = vrot.slane %v8256_v40, %v985_v33  ;;  %v7979_v51 = vcombine.high %v932_v42, %v940_v43 }
 0x2b8   :  { %6364 = vmatpush1.bf16.msra.mxu0 %v7864_v47  ;;  %6536 = vmatpush1.bf16.msra.mxu1 %v7866_v48  ;;  %v994_v47 = vrot.slane %v8256_v40, %v993_v35  ;;  %v7962_v48 = vcombine.low %v916_v28, %v924_v29  ;;  %v94_v28 = vld [vmem:[#allocation5 + $0xf8] sm:$0xff] }
 0x2b9   :  { %6376 = vmatprep.subr.bf16.mxu0 %v7881_v49  ;;  %6548 = vmatprep.subr.bf16.mxu1 %v7883_v50  ;;  %v7977_v49 = vcombine.high %v931_v38, %v939_v39  ;;  %v109_v38 = vld [vmem:[#allocation5 + $0x170] sm:$0xff]  ;;  %v8257_v40 = vld [vmem:[#allocation2 + $0x18] ss:$28 sps:$4 sm:$0xff]  }
 0x2bb   :  { %6366 = vmatmul.mubr.bf16.vlgmr.msra.gmra.mrb[8].mxu0 %v8255_v62  ;;  %6538 = vmatmul.mubr.bf16.vlgmr.msra.gmra.mrb[8].mxu1 %v8255_v62 }
 0x2bc   :  { %6377 = vmatpush1.bf16.msra.mxu0 %v7880_v55  ;;  %6549 = vmatpush1.bf16.msra.mxu1 %v7882_v57 }
 0x2bd   :  { %6378 = vmatprep.subr.bf16.mxu0 %v7897_v58  ;;  %6550 = vmatprep.subr.bf16.mxu1 %v7899_v59  ;;  %v948_v58 = vld [vmem:[#allocation5 + $0x1ba8] sm:$0xff] }
 0x2be   :  { %6408 = vmatprep.mubr.bf16.mxu0 %v8366_v30  ;;  %6580 = vmatprep.mubr.bf16.mxu1 %v8366_v30  ;;  %v956_v59 = vld [vmem:[#allocation5 + $0x1be8] sm:$0xff] }
 0x2c0   :  { %6379 = vmatpush1.bf16.msra.mxu0 %v7896_v2  ;;  %6551 = vmatpush1.bf16.msra.mxu1 %v7898_v3  ;;  %v7978_v2 = vcombine.low %v932_v42, %v940_v43  ;;  %v110_v42 = vld [vmem:[#allocation5 + $0x178] sm:$0xff] }
 0x2c1   :  { %6380 = vmatprep.subr.bf16.mxu0 %v7913_v6  ;;  %6552 = vmatprep.subr.bf16.mxu1 %v7915_v8 }
 0x2c4   :  { %6381 = vmatpush1.bf16.msra.mxu0 %v7912_v13  ;;  %6553 = vmatpush1.bf16.msra.mxu1 %v7914_v14  ;;  %v7995_v13 = vcombine.high %v948_v58, %v956_v59  ;;  %v69_v14 = vld [vmem:[#allocation5 + $0x30] sm:$0xff] }
 0x2c5   :  { %6382 = vmatprep.subr.bf16.mxu0 %v7929_v15  ;;  %6554 = vmatprep.subr.bf16.mxu1 %v7931_v16  ;;  %v77_v15 = vld [vmem:[#allocation5 + $0x70] sm:$0xff] }
 0x2c6   :  { %v7116_v29 = vcombine.low %v69_v14, %v77_v15 }
 0x2c8   :  { %6383 = vmatpush1.bf16.msra.mxu0 %v7928_v21  ;;  %6555 = vmatpush1.bf16.msra.mxu1 %v7930_v22  ;;  %v7994_v21 = vcombine.low %v948_v58, %v956_v59  ;;  %v7117_v22 = vcombine.high %v69_v14, %v77_v15  ;;  %v126_v58 = vld [vmem:[#allocation5 + $0x1f8] sm:$0xff] }
 0x2c9   :  { %6384 = vmatprep.subr.bf16.mxu0 %v7945_v23  ;;  %6556 = vmatprep.subr.bf16.mxu1 %v7947_v24  ;;  %v7119_v23 = vcombine.high %v70_v17, %v78_v18  ;;  %v85_v24 = vld [vmem:[#allocation5 + $0xb0] sm:$0xff] }
 0x2cc   :  { %6385 = vmatpush1.bf16.msra.mxu0 %v7944_v31  ;;  %6557 = vmatpush1.bf16.msra.mxu1 %v7946_v34  ;;  %v7118_v31 = vcombine.low %v70_v17, %v78_v18  ;;  %v7133_v34 = vcombine.high %v85_v24, %v93_v25  ;;  %v157_v17 = vld [vmem:[#allocation5 + $0x2f0] sm:$0xff]  ;;  %v150_v18 = vld [vmem:[#allocation5 + $0x2b8] sm:$0xff] }
 0x2cd   :  { %6386 = vmatprep.subr.bf16.mxu0 %v7961_v36  ;;  %6558 = vmatprep.subr.bf16.mxu1 %v7963_v37  ;;  %v7135_v36 = vcombine.high %v86_v26, %v94_v28  ;;  %v101_v37 = vld [vmem:[#allocation5 + $0x130] sm:$0xff] }
 0x2ce   :  { %v6066_v50 = vpop.f32.mrb[4].mxu0  ;;  %v6238_v55 = vpop.f32.mrb[4].mxu1 }
 0x2cf   :  { %v8040_v54 = vadd.f32 %v6066_v50, %v982_v41  ;;  %v6068_v57 = vpop.f32.mrb[5].mxu0  ;;  %v8044_v60 = vadd.f32 %v6238_v55, %v990_v44  ;;  %v6240_v62 = vpop.f32.mrb[5].mxu1 }
 0x2d0   :  { %v8041_v61 = vadd.f32 %v6068_v57, %v986_v45  ;;  %v6070_v0 = vpop.f32.mrb[6].mxu0  ;;  %6387 = vmatpush1.bf16.msra.mxu0 %v7960_v46  ;;  %v8045_v3 = vadd.f32 %v6240_v62, %v994_v47  ;;  %v6242_v8 = vpop.f32.mrb[6].mxu1  ;;  %6559 = vmatpush1.bf16.msra.mxu1 %v7962_v48  ;;  %v7134_v46 = vcombine.low %v86_v26, %v94_v28  ;;  %v118_v57 = vld [vmem:[#allocation5 + $0x1b8] sm:$0xff] }
 0x2d1   :  { %8195 = vtanh.f32 %v8040_v54  ;;  %v8042_v6 = vadd.f32 %v6070_v0, %v982_v41  ;;  %v6072_v9 = vpop.f32.mrb[7].mxu0  ;;  %6388 = vmatprep.subr.bf16.mxu0 %v7977_v49  ;;  %v8046_v11 = vadd.f32 %v6242_v8, %v990_v44  ;;  %v6244_v12 = vpop.f32.mrb[7].mxu1  ;;  %6560 = vmatprep.subr.bf16.mxu1 %v7979_v51  ;;  %v102_v41 = vld [vmem:[#allocation5 + $0x138] sm:$0xff]  ;;  %v7132_v44 = vcombine.low %v85_v24, %v93_v25  ;;  %v117_v51 = vld [vmem:[#allocation5 + $0x1b0] sm:$0xff] }
 0x2d2   :  { %8197 = vtanh.f32 %v8044_v60  ;;  %v8043_v16 = vadd.f32 %v6072_v9, %v986_v45  ;;  %v8047_v19 = vadd.f32 %v6244_v12, %v994_v47  ;;  %v7149_v47 = vcombine.high %v101_v37, %v109_v38  ;;  %v141_v8 = vld [vmem:[#allocation5 + $0x270] sm:$0xff]  ;;  %v166_v26 = vld [vmem:[#allocation5 + $0x338] sm:$0xff] }
 0x2d3   :  { %8199 = vtanh.f32 %v8041_v61  ;;  %v7151_v50 = vcombine.high %v102_v41, %v110_v42  ;;  %v7148_v60 = vcombine.low %v101_v37, %v109_v38  ;;  %v7150_v62 = vcombine.low %v102_v41, %v110_v42  ;;  %v165_v24 = vld [vmem:[#allocation5 + $0x330] sm:$0xff]  ;;  %v174_v28 = vld [vmem:[#allocation5 + $0x378] sm:$0xff] }
 0x2d4   :  { %8201 = vtanh.f32 %v8045_v3  ;;  %6389 = vmatpush1.bf16.msra.mxu0 %v7976_v1  ;;  %6561 = vmatpush1.bf16.msra.mxu1 %v7978_v2  ;;  %v7165_v0 = vcombine.high %v117_v51, %v125_v52  ;;  %v7167_v3 = vcombine.high %v118_v57, %v126_v58  ;;  %v7164_v12 = vcombine.low %v117_v51, %v125_v52  ;;  %v173_v25 = vld [vmem:[#allocation5 + $0x370] sm:$0xff] }
 0x2d5   :  { %8203 = vtanh.f32 %v8042_v6  ;;  %6390 = vmatprep.subr.bf16.mxu0 %v7993_v10  ;;  %6562 = vmatprep.subr.bf16.mxu1 %v7995_v13  ;;  %v133_v6 = vld [vmem:[#allocation5 + $0x230] sm:$0xff]  ;;  %v134_v10 = vld [vmem:[#allocation5 + $0x238] sm:$0xff]  ;;  %v7166_v13 = vcombine.low %v118_v57, %v126_v58  ;;  %v7212_v41 = vcombine.low %v165_v24, %v173_v25  ;;  %v7214_v42 = vcombine.low %v166_v26, %v174_v28 }
 0x2d6   :  { %8205 = vtanh.f32 %v8046_v11  ;;  %v142_v11 = vld [vmem:[#allocation5 + $0x278] sm:$0xff]  ;;  %v7181_v14 = vcombine.high %v133_v6, %v141_v8  ;;  %v181_v37 = vld [vmem:[#allocation5 + $0x3b0] sm:$0xff] }
 0x2d7   :  { %8207 = vtanh.f32 %v8043_v16  ;;  %v7183_v15 = vcombine.high %v134_v10, %v142_v11  ;;  %v149_v16 = vld [vmem:[#allocation5 + $0x2b0] sm:$0xff]  ;;  %v222_v57 = vld [vmem:[#allocation5 + $0x4f8] sm:$0xff] }
 0x2d8   :  { %8209 = vtanh.f32 %v8047_v19  ;;  %6391 = vmatpush1.bf16.msra.mxu0 %v7992_v20  ;;  %6563 = vmatpush1.bf16.msra.mxu1 %v7994_v21  ;;  %v158_v19 = vld [vmem:[#allocation5 + $0x2f8] sm:$0xff]  ;;  %v7180_v20 = vcombine.low %v133_v6, %v141_v8  ;;  %v7182_v21 = vcombine.low %v134_v10, %v142_v11  ;;  %v189_v38 = vld [vmem:[#allocation5 + $0x3f0] sm:$0xff] }
 0x2d9   :  { %6591 = vmatprep.subr.bf16.mxu0 %v7117_v22  ;;  %6763 = vmatprep.subr.bf16.mxu1 %v7119_v23  ;;  %v7197_v22 = vcombine.high %v149_v16, %v157_v17  ;;  %v7199_v23 = vcombine.high %v150_v18, %v158_v19  ;;  %v245_v10 = vld [vmem:[#allocation5 + $0x5b0] sm:$0xff] }
 0x2da   :  { %v253_v11 = vld [vmem:[#allocation5 + $0x5f0] sm:$0xff] }
 0x2db   :  { %v8196_v39 = vpop.eup %8195  ;;  %6409 = vmatmul.mubr.bf16.vlgmr.msra.gmra.mrb[8].mxu0 %v8257_v40  ;;  %6581 = vmatmul.mubr.bf16.vlgmr.msra.gmra.mrb[8].mxu1 %v8257_v40  ;;  %v190_v40 = vld [vmem:[#allocation5 + $0x3f8] sm:$0xff] }
 0x2dc   :  { %v8198_v43 = vpop.eup %8197  ;;  %6592 = vmatpush1.bf16.msra.mxu0 %v7116_v29  ;;  %6764 = vmatpush1.bf16.msra.mxu1 %v7118_v31  ;;  %v7196_v29 = vcombine.low %v149_v16, %v157_v17  ;;  %v7198_v31 = vcombine.low %v150_v18, %v158_v19  ;;  %v7293_v16 = vcombine.high %v245_v10, %v253_v11  ;;  %v261_v18 = vld [vmem:[#allocation5 + $0x630] sm:$0xff] }
 0x2dd   :  { %v8200_v45 = vpop.eup %8199  ;;  %6593 = vmatprep.subr.bf16.mxu0 %v7133_v34  ;;  %6765 = vmatprep.subr.bf16.mxu1 %v7135_v36  ;;  %v7213_v34 = vcombine.high %v165_v24, %v173_v25  ;;  %v7215_v36 = vcombine.high %v166_v26, %v174_v28  ;;  %v269_v19 = vld [vmem:[#allocation5 + $0x670] sm:$0xff] }
 0x2de   :  { %v8202_v48 = vpop.eup %8201  ;;  %v8018_v49 = vpack.c.bf16 %v8200_v45, %v8196_v39  ;;  %6623 = vmatprep.mubr.bf16.mxu0 %v8258_v53  ;;  %6795 = vmatprep.mubr.bf16.mxu1 %v8258_v53  ;;  %v182_v39 = vld [vmem:[#allocation5 + $0x3b8] sm:$0xff]  ;;  %v197_v45 = vld [vmem:[#allocation5 + $0x430] sm:$0xff]  ;;  %v7309_v24 = vcombine.high %v261_v18, %v269_v19 }
 0x2df   :  { %v8204_v54 = vpop.eup %8203  ;;  %v8019_v55 = vpack.c.bf16 %v8202_v48, %v8198_v43  ;;  %v7229_v43 = vcombine.high %v181_v37, %v189_v38  ;;  %v206_v48 = vld [vmem:[#allocation5 + $0x478] sm:$0xff]  ;;  %v213_v53 = vld [vmem:[#allocation5 + $0x4b0] sm:$0xff] }
 0x2e0   :  { %v8206_v59 = vpop.eup %8205  ;;  %7065 = vst [vmem:[#allocation8 + $0x10] sm:$0xff] %v8018_v49  ;;  %6594 = vmatpush1.bf16.msra.mxu0 %v7132_v44  ;;  %6766 = vmatpush1.bf16.msra.mxu1 %v7134_v46  ;;  %v7231_v44 = vcombine.high %v182_v39, %v190_v40  ;;  %v205_v46 = vld [vmem:[#allocation5 + $0x470] sm:$0xff]  ;;  %v7228_v49 = vcombine.low %v181_v37, %v189_v38 }
 0x2e1   :  { %v8208_v61 = vpop.eup %8207  ;;  %7066 = vst [vmem:[#allocation8 + $0x18] sm:$0xff] %v8019_v55  ;;  %6595 = vmatprep.subr.bf16.mxu0 %v7149_v47  ;;  %6767 = vmatprep.subr.bf16.mxu1 %v7151_v50  ;;  %v198_v47 = vld [vmem:[#allocation5 + $0x438] sm:$0xff]  ;;  %v7230_v50 = vcombine.low %v182_v39, %v190_v40  ;;  %v7245_v51 = vcombine.high %v197_v45, %v205_v46  ;;  %v277_v26 = vld [vmem:[#allocation5 + $0x6b0] sm:$0xff] }
 0x2e2   :  { %v8210_v1 = vpop.eup %8209  ;;  %v8026_v2 = vpack.c.bf16 %v8208_v61, %v8204_v54  ;;  %v7247_v52 = vcombine.high %v198_v47, %v206_v48  ;;  %v221_v54 = vld [vmem:[#allocation5 + $0x4f0] sm:$0xff]  ;;  %v214_v55 = vld [vmem:[#allocation5 + $0x4b8] sm:$0xff]  ;;  %v7244_v58 = vcombine.low %v197_v45, %v205_v46 }
 0x2e3   :  { %v8027_v9 = vpack.c.bf16 %v8210_v1, %v8206_v59  ;;  %v7246_v59 = vcombine.low %v198_v47, %v206_v48  ;;  %v7263_v61 = vcombine.high %v214_v55, %v222_v57  ;;  %v230_v1 = vld [vmem:[#allocation5 + $0x538] sm:$0xff]  ;;  %v7262_v6 = vcombine.low %v214_v55, %v222_v57  ;;  %v285_v28 = vld [vmem:[#allocation5 + $0x6f0] sm:$0xff] }
 0x2e4   :  { %7073 = vst [vmem:[#allocation8 + $0x50] sm:$0xff] %v8026_v2  ;;  %6596 = vmatpush1.bf16.msra.mxu0 %v7148_v60  ;;  %6768 = vmatpush1.bf16.msra.mxu1 %v7150_v62  ;;  %v7261_v60 = vcombine.high %v213_v53, %v221_v54  ;;  %v229_v62 = vld [vmem:[#allocation5 + $0x530] sm:$0xff]  ;;  %v238_v2 = vld [vmem:[#allocation5 + $0x578] sm:$0xff]  ;;  %v7325_v37 = vcombine.high %v277_v26, %v285_v28 }
 0x2e5   :  { %7074 = vst [vmem:[#allocation8 + $0x58] sm:$0xff] %v8027_v9  ;;  %6597 = vmatprep.subr.bf16.mxu0 %v7165_v0  ;;  %6769 = vmatprep.subr.bf16.mxu1 %v7167_v3  ;;  %v237_v0 = vld [vmem:[#allocation5 + $0x570] sm:$0xff]  ;;  %v7260_v3 = vcombine.low %v213_v53, %v221_v54  ;;  %v7279_v9 = vcombine.high %v230_v1, %v238_v2 }
 0x2e6   :  { %v7277_v8 = vcombine.high %v229_v62, %v237_v0  ;;  %v293_v39 = vld [vmem:[#allocation5 + $0x730] sm:$0xff] }
 0x2e7   :  { %v301_v40 = vld [vmem:[#allocation5 + $0x770] sm:$0xff] }
 0x2e8   :  { %6598 = vmatpush1.bf16.msra.mxu0 %v7164_v12  ;;  %6770 = vmatpush1.bf16.msra.mxu1 %v7166_v13  ;;  %v246_v12 = vld [vmem:[#allocation5 + $0x5b8] sm:$0xff]  ;;  %v7341_v45 = vcombine.high %v293_v39, %v301_v40  ;;  %v309_v47 = vld [vmem:[#allocation5 + $0x7b0] sm:$0xff] }
 0x2e9   :  { %6599 = vmatprep.subr.bf16.mxu0 %v7181_v14  ;;  %6771 = vmatprep.subr.bf16.mxu1 %v7183_v15  ;;  %v254_v13 = vld [vmem:[#allocation5 + $0x5f8] sm:$0xff]  ;;  %v7276_v14 = vcombine.low %v229_v62, %v237_v0  ;;  %v7278_v15 = vcombine.low %v230_v1, %v238_v2  ;;  %v317_v48 = vld [vmem:[#allocation5 + $0x7f0] sm:$0xff] }
 0x2ea   :  { %v7295_v17 = vcombine.high %v246_v12, %v254_v13  ;;  %v7357_v53 = vcombine.high %v309_v47, %v317_v48  ;;  %v325_v55 = vld [vmem:[#allocation5 + $0x830] sm:$0xff] }
 0x2eb   :  { %v333_v57 = vld [vmem:[#allocation5 + $0x870] sm:$0xff] }
 0x2ec   :  { %6600 = vmatpush1.bf16.msra.mxu0 %v7180_v20  ;;  %6772 = vmatpush1.bf16.msra.mxu1 %v7182_v21  ;;  %v262_v20 = vld [vmem:[#allocation5 + $0x638] sm:$0xff]  ;;  %v7373_v62 = vcombine.high %v325_v55, %v333_v57  ;;  %v341_v1 = vld [vmem:[#allocation5 + $0x8b0] sm:$0xff] }
 0x2ed   :  { %6601 = vmatprep.subr.bf16.mxu0 %v7197_v22  ;;  %6773 = vmatprep.subr.bf16.mxu1 %v7199_v23  ;;  %v270_v21 = vld [vmem:[#allocation5 + $0x678] sm:$0xff]  ;;  %v7292_v22 = vcombine.low %v245_v10, %v253_v11  ;;  %v7294_v23 = vcombine.low %v246_v12, %v254_v13  ;;  %v349_v2 = vld [vmem:[#allocation5 + $0x8f0] sm:$0xff] }
 0x2ee   :  { %v7311_v25 = vcombine.high %v262_v20, %v270_v21  ;;  %v7389_v10 = vcombine.high %v341_v1, %v349_v2  ;;  %v357_v12 = vld [vmem:[#allocation5 + $0x930] sm:$0xff] }
 0x2ef   :  { %v365_v13 = vld [vmem:[#allocation5 + $0x970] sm:$0xff] }
 0x2f0   :  { %6602 = vmatpush1.bf16.msra.mxu0 %v7196_v29  ;;  %6774 = vmatpush1.bf16.msra.mxu1 %v7198_v31  ;;  %v278_v29 = vld [vmem:[#allocation5 + $0x6b8] sm:$0xff] }
 0x2f1   :  { %6603 = vmatprep.subr.bf16.mxu0 %v7213_v34  ;;  %6775 = vmatprep.subr.bf16.mxu1 %v7215_v36  ;;  %v286_v31 = vld [vmem:[#allocation5 + $0x6f8] sm:$0xff]  ;;  %v7308_v34 = vcombine.low %v261_v18, %v269_v19  ;;  %v7310_v36 = vcombine.low %v262_v20, %v270_v21  ;;  %v7405_v19 = vcombine.high %v357_v12, %v365_v13  ;;  %v373_v21 = vld [vmem:[#allocation5 + $0x9b0] sm:$0xff] }
 0x2f2   :  { %v7327_v38 = vcombine.high %v278_v29, %v286_v31 }
 0x2f4   :  { %6604 = vmatpush1.bf16.msra.mxu0 %v7212_v41  ;;  %6776 = vmatpush1.bf16.msra.mxu1 %v7214_v42  ;;  %v294_v41 = vld [vmem:[#allocation5 + $0x738] sm:$0xff] }
 0x2f5   :  { %6605 = vmatprep.subr.bf16.mxu0 %v7229_v43  ;;  %6777 = vmatprep.subr.bf16.mxu1 %v7231_v44  ;;  %v302_v42 = vld [vmem:[#allocation5 + $0x778] sm:$0xff]  ;;  %v7324_v43 = vcombine.low %v277_v26, %v285_v28  ;;  %v7326_v44 = vcombine.low %v278_v29, %v286_v31  ;;  %v7404_v26 = vcombine.low %v357_v12, %v365_v13 }
 0x2f6   :  { %v7343_v46 = vcombine.high %v294_v41, %v302_v42 }
 0x2f8   :  { %6606 = vmatpush1.bf16.msra.mxu0 %v7228_v49  ;;  %6778 = vmatpush1.bf16.msra.mxu1 %v7230_v50  ;;  %v310_v49 = vld [vmem:[#allocation5 + $0x7b8] sm:$0xff] }
 0x2f9   :  { %6607 = vmatprep.subr.bf16.mxu0 %v7245_v51  ;;  %6779 = vmatprep.subr.bf16.mxu1 %v7247_v52  ;;  %v318_v50 = vld [vmem:[#allocation5 + $0x7f8] sm:$0xff]  ;;  %v7340_v51 = vcombine.low %v293_v39, %v301_v40  ;;  %v7342_v52 = vcombine.low %v294_v41, %v302_v42 }
 0x2fa   :  { %v7359_v54 = vcombine.high %v310_v49, %v318_v50 }
 0x2fc   :  { %6608 = vmatpush1.bf16.msra.mxu0 %v7244_v58  ;;  %6780 = vmatpush1.bf16.msra.mxu1 %v7246_v59  ;;  %v326_v58 = vld [vmem:[#allocation5 + $0x838] sm:$0xff] }
 0x2fd   :  { %6609 = vmatprep.subr.bf16.mxu0 %v7261_v60  ;;  %6781 = vmatprep.subr.bf16.mxu1 %v7263_v61  ;;  %v334_v59 = vld [vmem:[#allocation5 + $0x878] sm:$0xff]  ;;  %v7356_v60 = vcombine.low %v309_v47, %v317_v48  ;;  %v7358_v61 = vcombine.low %v310_v49, %v318_v50 }
 0x2fe   :  { %v7375_v0 = vcombine.high %v326_v58, %v334_v59 }
 0x300   :  { %6610 = vmatpush1.bf16.msra.mxu0 %v7260_v3  ;;  %6782 = vmatpush1.bf16.msra.mxu1 %v7262_v6  ;;  %v342_v3 = vld [vmem:[#allocation5 + $0x8b8] sm:$0xff] }
 0x301   :  { %6611 = vmatprep.subr.bf16.mxu0 %v7277_v8  ;;  %6783 = vmatprep.subr.bf16.mxu1 %v7279_v9  ;;  %v350_v6 = vld [vmem:[#allocation5 + $0x8f8] sm:$0xff]  ;;  %v7372_v8 = vcombine.low %v325_v55, %v333_v57  ;;  %v7374_v9 = vcombine.low %v326_v58, %v334_v59 }
 0x302   :  { %v7391_v11 = vcombine.high %v342_v3, %v350_v6  ;;  %v7390_v18 = vcombine.low %v342_v3, %v350_v6 }
 0x304   :  { %6612 = vmatpush1.bf16.msra.mxu0 %v7276_v14  ;;  %6784 = vmatpush1.bf16.msra.mxu1 %v7278_v15  ;;  %v8259_v14 = vld [vmem:[#allocation2] ss:$28 sps:$4 sm:$0xff]   ;;  %v358_v15 = vld [vmem:[#allocation5 + $0x938] sm:$0xff] }
 0x305   :  { %6613 = vmatprep.subr.bf16.mxu0 %v7293_v16  ;;  %6785 = vmatprep.subr.bf16.mxu1 %v7295_v17  ;;  %v366_v16 = vld [vmem:[#allocation5 + $0x978] sm:$0xff]  ;;  %v7388_v17 = vcombine.low %v341_v1, %v349_v2 }
 0x306   :  { %v7407_v20 = vcombine.high %v358_v15, %v366_v16  ;;  %v7406_v28 = vcombine.low %v358_v15, %v366_v16  ;;  %v469_v16 = vld [vmem:[#allocation5 + $0xcb0] sm:$0xff] }
 0x308   :  { %6614 = vmatpush1.bf16.msra.mxu0 %v7292_v22  ;;  %6786 = vmatpush1.bf16.msra.mxu1 %v7294_v23  ;;  %v381_v22 = vld [vmem:[#allocation5 + $0x9f0] sm:$0xff] }
 0x309   :  { %6615 = vmatprep.subr.bf16.mxu0 %v7309_v24  ;;  %6787 = vmatprep.subr.bf16.mxu1 %v7311_v25  ;;  %v8260_v23 = vld [vmem:[#allocation2 + $0xc] ss:$28 sps:$4 sm:$0xff]   ;;  %v374_v24 = vld [vmem:[#allocation5 + $0x9b8] sm:$0xff]  ;;  %v7421_v29 = vcombine.high %v373_v21, %v381_v22  ;;  %v7420_v39 = vcombine.low %v373_v21, %v381_v22 }
 0x30a   :  { %v382_v25 = vld [vmem:[#allocation5 + $0x9f8] sm:$0xff] }
 0x30b   :  { %v7423_v31 = vcombine.high %v374_v24, %v382_v25  ;;  %v7422_v40 = vcombine.low %v374_v24, %v382_v25  ;;  %v485_v24 = vld [vmem:[#allocation5 + $0xd30] sm:$0xff] }
 0x30c   :  { %6616 = vmatpush1.bf16.msra.mxu0 %v7308_v34  ;;  %6788 = vmatpush1.bf16.msra.mxu1 %v7310_v36  ;;  %v389_v34 = vld [vmem:[#allocation5 + $0xa30] sm:$0xff] }
 0x30d   :  { %6617 = vmatprep.subr.bf16.mxu0 %v7325_v37  ;;  %6789 = vmatprep.subr.bf16.mxu1 %v7327_v38  ;;  %v397_v36 = vld [vmem:[#allocation5 + $0xa70] sm:$0xff]  ;;  %v390_v37 = vld [vmem:[#allocation5 + $0xa38] sm:$0xff] }
 0x30e   :  { %v398_v38 = vld [vmem:[#allocation5 + $0xa78] sm:$0xff]  ;;  %v7437_v41 = vcombine.high %v389_v34, %v397_v36  ;;  %v7436_v47 = vcombine.low %v389_v34, %v397_v36  ;;  %v493_v25 = vld [vmem:[#allocation5 + $0xd70] sm:$0xff] }
 0x30f   :  { %v7439_v42 = vcombine.high %v390_v37, %v398_v38  ;;  %v7438_v48 = vcombine.low %v390_v37, %v398_v38  ;;  %v7533_v34 = vcombine.high %v485_v24, %v493_v25  ;;  %v501_v37 = vld [vmem:[#allocation5 + $0xdb0] sm:$0xff] }
 0x310   :  { %6618 = vmatpush1.bf16.msra.mxu0 %v7324_v43  ;;  %6790 = vmatpush1.bf16.msra.mxu1 %v7326_v44  ;;  %v405_v43 = vld [vmem:[#allocation5 + $0xab0] sm:$0xff] }
 0x311   :  { %6619 = vmatprep.subr.bf16.mxu0 %v7341_v45  ;;  %6791 = vmatprep.subr.bf16.mxu1 %v7343_v46  ;;  %v413_v44 = vld [vmem:[#allocation5 + $0xaf0] sm:$0xff]  ;;  %v406_v45 = vld [vmem:[#allocation5 + $0xab8] sm:$0xff] }
 0x312   :  { %v414_v46 = vld [vmem:[#allocation5 + $0xaf8] sm:$0xff]  ;;  %v7453_v49 = vcombine.high %v405_v43, %v413_v44  ;;  %v7452_v55 = vcombine.low %v405_v43, %v413_v44  ;;  %v509_v38 = vld [vmem:[#allocation5 + $0xdf0] sm:$0xff] }
 0x313   :  { %v7455_v50 = vcombine.high %v406_v45, %v414_v46  ;;  %v7454_v57 = vcombine.low %v406_v45, %v414_v46  ;;  %v7549_v43 = vcombine.high %v501_v37, %v509_v38  ;;  %v517_v45 = vld [vmem:[#allocation5 + $0xe30] sm:$0xff] }
 0x314   :  { %6620 = vmatpush1.bf16.msra.mxu0 %v7340_v51  ;;  %6792 = vmatpush1.bf16.msra.mxu1 %v7342_v52  ;;  %v421_v51 = vld [vmem:[#allocation5 + $0xb30] sm:$0xff] }
 0x315   :  { %6621 = vmatprep.subr.bf16.mxu0 %v7357_v53  ;;  %6793 = vmatprep.subr.bf16.mxu1 %v7359_v54  ;;  %v429_v52 = vld [vmem:[#allocation5 + $0xb70] sm:$0xff]  ;;  %v422_v53 = vld [vmem:[#allocation5 + $0xb38] sm:$0xff] }
 0x316   :  { %v430_v54 = vld [vmem:[#allocation5 + $0xb78] sm:$0xff]  ;;  %v7469_v58 = vcombine.high %v421_v51, %v429_v52  ;;  %v7468_v1 = vcombine.low %v421_v51, %v429_v52  ;;  %v525_v46 = vld [vmem:[#allocation5 + $0xe70] sm:$0xff] }
 0x317   :  { %v7471_v59 = vcombine.high %v422_v53, %v430_v54  ;;  %v7470_v2 = vcombine.low %v422_v53, %v430_v54  ;;  %v7565_v51 = vcombine.high %v517_v45, %v525_v46  ;;  %v533_v53 = vld [vmem:[#allocation5 + $0xeb0] sm:$0xff] }
 0x318   :  { %6622 = vmatpush1.bf16.msra.mxu0 %v7356_v60  ;;  %6794 = vmatpush1.bf16.msra.mxu1 %v7358_v61  ;;  %v437_v60 = vld [vmem:[#allocation5 + $0xbb0] sm:$0xff] }
 0x319   :  { %6634 = vmatprep.subr.bf16.mxu0 %v7373_v62  ;;  %6806 = vmatprep.subr.bf16.mxu1 %v7375_v0  ;;  %v445_v61 = vld [vmem:[#allocation5 + $0xbf0] sm:$0xff]  ;;  %v438_v62 = vld [vmem:[#allocation5 + $0xbb8] sm:$0xff] }
 0x31a   :  { %v446_v0 = vld [vmem:[#allocation5 + $0xbf8] sm:$0xff]  ;;  %v7485_v3 = vcombine.high %v437_v60, %v445_v61  ;;  %v7484_v12 = vcombine.low %v437_v60, %v445_v61  ;;  %v541_v54 = vld [vmem:[#allocation5 + $0xef0] sm:$0xff] }
 0x31b   :  { %6624 = vmatmul.mubr.bf16.vlgmr.msra.gmra.mrb[12].mxu0 %v8259_v14  ;;  %6796 = vmatmul.mubr.bf16.vlgmr.msra.gmra.mrb[12].mxu1 %v8259_v14  ;;  %v7487_v6 = vcombine.high %v438_v62, %v446_v0  ;;  %v7486_v13 = vcombine.low %v438_v62, %v446_v0  ;;  %v7581_v60 = vcombine.high %v533_v53, %v541_v54  ;;  %v549_v62 = vld [vmem:[#allocation5 + $0xf30] sm:$0xff] }
 0x31c   :  { %6635 = vmatpush1.bf16.msra.mxu0 %v7372_v8  ;;  %6807 = vmatpush1.bf16.msra.mxu1 %v7374_v9  ;;  %v453_v8 = vld [vmem:[#allocation5 + $0xc30] sm:$0xff] }
 0x31d   :  { %6636 = vmatprep.subr.bf16.mxu0 %v7389_v10  ;;  %6808 = vmatprep.subr.bf16.mxu1 %v7391_v11  ;;  %v461_v9 = vld [vmem:[#allocation5 + $0xc70] sm:$0xff]  ;;  %v454_v10 = vld [vmem:[#allocation5 + $0xc38] sm:$0xff] }
 0x31e   :  { %6666 = vmatprep.mubr.bf16.mxu0 %v8260_v23  ;;  %6838 = vmatprep.mubr.bf16.mxu1 %v8260_v23  ;;  %v462_v11 = vld [vmem:[#allocation5 + $0xc78] sm:$0xff]  ;;  %v7501_v14 = vcombine.high %v453_v8, %v461_v9  ;;  %v557_v0 = vld [vmem:[#allocation5 + $0xf70] sm:$0xff] }
 0x31f   :  { %v7503_v15 = vcombine.high %v454_v10, %v462_v11  ;;  %v7502_v21 = vcombine.low %v454_v10, %v462_v11  ;;  %v565_v10 = vld [vmem:[#allocation5 + $0xfb0] sm:$0xff] }
 0x320   :  { %6637 = vmatpush1.bf16.msra.mxu0 %v7388_v17  ;;  %6809 = vmatpush1.bf16.msra.mxu1 %v7390_v18  ;;  %v477_v17 = vld [vmem:[#allocation5 + $0xcf0] sm:$0xff]  ;;  %v470_v18 = vld [vmem:[#allocation5 + $0xcb8] sm:$0xff] }
 0x321   :  { %6638 = vmatprep.subr.bf16.mxu0 %v7405_v19  ;;  %6810 = vmatprep.subr.bf16.mxu1 %v7407_v20  ;;  %v478_v19 = vld [vmem:[#allocation5 + $0xcf8] sm:$0xff]  ;;  %v7500_v20 = vcombine.low %v453_v8, %v461_v9  ;;  %v7517_v22 = vcombine.high %v469_v16, %v477_v17  ;;  %v7597_v8 = vcombine.high %v549_v62, %v557_v0  ;;  %v573_v11 = vld [vmem:[#allocation5 + $0xff0] sm:$0xff] }
 0x322   :  { %v7519_v23 = vcombine.high %v470_v18, %v478_v19 }
 0x324   :  { %6639 = vmatpush1.bf16.msra.mxu0 %v7404_v26  ;;  %6811 = vmatpush1.bf16.msra.mxu1 %v7406_v28  ;;  %v486_v26 = vld [vmem:[#allocation5 + $0xd38] sm:$0xff] }
 0x325   :  { %6640 = vmatprep.subr.bf16.mxu0 %v7421_v29  ;;  %6812 = vmatprep.subr.bf16.mxu1 %v7423_v31  ;;  %v494_v28 = vld [vmem:[#allocation5 + $0xd78] sm:$0xff]  ;;  %v7516_v29 = vcombine.low %v469_v16, %v477_v17  ;;  %v7518_v31 = vcombine.low %v470_v18, %v478_v19  ;;  %v7613_v16 = vcombine.high %v565_v10, %v573_v11  ;;  %v581_v18 = vld [vmem:[#allocation5 + $0x1030] sm:$0xff] }
 0x326   :  { %v7535_v36 = vcombine.high %v486_v26, %v494_v28  ;;  %v589_v19 = vld [vmem:[#allocation5 + $0x1070] sm:$0xff] }
 0x328   :  { %6641 = vmatpush1.bf16.msra.mxu0 %v7420_v39  ;;  %6813 = vmatpush1.bf16.msra.mxu1 %v7422_v40  ;;  %v502_v39 = vld [vmem:[#allocation5 + $0xdb8] sm:$0xff] }
 0x329   :  { %6642 = vmatprep.subr.bf16.mxu0 %v7437_v41  ;;  %6814 = vmatprep.subr.bf16.mxu1 %v7439_v42  ;;  %v510_v40 = vld [vmem:[#allocation5 + $0xdf8] sm:$0xff]  ;;  %v7532_v41 = vcombine.low %v485_v24, %v493_v25  ;;  %v7534_v42 = vcombine.low %v486_v26, %v494_v28  ;;  %v7629_v24 = vcombine.high %v581_v18, %v589_v19  ;;  %v597_v26 = vld [vmem:[#allocation5 + $0x10b0] sm:$0xff] }
 0x32a   :  { %v7551_v44 = vcombine.high %v502_v39, %v510_v40  ;;  %v605_v28 = vld [vmem:[#allocation5 + $0x10f0] sm:$0xff] }
 0x32c   :  { %6643 = vmatpush1.bf16.msra.mxu0 %v7436_v47  ;;  %6815 = vmatpush1.bf16.msra.mxu1 %v7438_v48  ;;  %v518_v47 = vld [vmem:[#allocation5 + $0xe38] sm:$0xff] }
 0x32d   :  { %6644 = vmatprep.subr.bf16.mxu0 %v7453_v49  ;;  %6816 = vmatprep.subr.bf16.mxu1 %v7455_v50  ;;  %v526_v48 = vld [vmem:[#allocation5 + $0xe78] sm:$0xff]  ;;  %v7548_v49 = vcombine.low %v501_v37, %v509_v38  ;;  %v7550_v50 = vcombine.low %v502_v39, %v510_v40  ;;  %v7645_v37 = vcombine.high %v597_v26, %v605_v28  ;;  %v613_v39 = vld [vmem:[#allocation5 + $0x1130] sm:$0xff] }
 0x32e   :  { %v7567_v52 = vcombine.high %v518_v47, %v526_v48  ;;  %v621_v40 = vld [vmem:[#allocation5 + $0x1170] sm:$0xff] }
 0x330   :  { %6645 = vmatpush1.bf16.msra.mxu0 %v7452_v55  ;;  %6817 = vmatpush1.bf16.msra.mxu1 %v7454_v57  ;;  %v534_v55 = vld [vmem:[#allocation5 + $0xeb8] sm:$0xff] }
 0x331   :  { %6646 = vmatprep.subr.bf16.mxu0 %v7469_v58  ;;  %6818 = vmatprep.subr.bf16.mxu1 %v7471_v59  ;;  %v542_v57 = vld [vmem:[#allocation5 + $0xef8] sm:$0xff]  ;;  %v7564_v58 = vcombine.low %v517_v45, %v525_v46  ;;  %v7566_v59 = vcombine.low %v518_v47, %v526_v48  ;;  %v7661_v46 = vcombine.high %v613_v39, %v621_v40  ;;  %v629_v48 = vld [vmem:[#allocation5 + $0x11b0] sm:$0xff] }
 0x332   :  { %v7583_v61 = vcombine.high %v534_v55, %v542_v57 }
 0x334   :  { %6647 = vmatpush1.bf16.msra.mxu0 %v7468_v1  ;;  %6819 = vmatpush1.bf16.msra.mxu1 %v7470_v2  ;;  %v550_v1 = vld [vmem:[#allocation5 + $0xf38] sm:$0xff] }
 0x335   :  { %6648 = vmatprep.subr.bf16.mxu0 %v7485_v3  ;;  %6820 = vmatprep.subr.bf16.mxu1 %v7487_v6  ;;  %v558_v2 = vld [vmem:[#allocation5 + $0xf78] sm:$0xff]  ;;  %v7580_v3 = vcombine.low %v533_v53, %v541_v54  ;;  %v7582_v6 = vcombine.low %v534_v55, %v542_v57  ;;  %v7660_v53 = vcombine.low %v613_v39, %v621_v40 }
 0x336   :  { %v7599_v9 = vcombine.high %v550_v1, %v558_v2 }
 0x338   :  { %6649 = vmatpush1.bf16.msra.mxu0 %v7484_v12  ;;  %6821 = vmatpush1.bf16.msra.mxu1 %v7486_v13  ;;  %v566_v12 = vld [vmem:[#allocation5 + $0xfb8] sm:$0xff] }
 0x339   :  { %6650 = vmatprep.subr.bf16.mxu0 %v7501_v14  ;;  %6822 = vmatprep.subr.bf16.mxu1 %v7503_v15  ;;  %v574_v13 = vld [vmem:[#allocation5 + $0xff8] sm:$0xff]  ;;  %v7596_v14 = vcombine.low %v549_v62, %v557_v0  ;;  %v7598_v15 = vcombine.low %v550_v1, %v558_v2 }
 0x33a   :  { %v7615_v17 = vcombine.high %v566_v12, %v574_v13 }
 0x33c   :  { %6651 = vmatpush1.bf16.msra.mxu0 %v7500_v20  ;;  %6823 = vmatpush1.bf16.msra.mxu1 %v7502_v21  ;;  %v582_v20 = vld [vmem:[#allocation5 + $0x1038] sm:$0xff] }
 0x33d   :  { %6652 = vmatprep.subr.bf16.mxu0 %v7517_v22  ;;  %6824 = vmatprep.subr.bf16.mxu1 %v7519_v23  ;;  %v590_v21 = vld [vmem:[#allocation5 + $0x1078] sm:$0xff]  ;;  %v7612_v22 = vcombine.low %v565_v10, %v573_v11  ;;  %v7614_v23 = vcombine.low %v566_v12, %v574_v13 }
 0x33e   :  { %v7631_v25 = vcombine.high %v582_v20, %v590_v21 }
 0x340   :  { %6653 = vmatpush1.bf16.msra.mxu0 %v7516_v29  ;;  %6825 = vmatpush1.bf16.msra.mxu1 %v7518_v31  ;;  %v598_v29 = vld [vmem:[#allocation5 + $0x10b8] sm:$0xff] }
 0x341   :  { %6654 = vmatprep.subr.bf16.mxu0 %v7533_v34  ;;  %6826 = vmatprep.subr.bf16.mxu1 %v7535_v36  ;;  %v606_v31 = vld [vmem:[#allocation5 + $0x10f8] sm:$0xff]  ;;  %v7628_v34 = vcombine.low %v581_v18, %v589_v19  ;;  %v7630_v36 = vcombine.low %v582_v20, %v590_v21 }
 0x342   :  { %v7647_v38 = vcombine.high %v598_v29, %v606_v31  ;;  %v7646_v45 = vcombine.low %v598_v29, %v606_v31 }
 0x344   :  { %6655 = vmatpush1.bf16.msra.mxu0 %v7532_v41  ;;  %6827 = vmatpush1.bf16.msra.mxu1 %v7534_v42  ;;  %v8261_v41 = vld [vmem:[#allocation2 + $0x8] ss:$28 sps:$4 sm:$0xff]   ;;  %v614_v42 = vld [vmem:[#allocation5 + $0x1138] sm:$0xff] }
 0x345   :  { %6656 = vmatprep.subr.bf16.mxu0 %v7549_v43  ;;  %6828 = vmatprep.subr.bf16.mxu1 %v7551_v44  ;;  %v622_v43 = vld [vmem:[#allocation5 + $0x1178] sm:$0xff]  ;;  %v7644_v44 = vcombine.low %v597_v26, %v605_v28 }
 0x346   :  { %v7663_v47 = vcombine.high %v614_v42, %v622_v43  ;;  %v7662_v54 = vcombine.low %v614_v42, %v622_v43  ;;  %v725_v43 = vld [vmem:[#allocation5 + $0x14b0] sm:$0xff] }
 0x348   :  { %6657 = vmatpush1.bf16.msra.mxu0 %v7548_v49  ;;  %6829 = vmatpush1.bf16.msra.mxu1 %v7550_v50  ;;  %v637_v49 = vld [vmem:[#allocation5 + $0x11f0] sm:$0xff]  ;;  %v8262_v50 = vld [vmem:[#allocation2 + $0x14] ss:$28 sps:$4 sm:$0xff]  }
 0x349   :  { %6658 = vmatprep.subr.bf16.mxu0 %v7565_v51  ;;  %6830 = vmatprep.subr.bf16.mxu1 %v7567_v52  ;;  %v630_v51 = vld [vmem:[#allocation5 + $0x11b8] sm:$0xff]  ;;  %v7677_v55 = vcombine.high %v629_v48, %v637_v49  ;;  %v7676_v62 = vcombine.low %v629_v48, %v637_v49 }
 0x34a   :  { %v638_v52 = vld [vmem:[#allocation5 + $0x11f8] sm:$0xff] }
 0x34b   :  { %v7679_v57 = vcombine.high %v630_v51, %v638_v52  ;;  %v7678_v0 = vcombine.low %v630_v51, %v638_v52  ;;  %v741_v51 = vld [vmem:[#allocation5 + $0x1530] sm:$0xff] }
 0x34c   :  { %6659 = vmatpush1.bf16.msra.mxu0 %v7564_v58  ;;  %6831 = vmatpush1.bf16.msra.mxu1 %v7566_v59  ;;  %v645_v58 = vld [vmem:[#allocation5 + $0x1230] sm:$0xff] }
 0x34d   :  { %6660 = vmatprep.subr.bf16.mxu0 %v7581_v60  ;;  %6832 = vmatprep.subr.bf16.mxu1 %v7583_v61  ;;  %v653_v59 = vld [vmem:[#allocation5 + $0x1270] sm:$0xff]  ;;  %v646_v60 = vld [vmem:[#allocation5 + $0x1238] sm:$0xff] }
 0x34e   :  { %v654_v61 = vld [vmem:[#allocation5 + $0x1278] sm:$0xff]  ;;  %v7693_v1 = vcombine.high %v645_v58, %v653_v59  ;;  %v7692_v10 = vcombine.low %v645_v58, %v653_v59  ;;  %v749_v52 = vld [vmem:[#allocation5 + $0x1570] sm:$0xff] }
 0x34f   :  { %v7695_v2 = vcombine.high %v646_v60, %v654_v61  ;;  %v7694_v11 = vcombine.low %v646_v60, %v654_v61  ;;  %v7789_v58 = vcombine.high %v741_v51, %v749_v52  ;;  %v757_v60 = vld [vmem:[#allocation5 + $0x15b0] sm:$0xff] }
 0x350   :  { %6661 = vmatpush1.bf16.msra.mxu0 %v7580_v3  ;;  %6833 = vmatpush1.bf16.msra.mxu1 %v7582_v6  ;;  %v661_v3 = vld [vmem:[#allocation5 + $0x12b0] sm:$0xff] }
 0x351   :  { %6662 = vmatprep.subr.bf16.mxu0 %v7597_v8  ;;  %6834 = vmatprep.subr.bf16.mxu1 %v7599_v9  ;;  %v669_v6 = vld [vmem:[#allocation5 + $0x12f0] sm:$0xff]  ;;  %v662_v8 = vld [vmem:[#allocation5 + $0x12b8] sm:$0xff] }
 0x352   :  { %v670_v9 = vld [vmem:[#allocation5 + $0x12f8] sm:$0xff]  ;;  %v7709_v12 = vcombine.high %v661_v3, %v669_v6  ;;  %v7708_v18 = vcombine.low %v661_v3, %v669_v6  ;;  %v765_v61 = vld [vmem:[#allocation5 + $0x15f0] sm:$0xff] }
 0x353   :  { %v7711_v13 = vcombine.high %v662_v8, %v670_v9  ;;  %v7710_v19 = vcombine.low %v662_v8, %v670_v9  ;;  %v7805_v3 = vcombine.high %v757_v60, %v765_v61  ;;  %v773_v8 = vld [vmem:[#allocation5 + $0x1630] sm:$0xff] }
 0x354   :  { %6663 = vmatpush1.bf16.msra.mxu0 %v7596_v14  ;;  %6835 = vmatpush1.bf16.msra.mxu1 %v7598_v15  ;;  %v677_v14 = vld [vmem:[#allocation5 + $0x1330] sm:$0xff] }
 0x355   :  { %6664 = vmatprep.subr.bf16.mxu0 %v7613_v16  ;;  %6836 = vmatprep.subr.bf16.mxu1 %v7615_v17  ;;  %v685_v15 = vld [vmem:[#allocation5 + $0x1370] sm:$0xff]  ;;  %v678_v16 = vld [vmem:[#allocation5 + $0x1338] sm:$0xff] }
 0x356   :  { %v686_v17 = vld [vmem:[#allocation5 + $0x1378] sm:$0xff]  ;;  %v7725_v20 = vcombine.high %v677_v14, %v685_v15  ;;  %v7724_v26 = vcombine.low %v677_v14, %v685_v15  ;;  %v781_v9 = vld [vmem:[#allocation5 + $0x1670] sm:$0xff] }
 0x357   :  { %v7727_v21 = vcombine.high %v678_v16, %v686_v17  ;;  %v7726_v28 = vcombine.low %v678_v16, %v686_v17  ;;  %v7821_v14 = vcombine.high %v773_v8, %v781_v9  ;;  %v789_v16 = vld [vmem:[#allocation5 + $0x16b0] sm:$0xff] }
 0x358   :  { %6665 = vmatpush1.bf16.msra.mxu0 %v7612_v22  ;;  %6837 = vmatpush1.bf16.msra.mxu1 %v7614_v23  ;;  %v693_v22 = vld [vmem:[#allocation5 + $0x13b0] sm:$0xff] }
 0x359   :  { %6677 = vmatprep.subr.bf16.mxu0 %v7629_v24  ;;  %6849 = vmatprep.subr.bf16.mxu1 %v7631_v25  ;;  %v701_v23 = vld [vmem:[#allocation5 + $0x13f0] sm:$0xff]  ;;  %v694_v24 = vld [vmem:[#allocation5 + $0x13b8] sm:$0xff] }
 0x35a   :  { %v702_v25 = vld [vmem:[#allocation5 + $0x13f8] sm:$0xff]  ;;  %v7741_v29 = vcombine.high %v693_v22, %v701_v23  ;;  %v7740_v39 = vcombine.low %v693_v22, %v701_v23  ;;  %v797_v17 = vld [vmem:[#allocation5 + $0x16f0] sm:$0xff] }
 0x35b   :  { %6667 = vmatmul.mubr.bf16.vlgmr.msra.gmra.mrb[12].mxu0 %v8261_v41  ;;  %6839 = vmatmul.mubr.bf16.vlgmr.msra.gmra.mrb[12].mxu1 %v8261_v41  ;;  %v7743_v31 = vcombine.high %v694_v24, %v702_v25  ;;  %v7742_v40 = vcombine.low %v694_v24, %v702_v25  ;;  %v7837_v22 = vcombine.high %v789_v16, %v797_v17  ;;  %v805_v24 = vld [vmem:[#allocation5 + $0x1730] sm:$0xff] }
 0x35c   :  { %6678 = vmatpush1.bf16.msra.mxu0 %v7628_v34  ;;  %6850 = vmatpush1.bf16.msra.mxu1 %v7630_v36  ;;  %v709_v34 = vld [vmem:[#allocation5 + $0x1430] sm:$0xff] }
 0x35d   :  { %6679 = vmatprep.subr.bf16.mxu0 %v7645_v37  ;;  %6851 = vmatprep.subr.bf16.mxu1 %v7647_v38  ;;  %v717_v36 = vld [vmem:[#allocation5 + $0x1470] sm:$0xff]  ;;  %v710_v37 = vld [vmem:[#allocation5 + $0x1438] sm:$0xff] }
 0x35e   :  { %6709 = vmatprep.mubr.bf16.mxu0 %v8262_v50  ;;  %6881 = vmatprep.mubr.bf16.mxu1 %v8262_v50  ;;  %v718_v38 = vld [vmem:[#allocation5 + $0x1478] sm:$0xff]  ;;  %v7757_v41 = vcombine.high %v709_v34, %v717_v36  ;;  %v813_v25 = vld [vmem:[#allocation5 + $0x1770] sm:$0xff] }
 0x35f   :  { %v7759_v42 = vcombine.high %v710_v37, %v718_v38  ;;  %v7758_v48 = vcombine.low %v710_v37, %v718_v38  ;;  %v821_v37 = vld [vmem:[#allocation5 + $0x17b0] sm:$0xff] }
 0x360   :  { %6680 = vmatpush1.bf16.msra.mxu0 %v7644_v44  ;;  %6852 = vmatpush1.bf16.msra.mxu1 %v7646_v45  ;;  %v733_v44 = vld [vmem:[#allocation5 + $0x14f0] sm:$0xff]  ;;  %v726_v45 = vld [vmem:[#allocation5 + $0x14b8] sm:$0xff] }
 0x361   :  { %6681 = vmatprep.subr.bf16.mxu0 %v7661_v46  ;;  %6853 = vmatprep.subr.bf16.mxu1 %v7663_v47  ;;  %v734_v46 = vld [vmem:[#allocation5 + $0x14f8] sm:$0xff]  ;;  %v7756_v47 = vcombine.low %v709_v34, %v717_v36  ;;  %v7773_v49 = vcombine.high %v725_v43, %v733_v44  ;;  %v7853_v34 = vcombine.high %v805_v24, %v813_v25  ;;  %v829_v38 = vld [vmem:[#allocation5 + $0x17f0] sm:$0xff] }
 0x362   :  { %v7775_v50 = vcombine.high %v726_v45, %v734_v46 }
 0x364   :  { %6682 = vmatpush1.bf16.msra.mxu0 %v7660_v53  ;;  %6854 = vmatpush1.bf16.msra.mxu1 %v7662_v54  ;;  %v742_v53 = vld [vmem:[#allocation5 + $0x1538] sm:$0xff] }
 0x365   :  { %6683 = vmatprep.subr.bf16.mxu0 %v7677_v55  ;;  %6855 = vmatprep.subr.bf16.mxu1 %v7679_v57  ;;  %v750_v54 = vld [vmem:[#allocation5 + $0x1578] sm:$0xff]  ;;  %v7772_v55 = vcombine.low %v725_v43, %v733_v44  ;;  %v7774_v57 = vcombine.low %v726_v45, %v734_v46  ;;  %v7869_v43 = vcombine.high %v821_v37, %v829_v38  ;;  %v837_v45 = vld [vmem:[#allocation5 + $0x1830] sm:$0xff] }
 0x366   :  { %v7791_v59 = vcombine.high %v742_v53, %v750_v54  ;;  %v845_v46 = vld [vmem:[#allocation5 + $0x1870] sm:$0xff] }
 0x368   :  { %6684 = vmatpush1.bf16.msra.mxu0 %v7676_v62  ;;  %6856 = vmatpush1.bf16.msra.mxu1 %v7678_v0  ;;  %v758_v62 = vld [vmem:[#allocation5 + $0x15b8] sm:$0xff] }
 0x369   :  { %6685 = vmatprep.subr.bf16.mxu0 %v7693_v1  ;;  %6857 = vmatprep.subr.bf16.mxu1 %v7695_v2  ;;  %v766_v0 = vld [vmem:[#allocation5 + $0x15f8] sm:$0xff]  ;;  %v7788_v1 = vcombine.low %v741_v51, %v749_v52  ;;  %v7790_v2 = vcombine.low %v742_v53, %v750_v54  ;;  %v7885_v51 = vcombine.high %v837_v45, %v845_v46  ;;  %v853_v53 = vld [vmem:[#allocation5 + $0x18b0] sm:$0xff] }
 0x36a   :  { %v7807_v6 = vcombine.high %v758_v62, %v766_v0  ;;  %v861_v54 = vld [vmem:[#allocation5 + $0x18f0] sm:$0xff] }
 0x36c   :  { %6686 = vmatpush1.bf16.msra.mxu0 %v7692_v10  ;;  %6858 = vmatpush1.bf16.msra.mxu1 %v7694_v11  ;;  %v774_v10 = vld [vmem:[#allocation5 + $0x1638] sm:$0xff] }
 0x36d   :  { %6687 = vmatprep.subr.bf16.mxu0 %v7709_v12  ;;  %6859 = vmatprep.subr.bf16.mxu1 %v7711_v13  ;;  %v782_v11 = vld [vmem:[#allocation5 + $0x1678] sm:$0xff]  ;;  %v7804_v12 = vcombine.low %v757_v60, %v765_v61  ;;  %v7806_v13 = vcombine.low %v758_v62, %v766_v0  ;;  %v7901_v60 = vcombine.high %v853_v53, %v861_v54  ;;  %v869_v62 = vld [vmem:[#allocation5 + $0x1930] sm:$0xff] }
 0x36e   :  { %v7823_v15 = vcombine.high %v774_v10, %v782_v11  ;;  %v877_v0 = vld [vmem:[#allocation5 + $0x1970] sm:$0xff] }
 0x370   :  { %6688 = vmatpush1.bf16.msra.mxu0 %v7708_v18  ;;  %6860 = vmatpush1.bf16.msra.mxu1 %v7710_v19  ;;  %v790_v18 = vld [vmem:[#allocation5 + $0x16b8] sm:$0xff] }
 0x371   :  { %6689 = vmatprep.subr.bf16.mxu0 %v7725_v20  ;;  %6861 = vmatprep.subr.bf16.mxu1 %v7727_v21  ;;  %v798_v19 = vld [vmem:[#allocation5 + $0x16f8] sm:$0xff]  ;;  %v7820_v20 = vcombine.low %v773_v8, %v781_v9  ;;  %v7822_v21 = vcombine.low %v774_v10, %v782_v11  ;;  %v7917_v9 = vcombine.high %v869_v62, %v877_v0  ;;  %v885_v11 = vld [vmem:[#allocation5 + $0x19b0] sm:$0xff] }
 0x372   :  { %v7839_v23 = vcombine.high %v790_v18, %v798_v19 }
 0x374   :  { %6690 = vmatpush1.bf16.msra.mxu0 %v7724_v26  ;;  %6862 = vmatpush1.bf16.msra.mxu1 %v7726_v28  ;;  %v806_v26 = vld [vmem:[#allocation5 + $0x1738] sm:$0xff] }
 0x375   :  { %6691 = vmatprep.subr.bf16.mxu0 %v7741_v29  ;;  %6863 = vmatprep.subr.bf16.mxu1 %v7743_v31  ;;  %v814_v28 = vld [vmem:[#allocation5 + $0x1778] sm:$0xff]  ;;  %v7836_v29 = vcombine.low %v789_v16, %v797_v17  ;;  %v7838_v31 = vcombine.low %v790_v18, %v798_v19  ;;  %v901_v19 = vld [vmem:[#allocation5 + $0x1a30] sm:$0xff] }
 0x376   :  { %v7855_v36 = vcombine.high %v806_v26, %v814_v28 }
 0x378   :  { %6692 = vmatpush1.bf16.msra.mxu0 %v7740_v39  ;;  %6864 = vmatpush1.bf16.msra.mxu1 %v7742_v40  ;;  %v822_v39 = vld [vmem:[#allocation5 + $0x17b8] sm:$0xff] }
 0x379   :  { %6693 = vmatprep.subr.bf16.mxu0 %v7757_v41  ;;  %6865 = vmatprep.subr.bf16.mxu1 %v7759_v42  ;;  %v830_v40 = vld [vmem:[#allocation5 + $0x17f8] sm:$0xff]  ;;  %v7852_v41 = vcombine.low %v805_v24, %v813_v25  ;;  %v7854_v42 = vcombine.low %v806_v26, %v814_v28  ;;  %v917_v26 = vld [vmem:[#allocation5 + $0x1ab0] sm:$0xff] }
 0x37a   :  { %v7871_v44 = vcombine.high %v822_v39, %v830_v40  ;;  %v925_v28 = vld [vmem:[#allocation5 + $0x1af0] sm:$0xff] }
 0x37c   :  { %6694 = vmatpush1.bf16.msra.mxu0 %v7756_v47  ;;  %6866 = vmatpush1.bf16.msra.mxu1 %v7758_v48  ;;  %v838_v47 = vld [vmem:[#allocation5 + $0x1838] sm:$0xff] }
 0x37d   :  { %6695 = vmatprep.subr.bf16.mxu0 %v7773_v49  ;;  %6867 = vmatprep.subr.bf16.mxu1 %v7775_v50  ;;  %v846_v48 = vld [vmem:[#allocation5 + $0x1878] sm:$0xff]  ;;  %v7868_v49 = vcombine.low %v821_v37, %v829_v38  ;;  %v7870_v50 = vcombine.low %v822_v39, %v830_v40  ;;  %v7965_v38 = vcombine.high %v917_v26, %v925_v28  ;;  %v933_v40 = vld [vmem:[#allocation5 + $0x1b30] sm:$0xff] }
 0x37e   :  { %v7887_v52 = vcombine.high %v838_v47, %v846_v48 }
 0x380   :  { %6696 = vmatpush1.bf16.msra.mxu0 %v7772_v55  ;;  %6868 = vmatpush1.bf16.msra.mxu1 %v7774_v57  ;;  %v854_v55 = vld [vmem:[#allocation5 + $0x18b8] sm:$0xff] }
 0x381   :  { %6697 = vmatprep.subr.bf16.mxu0 %v7789_v58  ;;  %6869 = vmatprep.subr.bf16.mxu1 %v7791_v59  ;;  %v862_v57 = vld [vmem:[#allocation5 + $0x18f8] sm:$0xff]  ;;  %v7884_v58 = vcombine.low %v837_v45, %v845_v46  ;;  %v7886_v59 = vcombine.low %v838_v47, %v846_v48  ;;  %v7964_v47 = vcombine.low %v917_v26, %v925_v28 }
 0x382   :  { %v7903_v61 = vcombine.high %v854_v55, %v862_v57  ;;  %v7902_v8 = vcombine.low %v854_v55, %v862_v57  ;;  %v950_v57 = vld [vmem:[#allocation5 + $0x1bb8] sm:$0xff] }
 0x384   :  { %6698 = vmatpush1.bf16.msra.mxu0 %v7788_v1  ;;  %6870 = vmatpush1.bf16.msra.mxu1 %v7790_v2  ;;  %v8263_v1 = vld [vmem:[#allocation2 + $0x10] ss:$28 sps:$4 sm:$0xff]  }
 0x385   :  { %6699 = vmatprep.subr.bf16.mxu0 %v7805_v3  ;;  %6871 = vmatprep.subr.bf16.mxu1 %v7807_v6  ;;  %v870_v2 = vld [vmem:[#allocation5 + $0x1938] sm:$0xff]  ;;  %v7900_v6 = vcombine.low %v853_v53, %v861_v54  ;;  %v957_v53 = vld [vmem:[#allocation5 + $0x1bf0] sm:$0xff] }
 0x386   :  { %v878_v3 = vld [vmem:[#allocation5 + $0x1978] sm:$0xff] }
 0x387   :  { %v7919_v10 = vcombine.high %v870_v2, %v878_v3  ;;  %v7918_v16 = vcombine.low %v870_v2, %v878_v3 }
 0x388   :  { %6700 = vmatpush1.bf16.msra.mxu0 %v7804_v12  ;;  %6872 = vmatpush1.bf16.msra.mxu1 %v7806_v13  ;;  %v893_v12 = vld [vmem:[#allocation5 + $0x19f0] sm:$0xff]  ;;  %v886_v13 = vld [vmem:[#allocation5 + $0x19b8] sm:$0xff] }
 0x389   :  { %6701 = vmatprep.subr.bf16.mxu0 %v7821_v14  ;;  %6873 = vmatprep.subr.bf16.mxu1 %v7823_v15  ;;  %v894_v14 = vld [vmem:[#allocation5 + $0x19f8] sm:$0xff]  ;;  %v7916_v15 = vcombine.low %v869_v62, %v877_v0  ;;  %v7933_v17 = vcombine.high %v885_v11, %v893_v12 }
 0x38a   :  { %v7935_v18 = vcombine.high %v886_v13, %v894_v14  ;;  %v7934_v24 = vcombine.low %v886_v13, %v894_v14 }
 0x38c   :  { %6702 = vmatpush1.bf16.msra.mxu0 %v7820_v20  ;;  %6874 = vmatpush1.bf16.msra.mxu1 %v7822_v21  ;;  %v909_v20 = vld [vmem:[#allocation5 + $0x1a70] sm:$0xff]  ;;  %v902_v21 = vld [vmem:[#allocation5 + $0x1a38] sm:$0xff] }
 0x38d   :  { %6703 = vmatprep.subr.bf16.mxu0 %v7837_v22  ;;  %6875 = vmatprep.subr.bf16.mxu1 %v7839_v23  ;;  %v910_v22 = vld [vmem:[#allocation5 + $0x1a78] sm:$0xff]  ;;  %v7932_v23 = vcombine.low %v885_v11, %v893_v12  ;;  %v7949_v25 = vcombine.high %v901_v19, %v909_v20 }
 0x38e   :  { %v7950_v37 = vcombine.low %v902_v21, %v910_v22 }
 0x390   :  { %6704 = vmatpush1.bf16.msra.mxu0 %v7836_v29  ;;  %6876 = vmatpush1.bf16.msra.mxu1 %v7838_v31  ;;  %v918_v29 = vld [vmem:[#allocation5 + $0x1ab8] sm:$0xff] }
 0x391   :  { %6705 = vmatprep.subr.bf16.mxu0 %v7853_v34  ;;  %6877 = vmatprep.subr.bf16.mxu1 %v7855_v36  ;;  %v926_v31 = vld [vmem:[#allocation5 + $0x1af8] sm:$0xff]  ;;  %v7948_v34 = vcombine.low %v901_v19, %v909_v20  ;;  %v8461_v36 = vld [vmem:[#allocation7 + $0x8] sm:$0xff] }
 0x392   :  { %v7967_v39 = vcombine.high %v918_v29, %v926_v31  ;;  %v1006_v45 = vrot.slane %v8461_v36, %v973_v4  ;;  %v1002_v46 = vrot.slane %v8461_v36, %v969_v5  ;;  %v1010_v48 = vrot.slane %v8461_v36, %v977_v7 }
 0x393   :  { %v1014_v28 = vrot.slane %v8461_v36, %v981_v27 }
 0x394   :  { %6706 = vmatpush1.bf16.msra.mxu0 %v7852_v41  ;;  %6878 = vmatpush1.bf16.msra.mxu1 %v7854_v42  ;;  %v941_v41 = vld [vmem:[#allocation5 + $0x1b70] sm:$0xff]  ;;  %v998_v42 = vrot.slane %v8461_v36, %v965_v63 }
 0x395   :  { %6707 = vmatprep.subr.bf16.mxu0 %v7869_v43  ;;  %6879 = vmatprep.subr.bf16.mxu1 %v7871_v44  ;;  %v934_v43 = vld [vmem:[#allocation5 + $0x1b38] sm:$0xff]  ;;  %v7981_v63 = vcombine.high %v933_v40, %v941_v41  ;;  %v7980_v62 = vcombine.low %v933_v40, %v941_v41 }
 0x396   :  { %v942_v44 = vld [vmem:[#allocation5 + $0x1b78] sm:$0xff] }
 0x397   :  { %v7982_v7 = vcombine.low %v934_v43, %v942_v44 }
 0x398   :  { %6708 = vmatpush1.bf16.msra.mxu0 %v7868_v49  ;;  %6880 = vmatpush1.bf16.msra.mxu1 %v7870_v50  ;;  %v7966_v49 = vcombine.low %v918_v29, %v926_v31  ;;  %v1022_v29 = vrot.slane %v8461_v36, %v989_v32  ;;  %v1018_v31 = vrot.slane %v8461_v36, %v985_v33 }
 0x399   :  { %6720 = vmatprep.subr.bf16.mxu0 %v7885_v51  ;;  %6892 = vmatprep.subr.bf16.mxu1 %v7887_v52  ;;  %v7983_v51 = vcombine.high %v934_v43, %v942_v44  ;;  %v949_v52 = vld [vmem:[#allocation5 + $0x1bb0] sm:$0xff] }
 0x39a   :  { %v7996_v13 = vcombine.low %v949_v52, %v957_v53 }
 0x39b   :  { %6710 = vmatmul.mubr.bf16.vlgmr.msra.gmra.mrb[12].mxu0 %v8263_v1  ;;  %6882 = vmatmul.mubr.bf16.vlgmr.msra.gmra.mrb[12].mxu1 %v8263_v1 }
 0x39c   :  { %6721 = vmatpush1.bf16.msra.mxu0 %v7884_v58  ;;  %6893 = vmatpush1.bf16.msra.mxu1 %v7886_v59  ;;  %v958_v58 = vld [vmem:[#allocation5 + $0x1bf8] sm:$0xff] }
 0x39d   :  { %6722 = vmatprep.subr.bf16.mxu0 %v7901_v60  ;;  %6894 = vmatprep.subr.bf16.mxu1 %v7903_v61  ;;  %v7998_v14 = vcombine.low %v950_v57, %v958_v58 }
 0x39e   :  { %6752 = vmatprep.mubr.bf16.mxu0 %v8366_v30  ;;  %6924 = vmatprep.mubr.bf16.mxu1 %v8366_v30  ;;  %v7951_v30 = vcombine.high %v902_v21, %v910_v22 }
 0x3a0   :  { %6723 = vmatpush1.bf16.msra.mxu0 %v7900_v6  ;;  %6895 = vmatpush1.bf16.msra.mxu1 %v7902_v8  ;;  %v7997_v6 = vcombine.high %v949_v52, %v957_v53 }
 0x3a1   :  { %6724 = vmatprep.subr.bf16.mxu0 %v7917_v9  ;;  %6896 = vmatprep.subr.bf16.mxu1 %v7919_v10  ;;  %v7999_v10 = vcombine.high %v950_v57, %v958_v58 }
 0x3a4   :  { %6725 = vmatpush1.bf16.msra.mxu0 %v7916_v15  ;;  %6897 = vmatpush1.bf16.msra.mxu1 %v7918_v16  ;;  %v8264_v16 = vld [vmem:[#allocation2 + $0x18] ss:$28 sps:$4 sm:$0xff]  }
 0x3a5   :  { %6726 = vmatprep.subr.bf16.mxu0 %v7933_v17  ;;  %6898 = vmatprep.subr.bf16.mxu1 %v7935_v18 }
 0x3a8   :  { %6727 = vmatpush1.bf16.msra.mxu0 %v7932_v23  ;;  %6899 = vmatpush1.bf16.msra.mxu1 %v7934_v24 }
 0x3a9   :  { %6728 = vmatprep.subr.bf16.mxu0 %v7949_v25  ;;  %6900 = vmatprep.subr.bf16.mxu1 %v7951_v30 }
 0x3ac   :  { %6729 = vmatpush1.bf16.msra.mxu0 %v7948_v34  ;;  %6901 = vmatpush1.bf16.msra.mxu1 %v7950_v37  ;;  %v1026_v34 = vrot.slane %v8461_v36, %v993_v35 }
 0x3ad   :  { %6730 = vmatprep.subr.bf16.mxu0 %v7965_v38  ;;  %6902 = vmatprep.subr.bf16.mxu1 %v7967_v39 }
 0x3ae   :  { %v6410_v50 = vpop.f32.mrb[8].mxu0  ;;  %v6582_v4 = vpop.f32.mrb[8].mxu1 }
 0x3af   :  { %v8048_v54 = vadd.f32 %v6410_v50, %v998_v42  ;;  %v6412_v55 = vpop.f32.mrb[9].mxu0  ;;  %v8052_v5 = vadd.f32 %v6582_v4, %v1006_v45  ;;  %v6584_v60 = vpop.f32.mrb[9].mxu1 }
 0x3b0   :  { %v8049_v59 = vadd.f32 %v6412_v55, %v1002_v46  ;;  %v6414_v61 = vpop.f32.mrb[10].mxu0  ;;  %6731 = vmatpush1.bf16.msra.mxu0 %v7964_v47  ;;  %v8053_v0 = vadd.f32 %v6584_v60, %v1010_v48  ;;  %v6586_v2 = vpop.f32.mrb[10].mxu1  ;;  %6903 = vmatpush1.bf16.msra.mxu1 %v7966_v49 }
 0x3b1   :  { %8211 = vtanh.f32 %v8048_v54  ;;  %v8050_v1 = vadd.f32 %v6414_v61, %v998_v42  ;;  %v6416_v3 = vpop.f32.mrb[11].mxu0  ;;  %6732 = vmatprep.subr.bf16.mxu0 %v7981_v63  ;;  %v8054_v8 = vadd.f32 %v6586_v2, %v1006_v45  ;;  %v6588_v9 = vpop.f32.mrb[11].mxu1  ;;  %6904 = vmatprep.subr.bf16.mxu1 %v7983_v51 }
 0x3b2   :  { %8213 = vtanh.f32 %v8052_v5  ;;  %v8051_v11 = vadd.f32 %v6416_v3, %v1002_v46  ;;  %v8055_v12 = vadd.f32 %v6588_v9, %v1010_v48 }
 0x3b3   :  { %8215 = vtanh.f32 %v8049_v59 }
 0x3b4   :  { %8217 = vtanh.f32 %v8053_v0  ;;  %6733 = vmatpush1.bf16.msra.mxu0 %v7980_v62  ;;  %6905 = vmatpush1.bf16.msra.mxu1 %v7982_v7 }
 0x3b5   :  { %8219 = vtanh.f32 %v8050_v1  ;;  %6734 = vmatprep.subr.bf16.mxu0 %v7997_v6  ;;  %6906 = vmatprep.subr.bf16.mxu1 %v7999_v10 }
 0x3b6   :  { %8221 = vtanh.f32 %v8054_v8 }
 0x3b7   :  { %8223 = vtanh.f32 %v8051_v11 }
 0x3b8   :  { %8225 = vtanh.f32 %v8055_v12  ;;  %6735 = vmatpush1.bf16.msra.mxu0 %v7996_v13  ;;  %6907 = vmatpush1.bf16.msra.mxu1 %v7998_v14 }
 0x3bb   :  { %v8212_v15 = vpop.eup %8211  ;;  %6753 = vmatmul.mubr.bf16.vlgmr.msra.gmra.mrb[12].mxu0 %v8264_v16  ;;  %6925 = vmatmul.mubr.bf16.vlgmr.msra.gmra.mrb[12].mxu1 %v8264_v16 }
 0x3bc   :  { %v8214_v17 = vpop.eup %8213 }
 0x3bd   :  { %v8216_v18 = vpop.eup %8215 }
 0x3be   :  { %v8218_v19 = vpop.eup %8217  ;;  %v8020_v20 = vpack.c.bf16 %v8216_v18, %v8212_v15 }
 0x3bf   :  { %v8220_v21 = vpop.eup %8219  ;;  %v8021_v22 = vpack.c.bf16 %v8218_v19, %v8214_v17 }
 0x3c0   :  { %v8222_v23 = vpop.eup %8221  ;;  %7067 = vst [vmem:[#allocation8 + $0x20] sm:$0xff] %v8020_v20 }
 0x3c1   :  { %v8224_v24 = vpop.eup %8223  ;;  %7068 = vst [vmem:[#allocation8 + $0x28] sm:$0xff] %v8021_v22 }
 0x3c2   :  { %v8226_v25 = vpop.eup %8225  ;;  %v8028_v30 = vpack.c.bf16 %v8224_v24, %v8220_v21 }
 0x3c3   :  { %v8029_v26 = vpack.c.bf16 %v8226_v25, %v8222_v23 }
 0x3c4   :  { %7075 = vst [vmem:[#allocation8 + $0x60] sm:$0xff] %v8028_v30 }
 0x3c5   :  { %7076 = vst [vmem:[#allocation8 + $0x68] sm:$0xff] %v8029_v26 }
 0x48e   :  { %v6754_v37 = vpop.f32.mrb[12].mxu0  ;;  %v6926_v39 = vpop.f32.mrb[12].mxu1 }
 0x48f   :  { %v8056_v38 = vadd.f32 %v6754_v37, %v1014_v28  ;;  %v6756_v40 = vpop.f32.mrb[13].mxu0  ;;  %v8060_v41 = vadd.f32 %v6926_v39, %v1022_v29  ;;  %v6928_v43 = vpop.f32.mrb[13].mxu1 }
 0x490   :  { %v8057_v42 = vadd.f32 %v6756_v40, %v1018_v31  ;;  %v6758_v27 = vpop.f32.mrb[14].mxu0  ;;  %v8061_v44 = vadd.f32 %v6928_v43, %v1026_v34  ;;  %v6930_v32 = vpop.f32.mrb[14].mxu1 }
 0x491   :  { %8227 = vtanh.f32 %v8056_v38  ;;  %v8058_v45 = vadd.f32 %v6758_v27, %v1014_v28  ;;  %v6760_v46 = vpop.f32.mrb[15].mxu0  ;;  %v8062_v47 = vadd.f32 %v6930_v32, %v1022_v29  ;;  %v6932_v33 = vpop.f32.mrb[15].mxu1 }
 0x492   :  { %8229 = vtanh.f32 %v8060_v41  ;;  %v8059_v56 = vadd.f32 %v6760_v46, %v1018_v31  ;;  %v8063_v35 = vadd.f32 %v6932_v33, %v1026_v34 }
 0x493   :  { %8231 = vtanh.f32 %v8057_v42 }
 0x494   :  { %8233 = vtanh.f32 %v8061_v44 }
 0x495   :  { %8235 = vtanh.f32 %v8058_v45 }
 0x496   :  { %8237 = vtanh.f32 %v8062_v47 }
 0x497   :  { %8239 = vtanh.f32 %v8059_v56 }
 0x498   :  { %8241 = vtanh.f32 %v8063_v35 }
 0x49b   :  { %v8228_v36 = vpop.eup %8227 }
 0x49c   :  { %v8230_v48 = vpop.eup %8229 }
 0x49d   :  { %v8232_v49 = vpop.eup %8231 }
 0x49e   :  { %v8234_v63 = vpop.eup %8233  ;;  %v8022_v50 = vpack.c.bf16 %v8232_v49, %v8228_v36 }
 0x49f   :  { %v8236_v51 = vpop.eup %8235  ;;  %v8023_v52 = vpack.c.bf16 %v8234_v63, %v8230_v48 }
 0x4a0   :  { %v8238_v53 = vpop.eup %8237  ;;  %7069 = vst [vmem:[#allocation8 + $0x30] sm:$0xff] %v8022_v50 }
 0x4a1   :  { %v8240_v54 = vpop.eup %8239  ;;  %7070 = vst [vmem:[#allocation8 + $0x38] sm:$0xff] %v8023_v52 }
 0x4a2   :  { %v8242_v4 = vpop.eup %8241  ;;  %v8030_v55 = vpack.c.bf16 %v8240_v54, %v8236_v51 }
 0x4a3   :  { %v8031_v57 = vpack.c.bf16 %v8242_v4, %v8238_v53 }
 0x4a4   :  { %7077 = vst [vmem:[#allocation8 + $0x70] sm:$0xff] %v8030_v55 }
 0x4a5   :  { %7078 = vst [vmem:[#allocation8 + $0x78] sm:$0xff] %v8031_v57 }
 0x4a6   :  { %8342 = shalt.err (!%p8339_p0)
}
 0x4a7   :  { %s8343_s29 = scalar_lea.hbm %s8505_s3, 2048 }
 0x4a8   :  { %p8344_p1 = scmp.ne.s32.totalorder %s8505_s3, %s8343_s29  ;;  %p8347_p2 = scmp.lt.u32.totalorder %s8343_s29, %s8505_s3 }
 0x4aa   :  { %p8349_p3 = pnand %p8347_p2, %p8344_p1 }
 0x4ac   :  { %8352 = shalt.err (!%p8349_p3)
}
 0x4ad   :  { %7090 = dma.vmem_to_hbm [thread:$0]  %s7085_s25, 2048, %s8505_s3, [#allocation4], %s8360_s22, %s8360_s22, %s8361_s23  }
 0x4ae   :  { %8357 = dma.done.wait [#allocation4], 2048  }
 0x4af   :  { %8358 = vsyncadd [#allocation4], 4294965248 }
 0x4b0   :  { %7094 = vsyncpa [#allocation3], 1 }
 0x4b1   :  { %7095 = vsyncpa [#allocation6], 1 }
 0x4b2   :  { %7096 = vsyncpa [#allocation4], 1 }

</bundles_post_ra>
